<compile_context>
chip_gen: v5e
topology: v5e:2x2
jax: 0.10.0
libtpu: 0.0.40
codegen_flags: <defaults>
</compile_context>

<pallas_src>
import functools

import jax
import jax.numpy as jnp
from jax import lax
from jax.experimental import pallas as pl
from jax.experimental.pallas import tpu as pltpu


# ----------------------------------------------------------------------------
# Fused Pallas kernel
# ----------------------------------------------------------------------------
def rnn_fused_kernel(x_ref, wih_ref, whh_ref, b_ref, fcw_ref, fcb_ref,
                     out_ref, *, num_layers, seq_len, batch, hidden):
    """Fused 4-layer LSTM + Linear + LogSoftmax, everything VMEM/vreg-resident.

    Shapes (B = padded batch, Vp = padded vocab):
      x_ref   : (T*B, D)    seq-major embedded inputs, flattened over (T, B)
      wih_ref : (L, D, 4H)  input-to-hidden weights, pre-transposed
      whh_ref : (L, H, 4H)  hidden-to-hidden weights, pre-transposed
      b_ref   : (L, 1, 4H)  combined b_ih + b_hh (f32)
      fcw_ref : (H, Vp)     final projection, pre-transposed (padded cols = 0)
      fcb_ref : (1, Vp)     final bias (padded cols = -1e30)
      out_ref : (T*B, Vp)   log-probabilities (single lane-dense bulk store)
    """
    H = hidden
    B = batch
    wdt = wih_ref.dtype          # f32 by default, bf16 on v6e/v7x if requested

    inp = x_ref[...]                                             # (T*B, D)
    for layer in range(num_layers):
        # Hoisted input-to-hidden projection + bias for ALL timesteps at once:
        # one MXU pass per layer; only h @ Whh stays on the sequential path.
        gx = (jnp.dot(inp.astype(wdt), wih_ref[layer],
                      preferred_element_type=jnp.float32)
              + b_ref[layer])                                    # (T*B, 4H) f32
        whh = whh_ref[layer]                                     # (H, 4H)

        h = jnp.zeros((B, H), jnp.float32)
        c = jnp.zeros((B, H), jnp.float32)
        hs = []

        # T is small and static: full static unroll keeps every slice static
        # and scheduler-visible. (Switch to lax.fori_loop + pl.ds for large T.)
        for t in range(seq_len):
            gates = gx[t * B:(t + 1) * B, :] + jnp.dot(
                h.astype(wdt), whh, preferred_element_type=jnp.float32)
            # Whole-vreg nonlinearities over the full (B, 4H) tile, then take
            # static lane slices (PyTorch gate order [i, f, g, o]).
            sig = jax.nn.sigmoid(gates)                          # 1 EUP pass
            tnh = jnp.tanh(gates)                                # 1 EUP pass
            i_g = sig[:, 0 * H:1 * H]
            f_g = sig[:, 1 * H:2 * H]
            g_g = tnh[:, 2 * H:3 * H]
            o_g = sig[:, 3 * H:4 * H]
            c = f_g * c + i_g * g_g
            h = o_g * jnp.tanh(c)                                # 1 EUP pass
            hs.append(h)                                         # stays in vregs

        # Next layer's input: concatenate in (t, b) row order to match the
        # (T*B, D) flattening of x. No VMEM scratch round-trip.
        inp = jnp.concatenate(hs, axis=0)                        # (T*B, H)

    # Batched FC + log-softmax over all timesteps at once; padded vocab
    # columns carry a -1e30 bias so the full-width reductions are exact.
    logits = jnp.dot(inp.astype(wdt), fcw_ref[...],
                     preferred_element_type=jnp.float32) + fcb_ref[...]
    m = jnp.max(logits, axis=-1, keepdims=True)
    lse = jnp.log(jnp.sum(jnp.exp(logits - m), axis=-1, keepdims=True)) + m
    out_ref[...] = logits - lse                    # one lane-dense bulk store


# ----------------------------------------------------------------------------
# Wrapper
# ----------------------------------------------------------------------------
def rnn_forward(x_idx, params, *, matmul_dtype=jnp.float32):
    """x_idx: (B, T) int32 token indices -> (T, B, src_length) log-probs.

    matmul_dtype=jnp.bfloat16 is the v6e/v7x option (f32 accumulation kept via
    preferred_element_type); default f32 keeps bit-tight agreement with the
    reference and the v5e-friendly path.
    """
    # TODO(synk): embedding lookup is a data-dependent gather; done with
    # jnp.take in JAX glue rather than an in-kernel DMA gather.
    emb = jnp.take(params["embedding"], x_idx, axis=0)            # (B, T, D)
    x_tbd = jnp.transpose(emb, (1, 0, 2)).astype(jnp.float32)     # (T, B, D)
    T, B, D = x_tbd.shape
    H = D
    L = params["wih_all"].shape[0]
    V = params["fc_w_t"].shape[1]

    # Pad batch (sublane dim) to a multiple of 8: B=2 would use 2/8 sublanes
    # of every per-step vreg; padded rows cost nothing (latency-bound) and do
    # not interact with real rows.
    Bp = -(-B // 8) * 8
    if Bp != B:
        x_tbd = jnp.pad(x_tbd, ((0, 0), (0, Bp - B), (0, 0)))

    # Pad vocab (lane dim) to a multiple of 128 for a lane-dense output store
    # and full-width log-softmax reductions. Padded weight columns are 0 and
    # padded bias columns are -1e30 so they vanish from the softmax sum.
    Vp = -(-V // 128) * 128
    fcw = params["fc_w_t"]
    fcb = params["fc_b"]
    if Vp != V:
        fcw = jnp.pad(fcw, ((0, 0), (0, Vp - V)))
        fcb = jnp.pad(fcb, ((0, 0), (0, Vp - V)), constant_values=-1e30)

    kernel = functools.partial(rnn_fused_kernel, num_layers=L,
                               seq_len=T, batch=Bp, hidden=H)
    out_flat = pl.pallas_call(
        kernel,
        out_shape=jax.ShapeDtypeStruct((T * Bp, Vp), jnp.float32),
        # Grid-less: whole problem (~200 KB) is VMEM-resident in one
        # invocation; defaults DMA every operand in once, no per-step
        # pipelining overhead. (On v7x with a non-toy batch, add a leading
        # "parallel" batch grid axis so the 2nd TensorCore is used.)
    )(x_tbd.reshape(T * Bp, D),
      params["wih_all"].astype(matmul_dtype),
      params["whh_all"].astype(matmul_dtype),
      params["b_all"],
      fcw.astype(matmul_dtype),
      fcb)
    return out_flat.reshape(T, Bp, Vp)[:, :B, :V]


# ----------------------------------------------------------------------------
# Deterministic parameter init + pure-JAX reference for sanity checking
# ----------------------------------------------------------------------------
def init_params(key, src_length, embed_dim, num_layers=4):
    H = embed_dim
    keys = jax.random.split(key, 3 + 4 * num_layers)
    scale = 1.0 / jnp.sqrt(H)
    wih, whh, bias = [], [], []
    for l in range(num_layers):
        k = keys[3 + 4 * l:3 + 4 * (l + 1)]
        w_ih = jax.random.uniform(k[0], (4 * H, embed_dim), jnp.float32,
                                  -scale, scale)
        w_hh = jax.random.uniform(k[1], (4 * H, H), jnp.float32, -scale, scale)
        b_ih = jax.random.uniform(k[2], (4 * H,), jnp.float32, -scale, scale)
        b_hh = jax.random.uniform(k[3], (4 * H,), jnp.float32, -scale, scale)
        wih.append(w_ih.T)                                  # (D, 4H)
        whh.append(w_hh.T)                                  # (H, 4H)
        bias.append((b_ih + b_hh).reshape(1, 4 * H))        # (1, 4H)
    return {
        "embedding": jax.random.normal(keys[0], (src_length, embed_dim),
                                       jnp.float32),
        "fc_w_t": jax.random.uniform(keys[1], (embed_dim, src_length),
                                     jnp.float32, -scale, scale),
        "fc_b": jax.random.uniform(keys[2], (1, src_length),
                                   jnp.float32, -scale, scale),
        "wih_all": jnp.stack(wih),                          # (L, D, 4H)
        "whh_all": jnp.stack(whh),                          # (L, H, 4H)
        "b_all": jnp.stack(bias),                           # (L, 1, 4H)
    }


def rnn_reference(x_idx, params):
    emb = jnp.take(params["embedding"], x_idx, axis=0)
    h_seq = jnp.transpose(emb, (1, 0, 2)).astype(jnp.float32)    # (T, B, D)
    B = h_seq.shape[1]
    H = params["whh_all"].shape[1]
    L = params["wih_all"].shape[0]
    for l in range(L):
        w_ih_t = params["wih_all"][l]
        w_hh_t = params["whh_all"][l]
        b = params["b_all"][l]

        def step(carry, x_t, w_ih_t=w_ih_t, w_hh_t=w_hh_t, b=b):
            h, c = carry
            gates = x_t @ w_ih_t + h @ w_hh_t + b
            i = jax.nn.sigmoid(gates[:, 0 * H:1 * H])
            f = jax.nn.sigmoid(gates[:, 1 * H:2 * H])
            g = jnp.tanh(gates[:, 2 * H:3 * H])
            o = jax.nn.sigmoid(gates[:, 3 * H:4 * H])
            c = f * c + i * g
            h = o * jnp.tanh(c)
            return (h, c), h

        init = (jnp.zeros((B, H), jnp.float32), jnp.zeros((B, H), jnp.float32))
        _, h_seq = lax.scan(step, init, h_seq)
    logits = h_seq @ params["fc_w_t"] + params["fc_b"]
    return jax.nn.log_softmax(logits, axis=-1)


# ----------------------------------------------------------------------------
if __name__ == "__main__":
    SRC_LENGTH = 16   # vocab size / output classes
    EMBED_DIM = 32    # embedding dim == LSTM hidden dim
    BATCH = 2
    SEQ = 8

    key = jax.random.PRNGKey(0)
    pkey, xkey = jax.random.split(key)
    params = init_params(pkey, SRC_LENGTH, EMBED_DIM, num_layers=4)
    x_idx = jax.random.randint(xkey, (BATCH, SEQ), 0, SRC_LENGTH, jnp.int32)

    out = rnn_forward(x_idx, params)
    out = jax.block_until_ready(out)

    ref = jax.block_until_ready(rnn_reference(x_idx, params))
    assert out.shape == (SEQ, BATCH, SRC_LENGTH), out.shape
    assert jnp.allclose(out, ref, atol=1e-5, rtol=1e-5), \
        float(jnp.max(jnp.abs(out - ref)))
    # log-softmax sanity: probabilities sum to 1
    assert jnp.allclose(jnp.exp(out).sum(-1), 1.0, atol=1e-5)

    print("KERNEL_OK")
</pallas_src>

<mosaic_0001>
module attributes {stable_mosaic.version = 11 : i64} {
  func.func @rnn_fused_kernel(%arg0: memref<64x32xf32, #tpu.memory_space<vmem>>, %arg1: memref<4x32x128xf32, #tpu.memory_space<vmem>>, %arg2: memref<4x32x128xf32, #tpu.memory_space<vmem>>, %arg3: memref<4x1x128xf32, #tpu.memory_space<vmem>>, %arg4: memref<32x128xf32, #tpu.memory_space<vmem>>, %arg5: memref<1x128xf32, #tpu.memory_space<vmem>>, %arg6: memref<64x128xf32, #tpu.memory_space<vmem>>) attributes {dimension_semantics = [], scalar_prefetch = 0 : i64, scratch_operands = 0 : i64, tpu.core_type = #tpu.core_type<tc>} {
    %c0 = arith.constant 0 : index
    %c0_0 = arith.constant 0 : index
    %0 = vector.load %arg0[%c0, %c0_0] : memref<64x32xf32, #tpu.memory_space<vmem>>, vector<64x32xf32>
    %c0_1 = arith.constant 0 : index
    %c0_2 = arith.constant 0 : index
    %c0_3 = arith.constant 0 : index
    %1 = vector.load %arg1[%c0_1, %c0_2, %c0_3] : memref<4x32x128xf32, #tpu.memory_space<vmem>>, vector<1x32x128xf32>
    %2 = vector.shape_cast %1 : vector<1x32x128xf32> to vector<32x128xf32>
    %cst = arith.constant dense<0.000000e+00> : vector<64x128xf32>
    %3 = tpu.matmul %0, %2, %cst {dimension_numbers = #tpu.dot_dimension_numbers<[1], [0], [0], [1], [0, 0, 1, 1], [], []>} : vector<64x32xf32>, vector<32x128xf32>, vector<64x128xf32> -> vector<64x128xf32>
    %c0_4 = arith.constant 0 : index
    %c0_5 = arith.constant 0 : index
    %c0_6 = arith.constant 0 : index
    %4 = vector.load %arg3[%c0_4, %c0_5, %c0_6] : memref<4x1x128xf32, #tpu.memory_space<vmem>>, vector<1x1x128xf32>
    %5 = vector.shape_cast %4 : vector<1x1x128xf32> to vector<1x128xf32>
    %6 = vector.broadcast %5 : vector<1x128xf32> to vector<64x128xf32>
    %7 = arith.addf %3, %6 : vector<64x128xf32>
    %c0_7 = arith.constant 0 : index
    %c0_8 = arith.constant 0 : index
    %c0_9 = arith.constant 0 : index
    %8 = vector.load %arg2[%c0_7, %c0_8, %c0_9] : memref<4x32x128xf32, #tpu.memory_space<vmem>>, vector<1x32x128xf32>
    %9 = vector.shape_cast %8 : vector<1x32x128xf32> to vector<32x128xf32>
    %cst_10 = arith.constant 0.000000e+00 : f32
    %10 = vector.broadcast %cst_10 : f32 to vector<8x32xf32>
    %cst_11 = arith.constant 0.000000e+00 : f32
    %11 = vector.broadcast %cst_11 : f32 to vector<8x32xf32>
    %12 = vector.extract_strided_slice %7 {offsets = [0, 0], sizes = [8, 128], strides = [1, 1]} : vector<64x128xf32> to vector<8x128xf32>
    %cst_12 = arith.constant dense<0.000000e+00> : vector<8x128xf32>
    %13 = tpu.matmul %10, %9, %cst_12 {dimension_numbers = #tpu.dot_dimension_numbers<[1], [0], [0], [1], [0, 0, 1, 1], [], []>} : vector<8x32xf32>, vector<32x128xf32>, vector<8x128xf32> -> vector<8x128xf32>
    %14 = arith.addf %12, %13 : vector<8x128xf32>
    %15 = arith.negf %14 : vector<8x128xf32>
    %16 = math.exp %15 : vector<8x128xf32>
    %cst_13 = arith.constant 1.000000e+00 : f32
    %17 = vector.broadcast %cst_13 : f32 to vector<8x128xf32>
    %18 = arith.addf %17, %16 : vector<8x128xf32>
    %19 = arith.divf %17, %18 : vector<8x128xf32>
    %20 = math.tanh %14 : vector<8x128xf32>
    %21 = vector.extract_strided_slice %19 {offsets = [0, 0], sizes = [8, 32], strides = [1, 1]} : vector<8x128xf32> to vector<8x32xf32>
    %22 = vector.extract_strided_slice %19 {offsets = [0, 32], sizes = [8, 32], strides = [1, 1]} : vector<8x128xf32> to vector<8x32xf32>
    %23 = vector.extract_strided_slice %20 {offsets = [0, 64], sizes = [8, 32], strides = [1, 1]} : vector<8x128xf32> to vector<8x32xf32>
    %24 = vector.extract_strided_slice %19 {offsets = [0, 96], sizes = [8, 32], strides = [1, 1]} : vector<8x128xf32> to vector<8x32xf32>
    %25 = arith.mulf %22, %11 : vector<8x32xf32>
    %26 = arith.mulf %21, %23 : vector<8x32xf32>
    %27 = arith.addf %25, %26 : vector<8x32xf32>
    %28 = math.tanh %27 : vector<8x32xf32>
    %29 = arith.mulf %24, %28 : vector<8x32xf32>
    %30 = vector.extract_strided_slice %7 {offsets = [8, 0], sizes = [8, 128], strides = [1, 1]} : vector<64x128xf32> to vector<8x128xf32>
    %cst_14 = arith.constant dense<0.000000e+00> : vector<8x128xf32>
    %31 = tpu.matmul %29, %9, %cst_14 {dimension_numbers = #tpu.dot_dimension_numbers<[1], [0], [0], [1], [0, 0, 1, 1], [], []>} : vector<8x32xf32>, vector<32x128xf32>, vector<8x128xf32> -> vector<8x128xf32>
    %32 = arith.addf %30, %31 : vector<8x128xf32>
    %33 = arith.negf %32 : vector<8x128xf32>
    %34 = math.exp %33 : vector<8x128xf32>
    %cst_15 = arith.constant 1.000000e+00 : f32
    %35 = vector.broadcast %cst_15 : f32 to vector<8x128xf32>
    %36 = arith.addf %35, %34 : vector<8x128xf32>
    %37 = arith.divf %35, %36 : vector<8x128xf32>
    %38 = math.tanh %32 : vector<8x128xf32>
    %39 = vector.extract_strided_slice %37 {offsets = [0, 0], sizes = [8, 32], strides = [1, 1]} : vector<8x128xf32> to vector<8x32xf32>
    %40 = vector.extract_strided_slice %37 {offsets = [0, 32], sizes = [8, 32], strides = [1, 1]} : vector<8x128xf32> to vector<8x32xf32>
    %41 = vector.extract_strided_slice %38 {offsets = [0, 64], sizes = [8, 32], strides = [1, 1]} : vector<8x128xf32> to vector<8x32xf32>
    %42 = vector.extract_strided_slice %37 {offsets = [0, 96], sizes = [8, 32], strides = [1, 1]} : vector<8x128xf32> to vector<8x32xf32>
    %43 = arith.mulf %40, %27 : vector<8x32xf32>
    %44 = arith.mulf %39, %41 : vector<8x32xf32>
    %45 = arith.addf %43, %44 : vector<8x32xf32>
    %46 = math.tanh %45 : vector<8x32xf32>
    %47 = arith.mulf %42, %46 : vector<8x32xf32>
    %48 = vector.extract_strided_slice %7 {offsets = [16, 0], sizes = [8, 128], strides = [1, 1]} : vector<64x128xf32> to vector<8x128xf32>
    %cst_16 = arith.constant dense<0.000000e+00> : vector<8x128xf32>
    %49 = tpu.matmul %47, %9, %cst_16 {dimension_numbers = #tpu.dot_dimension_numbers<[1], [0], [0], [1], [0, 0, 1, 1], [], []>} : vector<8x32xf32>, vector<32x128xf32>, vector<8x128xf32> -> vector<8x128xf32>
    %50 = arith.addf %48, %49 : vector<8x128xf32>
    %51 = arith.negf %50 : vector<8x128xf32>
    %52 = math.exp %51 : vector<8x128xf32>
    %cst_17 = arith.constant 1.000000e+00 : f32
    %53 = vector.broadcast %cst_17 : f32 to vector<8x128xf32>
    %54 = arith.addf %53, %52 : vector<8x128xf32>
    %55 = arith.divf %53, %54 : vector<8x128xf32>
    %56 = math.tanh %50 : vector<8x128xf32>
    %57 = vector.extract_strided_slice %55 {offsets = [0, 0], sizes = [8, 32], strides = [1, 1]} : vector<8x128xf32> to vector<8x32xf32>
    %58 = vector.extract_strided_slice %55 {offsets = [0, 32], sizes = [8, 32], strides = [1, 1]} : vector<8x128xf32> to vector<8x32xf32>
    %59 = vector.extract_strided_slice %56 {offsets = [0, 64], sizes = [8, 32], strides = [1, 1]} : vector<8x128xf32> to vector<8x32xf32>
    %60 = vector.extract_strided_slice %55 {offsets = [0, 96], sizes = [8, 32], strides = [1, 1]} : vector<8x128xf32> to vector<8x32xf32>
    %61 = arith.mulf %58, %45 : vector<8x32xf32>
    %62 = arith.mulf %57, %59 : vector<8x32xf32>
    %63 = arith.addf %61, %62 : vector<8x32xf32>
    %64 = math.tanh %63 : vector<8x32xf32>
    %65 = arith.mulf %60, %64 : vector<8x32xf32>
    %66 = vector.extract_strided_slice %7 {offsets = [24, 0], sizes = [8, 128], strides = [1, 1]} : vector<64x128xf32> to vector<8x128xf32>
    %cst_18 = arith.constant dense<0.000000e+00> : vector<8x128xf32>
    %67 = tpu.matmul %65, %9, %cst_18 {dimension_numbers = #tpu.dot_dimension_numbers<[1], [0], [0], [1], [0, 0, 1, 1], [], []>} : vector<8x32xf32>, vector<32x128xf32>, vector<8x128xf32> -> vector<8x128xf32>
    %68 = arith.addf %66, %67 : vector<8x128xf32>
    %69 = arith.negf %68 : vector<8x128xf32>
    %70 = math.exp %69 : vector<8x128xf32>
    %cst_19 = arith.constant 1.000000e+00 : f32
    %71 = vector.broadcast %cst_19 : f32 to vector<8x128xf32>
    %72 = arith.addf %71, %70 : vector<8x128xf32>
    %73 = arith.divf %71, %72 : vector<8x128xf32>
    %74 = math.tanh %68 : vector<8x128xf32>
    %75 = vector.extract_strided_slice %73 {offsets = [0, 0], sizes = [8, 32], strides = [1, 1]} : vector<8x128xf32> to vector<8x32xf32>
    %76 = vector.extract_strided_slice %73 {offsets = [0, 32], sizes = [8, 32], strides = [1, 1]} : vector<8x128xf32> to vector<8x32xf32>
    %77 = vector.extract_strided_slice %74 {offsets = [0, 64], sizes = [8, 32], strides = [1, 1]} : vector<8x128xf32> to vector<8x32xf32>
    %78 = vector.extract_strided_slice %73 {offsets = [0, 96], sizes = [8, 32], strides = [1, 1]} : vector<8x128xf32> to vector<8x32xf32>
    %79 = arith.mulf %76, %63 : vector<8x32xf32>
    %80 = arith.mulf %75, %77 : vector<8x32xf32>
    %81 = arith.addf %79, %80 : vector<8x32xf32>
    %82 = math.tanh %81 : vector<8x32xf32>
    %83 = arith.mulf %78, %82 : vector<8x32xf32>
    %84 = vector.extract_strided_slice %7 {offsets = [32, 0], sizes = [8, 128], strides = [1, 1]} : vector<64x128xf32> to vector<8x128xf32>
    %cst_20 = arith.constant dense<0.000000e+00> : vector<8x128xf32>
    %85 = tpu.matmul %83, %9, %cst_20 {dimension_numbers = #tpu.dot_dimension_numbers<[1], [0], [0], [1], [0, 0, 1, 1], [], []>} : vector<8x32xf32>, vector<32x128xf32>, vector<8x128xf32> -> vector<8x128xf32>
    %86 = arith.addf %84, %85 : vector<8x128xf32>
    %87 = arith.negf %86 : vector<8x128xf32>
    %88 = math.exp %87 : vector<8x128xf32>
    %cst_21 = arith.constant 1.000000e+00 : f32
    %89 = vector.broadcast %cst_21 : f32 to vector<8x128xf32>
    %90 = arith.addf %89, %88 : vector<8x128xf32>
    %91 = arith.divf %89, %90 : vector<8x128xf32>
    %92 = math.tanh %86 : vector<8x128xf32>
    %93 = vector.extract_strided_slice %91 {offsets = [0, 0], sizes = [8, 32], strides = [1, 1]} : vector<8x128xf32> to vector<8x32xf32>
    %94 = vector.extract_strided_slice %91 {offsets = [0, 32], sizes = [8, 32], strides = [1, 1]} : vector<8x128xf32> to vector<8x32xf32>
    %95 = vector.extract_strided_slice %92 {offsets = [0, 64], sizes = [8, 32], strides = [1, 1]} : vector<8x128xf32> to vector<8x32xf32>
    %96 = vector.extract_strided_slice %91 {offsets = [0, 96], sizes = [8, 32], strides = [1, 1]} : vector<8x128xf32> to vector<8x32xf32>
    %97 = arith.mulf %94, %81 : vector<8x32xf32>
    %98 = arith.mulf %93, %95 : vector<8x32xf32>
    %99 = arith.addf %97, %98 : vector<8x32xf32>
    %100 = math.tanh %99 : vector<8x32xf32>
    %101 = arith.mulf %96, %100 : vector<8x32xf32>
    %102 = vector.extract_strided_slice %7 {offsets = [40, 0], sizes = [8, 128], strides = [1, 1]} : vector<64x128xf32> to vector<8x128xf32>
    %cst_22 = arith.constant dense<0.000000e+00> : vector<8x128xf32>
    %103 = tpu.matmul %101, %9, %cst_22 {dimension_numbers = #tpu.dot_dimension_numbers<[1], [0], [0], [1], [0, 0, 1, 1], [], []>} : vector<8x32xf32>, vector<32x128xf32>, vector<8x128xf32> -> vector<8x128xf32>
    %104 = arith.addf %102, %103 : vector<8x128xf32>
    %105 = arith.negf %104 : vector<8x128xf32>
    %106 = math.exp %105 : vector<8x128xf32>
    %cst_23 = arith.constant 1.000000e+00 : f32
    %107 = vector.broadcast %cst_23 : f32 to vector<8x128xf32>
    %108 = arith.addf %107, %106 : vector<8x128xf32>
    %109 = arith.divf %107, %108 : vector<8x128xf32>
    %110 = math.tanh %104 : vector<8x128xf32>
    %111 = vector.extract_strided_slice %109 {offsets = [0, 0], sizes = [8, 32], strides = [1, 1]} : vector<8x128xf32> to vector<8x32xf32>
    %112 = vector.extract_strided_slice %109 {offsets = [0, 32], sizes = [8, 32], strides = [1, 1]} : vector<8x128xf32> to vector<8x32xf32>
    %113 = vector.extract_strided_slice %110 {offsets = [0, 64], sizes = [8, 32], strides = [1, 1]} : vector<8x128xf32> to vector<8x32xf32>
    %114 = vector.extract_strided_slice %109 {offsets = [0, 96], sizes = [8, 32], strides = [1, 1]} : vector<8x128xf32> to vector<8x32xf32>
    %115 = arith.mulf %112, %99 : vector<8x32xf32>
    %116 = arith.mulf %111, %113 : vector<8x32xf32>
    %117 = arith.addf %115, %116 : vector<8x32xf32>
    %118 = math.tanh %117 : vector<8x32xf32>
    %119 = arith.mulf %114, %118 : vector<8x32xf32>
    %120 = vector.extract_strided_slice %7 {offsets = [48, 0], sizes = [8, 128], strides = [1, 1]} : vector<64x128xf32> to vector<8x128xf32>
    %cst_24 = arith.constant dense<0.000000e+00> : vector<8x128xf32>
    %121 = tpu.matmul %119, %9, %cst_24 {dimension_numbers = #tpu.dot_dimension_numbers<[1], [0], [0], [1], [0, 0, 1, 1], [], []>} : vector<8x32xf32>, vector<32x128xf32>, vector<8x128xf32> -> vector<8x128xf32>
    %122 = arith.addf %120, %121 : vector<8x128xf32>
    %123 = arith.negf %122 : vector<8x128xf32>
    %124 = math.exp %123 : vector<8x128xf32>
    %cst_25 = arith.constant 1.000000e+00 : f32
    %125 = vector.broadcast %cst_25 : f32 to vector<8x128xf32>
    %126 = arith.addf %125, %124 : vector<8x128xf32>
    %127 = arith.divf %125, %126 : vector<8x128xf32>
    %128 = math.tanh %122 : vector<8x128xf32>
    %129 = vector.extract_strided_slice %127 {offsets = [0, 0], sizes = [8, 32], strides = [1, 1]} : vector<8x128xf32> to vector<8x32xf32>
    %130 = vector.extract_strided_slice %127 {offsets = [0, 32], sizes = [8, 32], strides = [1, 1]} : vector<8x128xf32> to vector<8x32xf32>
    %131 = vector.extract_strided_slice %128 {offsets = [0, 64], sizes = [8, 32], strides = [1, 1]} : vector<8x128xf32> to vector<8x32xf32>
    %132 = vector.extract_strided_slice %127 {offsets = [0, 96], sizes = [8, 32], strides = [1, 1]} : vector<8x128xf32> to vector<8x32xf32>
    %133 = arith.mulf %130, %117 : vector<8x32xf32>
    %134 = arith.mulf %129, %131 : vector<8x32xf32>
    %135 = arith.addf %133, %134 : vector<8x32xf32>
    %136 = math.tanh %135 : vector<8x32xf32>
    %137 = arith.mulf %132, %136 : vector<8x32xf32>
    %138 = vector.extract_strided_slice %7 {offsets = [56, 0], sizes = [8, 128], strides = [1, 1]} : vector<64x128xf32> to vector<8x128xf32>
    %cst_26 = arith.constant dense<0.000000e+00> : vector<8x128xf32>
    %139 = tpu.matmul %137, %9, %cst_26 {dimension_numbers = #tpu.dot_dimension_numbers<[1], [0], [0], [1], [0, 0, 1, 1], [], []>} : vector<8x32xf32>, vector<32x128xf32>, vector<8x128xf32> -> vector<8x128xf32>
    %140 = arith.addf %138, %139 : vector<8x128xf32>
    %141 = arith.negf %140 : vector<8x128xf32>
    %142 = math.exp %141 : vector<8x128xf32>
    %cst_27 = arith.constant 1.000000e+00 : f32
    %143 = vector.broadcast %cst_27 : f32 to vector<8x128xf32>
    %144 = arith.addf %143, %142 : vector<8x128xf32>
    %145 = arith.divf %143, %144 : vector<8x128xf32>
    %146 = math.tanh %140 : vector<8x128xf32>
    %147 = vector.extract_strided_slice %145 {offsets = [0, 0], sizes = [8, 32], strides = [1, 1]} : vector<8x128xf32> to vector<8x32xf32>
    %148 = vector.extract_strided_slice %145 {offsets = [0, 32], sizes = [8, 32], strides = [1, 1]} : vector<8x128xf32> to vector<8x32xf32>
    %149 = vector.extract_strided_slice %146 {offsets = [0, 64], sizes = [8, 32], strides = [1, 1]} : vector<8x128xf32> to vector<8x32xf32>
    %150 = vector.extract_strided_slice %145 {offsets = [0, 96], sizes = [8, 32], strides = [1, 1]} : vector<8x128xf32> to vector<8x32xf32>
    %151 = arith.mulf %148, %135 : vector<8x32xf32>
    %152 = arith.mulf %147, %149 : vector<8x32xf32>
    %153 = arith.addf %151, %152 : vector<8x32xf32>
    %154 = math.tanh %153 : vector<8x32xf32>
    %155 = arith.mulf %150, %154 : vector<8x32xf32>
    %156 = tpu.concatenate %29, %47, %65, %83, %101, %119, %137, %155 in 0 : vector<8x32xf32>, vector<8x32xf32>, vector<8x32xf32>, vector<8x32xf32>, vector<8x32xf32>, vector<8x32xf32>, vector<8x32xf32>, vector<8x32xf32> -> vector<64x32xf32>
    %c1 = arith.constant 1 : index
    %c0_28 = arith.constant 0 : index
    %c0_29 = arith.constant 0 : index
    %157 = vector.load %arg1[%c1, %c0_28, %c0_29] : memref<4x32x128xf32, #tpu.memory_space<vmem>>, vector<1x32x128xf32>
    %158 = vector.shape_cast %157 : vector<1x32x128xf32> to vector<32x128xf32>
    %cst_30 = arith.constant dense<0.000000e+00> : vector<64x128xf32>
    %159 = tpu.matmul %156, %158, %cst_30 {dimension_numbers = #tpu.dot_dimension_numbers<[1], [0], [0], [1], [0, 0, 1, 1], [], []>} : vector<64x32xf32>, vector<32x128xf32>, vector<64x128xf32> -> vector<64x128xf32>
    %c1_31 = arith.constant 1 : index
    %c0_32 = arith.constant 0 : index
    %c0_33 = arith.constant 0 : index
    %160 = vector.load %arg3[%c1_31, %c0_32, %c0_33] : memref<4x1x128xf32, #tpu.memory_space<vmem>>, vector<1x1x128xf32>
    %161 = vector.shape_cast %160 : vector<1x1x128xf32> to vector<1x128xf32>
    %162 = vector.broadcast %161 : vector<1x128xf32> to vector<64x128xf32>
    %163 = arith.addf %159, %162 : vector<64x128xf32>
    %c1_34 = arith.constant 1 : index
    %c0_35 = arith.constant 0 : index
    %c0_36 = arith.constant 0 : index
    %164 = vector.load %arg2[%c1_34, %c0_35, %c0_36] : memref<4x32x128xf32, #tpu.memory_space<vmem>>, vector<1x32x128xf32>
    %165 = vector.shape_cast %164 : vector<1x32x128xf32> to vector<32x128xf32>
    %cst_37 = arith.constant 0.000000e+00 : f32
    %166 = vector.broadcast %cst_37 : f32 to vector<8x32xf32>
    %cst_38 = arith.constant 0.000000e+00 : f32
    %167 = vector.broadcast %cst_38 : f32 to vector<8x32xf32>
    %168 = vector.extract_strided_slice %163 {offsets = [0, 0], sizes = [8, 128], strides = [1, 1]} : vector<64x128xf32> to vector<8x128xf32>
    %cst_39 = arith.constant dense<0.000000e+00> : vector<8x128xf32>
    %169 = tpu.matmul %166, %165, %cst_39 {dimension_numbers = #tpu.dot_dimension_numbers<[1], [0], [0], [1], [0, 0, 1, 1], [], []>} : vector<8x32xf32>, vector<32x128xf32>, vector<8x128xf32> -> vector<8x128xf32>
    %170 = arith.addf %168, %169 : vector<8x128xf32>
    %171 = arith.negf %170 : vector<8x128xf32>
    %172 = math.exp %171 : vector<8x128xf32>
    %cst_40 = arith.constant 1.000000e+00 : f32
    %173 = vector.broadcast %cst_40 : f32 to vector<8x128xf32>
    %174 = arith.addf %173, %172 : vector<8x128xf32>
    %175 = arith.divf %173, %174 : vector<8x128xf32>
    %176 = math.tanh %170 : vector<8x128xf32>
    %177 = vector.extract_strided_slice %175 {offsets = [0, 0], sizes = [8, 32], strides = [1, 1]} : vector<8x128xf32> to vector<8x32xf32>
    %178 = vector.extract_strided_slice %175 {offsets = [0, 32], sizes = [8, 32], strides = [1, 1]} : vector<8x128xf32> to vector<8x32xf32>
    %179 = vector.extract_strided_slice %176 {offsets = [0, 64], sizes = [8, 32], strides = [1, 1]} : vector<8x128xf32> to vector<8x32xf32>
    %180 = vector.extract_strided_slice %175 {offsets = [0, 96], sizes = [8, 32], strides = [1, 1]} : vector<8x128xf32> to vector<8x32xf32>
    %181 = arith.mulf %178, %167 : vector<8x32xf32>
    %182 = arith.mulf %177, %179 : vector<8x32xf32>
    %183 = arith.addf %181, %182 : vector<8x32xf32>
    %184 = math.tanh %183 : vector<8x32xf32>
    %185 = arith.mulf %180, %184 : vector<8x32xf32>
    %186 = vector.extract_strided_slice %163 {offsets = [8, 0], sizes = [8, 128], strides = [1, 1]} : vector<64x128xf32> to vector<8x128xf32>
    %cst_41 = arith.constant dense<0.000000e+00> : vector<8x128xf32>
    %187 = tpu.matmul %185, %165, %cst_41 {dimension_numbers = #tpu.dot_dimension_numbers<[1], [0], [0], [1], [0, 0, 1, 1], [], []>} : vector<8x32xf32>, vector<32x128xf32>, vector<8x128xf32> -> vector<8x128xf32>
    %188 = arith.addf %186, %187 : vector<8x128xf32>
    %189 = arith.negf %188 : vector<8x128xf32>
    %190 = math.exp %189 : vector<8x128xf32>
    %cst_42 = arith.constant 1.000000e+00 : f32
    %191 = vector.broadcast %cst_42 : f32 to vector<8x128xf32>
    %192 = arith.addf %191, %190 : vector<8x128xf32>
    %193 = arith.divf %191, %192 : vector<8x128xf32>
    %194 = math.tanh %188 : vector<8x128xf32>
    %195 = vector.extract_strided_slice %193 {offsets = [0, 0], sizes = [8, 32], strides = [1, 1]} : vector<8x128xf32> to vector<8x32xf32>
    %196 = vector.extract_strided_slice %193 {offsets = [0, 32], sizes = [8, 32], strides = [1, 1]} : vector<8x128xf32> to vector<8x32xf32>
    %197 = vector.extract_strided_slice %194 {offsets = [0, 64], sizes = [8, 32], strides = [1, 1]} : vector<8x128xf32> to vector<8x32xf32>
    %198 = vector.extract_strided_slice %193 {offsets = [0, 96], sizes = [8, 32], strides = [1, 1]} : vector<8x128xf32> to vector<8x32xf32>
    %199 = arith.mulf %196, %183 : vector<8x32xf32>
    %200 = arith.mulf %195, %197 : vector<8x32xf32>
    %201 = arith.addf %199, %200 : vector<8x32xf32>
    %202 = math.tanh %201 : vector<8x32xf32>
    %203 = arith.mulf %198, %202 : vector<8x32xf32>
    %204 = vector.extract_strided_slice %163 {offsets = [16, 0], sizes = [8, 128], strides = [1, 1]} : vector<64x128xf32> to vector<8x128xf32>
    %cst_43 = arith.constant dense<0.000000e+00> : vector<8x128xf32>
    %205 = tpu.matmul %203, %165, %cst_43 {dimension_numbers = #tpu.dot_dimension_numbers<[1], [0], [0], [1], [0, 0, 1, 1], [], []>} : vector<8x32xf32>, vector<32x128xf32>, vector<8x128xf32> -> vector<8x128xf32>
    %206 = arith.addf %204, %205 : vector<8x128xf32>
    %207 = arith.negf %206 : vector<8x128xf32>
    %208 = math.exp %207 : vector<8x128xf32>
    %cst_44 = arith.constant 1.000000e+00 : f32
    %209 = vector.broadcast %cst_44 : f32 to vector<8x128xf32>
    %210 = arith.addf %209, %208 : vector<8x128xf32>
    %211 = arith.divf %209, %210 : vector<8x128xf32>
    %212 = math.tanh %206 : vector<8x128xf32>
    %213 = vector.extract_strided_slice %211 {offsets = [0, 0], sizes = [8, 32], strides = [1, 1]} : vector<8x128xf32> to vector<8x32xf32>
    %214 = vector.extract_strided_slice %211 {offsets = [0, 32], sizes = [8, 32], strides = [1, 1]} : vector<8x128xf32> to vector<8x32xf32>
    %215 = vector.extract_strided_slice %212 {offsets = [0, 64], sizes = [8, 32], strides = [1, 1]} : vector<8x128xf32> to vector<8x32xf32>
    %216 = vector.extract_strided_slice %211 {offsets = [0, 96], sizes = [8, 32], strides = [1, 1]} : vector<8x128xf32> to vector<8x32xf32>
    %217 = arith.mulf %214, %201 : vector<8x32xf32>
    %218 = arith.mulf %213, %215 : vector<8x32xf32>
    %219 = arith.addf %217, %218 : vector<8x32xf32>
    %220 = math.tanh %219 : vector<8x32xf32>
    %221 = arith.mulf %216, %220 : vector<8x32xf32>
    %222 = vector.extract_strided_slice %163 {offsets = [24, 0], sizes = [8, 128], strides = [1, 1]} : vector<64x128xf32> to vector<8x128xf32>
    %cst_45 = arith.constant dense<0.000000e+00> : vector<8x128xf32>
    %223 = tpu.matmul %221, %165, %cst_45 {dimension_numbers = #tpu.dot_dimension_numbers<[1], [0], [0], [1], [0, 0, 1, 1], [], []>} : vector<8x32xf32>, vector<32x128xf32>, vector<8x128xf32> -> vector<8x128xf32>
    %224 = arith.addf %222, %223 : vector<8x128xf32>
    %225 = arith.negf %224 : vector<8x128xf32>
    %226 = math.exp %225 : vector<8x128xf32>
    %cst_46 = arith.constant 1.000000e+00 : f32
    %227 = vector.broadcast %cst_46 : f32 to vector<8x128xf32>
    %228 = arith.addf %227, %226 : vector<8x128xf32>
    %229 = arith.divf %227, %228 : vector<8x128xf32>
    %230 = math.tanh %224 : vector<8x128xf32>
    %231 = vector.extract_strided_slice %229 {offsets = [0, 0], sizes = [8, 32], strides = [1, 1]} : vector<8x128xf32> to vector<8x32xf32>
    %232 = vector.extract_strided_slice %229 {offsets = [0, 32], sizes = [8, 32], strides = [1, 1]} : vector<8x128xf32> to vector<8x32xf32>
    %233 = vector.extract_strided_slice %230 {offsets = [0, 64], sizes = [8, 32], strides = [1, 1]} : vector<8x128xf32> to vector<8x32xf32>
    %234 = vector.extract_strided_slice %229 {offsets = [0, 96], sizes = [8, 32], strides = [1, 1]} : vector<8x128xf32> to vector<8x32xf32>
    %235 = arith.mulf %232, %219 : vector<8x32xf32>
    %236 = arith.mulf %231, %233 : vector<8x32xf32>
    %237 = arith.addf %235, %236 : vector<8x32xf32>
    %238 = math.tanh %237 : vector<8x32xf32>
    %239 = arith.mulf %234, %238 : vector<8x32xf32>
    %240 = vector.extract_strided_slice %163 {offsets = [32, 0], sizes = [8, 128], strides = [1, 1]} : vector<64x128xf32> to vector<8x128xf32>
    %cst_47 = arith.constant dense<0.000000e+00> : vector<8x128xf32>
    %241 = tpu.matmul %239, %165, %cst_47 {dimension_numbers = #tpu.dot_dimension_numbers<[1], [0], [0], [1], [0, 0, 1, 1], [], []>} : vector<8x32xf32>, vector<32x128xf32>, vector<8x128xf32> -> vector<8x128xf32>
    %242 = arith.addf %240, %241 : vector<8x128xf32>
    %243 = arith.negf %242 : vector<8x128xf32>
    %244 = math.exp %243 : vector<8x128xf32>
    %cst_48 = arith.constant 1.000000e+00 : f32
    %245 = vector.broadcast %cst_48 : f32 to vector<8x128xf32>
    %246 = arith.addf %245, %244 : vector<8x128xf32>
    %247 = arith.divf %245, %246 : vector<8x128xf32>
    %248 = math.tanh %242 : vector<8x128xf32>
    %249 = vector.extract_strided_slice %247 {offsets = [0, 0], sizes = [8, 32], strides = [1, 1]} : vector<8x128xf32> to vector<8x32xf32>
    %250 = vector.extract_strided_slice %247 {offsets = [0, 32], sizes = [8, 32], strides = [1, 1]} : vector<8x128xf32> to vector<8x32xf32>
    %251 = vector.extract_strided_slice %248 {offsets = [0, 64], sizes = [8, 32], strides = [1, 1]} : vector<8x128xf32> to vector<8x32xf32>
    %252 = vector.extract_strided_slice %247 {offsets = [0, 96], sizes = [8, 32], strides = [1, 1]} : vector<8x128xf32> to vector<8x32xf32>
    %253 = arith.mulf %250, %237 : vector<8x32xf32>
    %254 = arith.mulf %249, %251 : vector<8x32xf32>
    %255 = arith.addf %253, %254 : vector<8x32xf32>
    %256 = math.tanh %255 : vector<8x32xf32>
    %257 = arith.mulf %252, %256 : vector<8x32xf32>
    %258 = vector.extract_strided_slice %163 {offsets = [40, 0], sizes = [8, 128], strides = [1, 1]} : vector<64x128xf32> to vector<8x128xf32>
    %cst_49 = arith.constant dense<0.000000e+00> : vector<8x128xf32>
    %259 = tpu.matmul %257, %165, %cst_49 {dimension_numbers = #tpu.dot_dimension_numbers<[1], [0], [0], [1], [0, 0, 1, 1], [], []>} : vector<8x32xf32>, vector<32x128xf32>, vector<8x128xf32> -> vector<8x128xf32>
    %260 = arith.addf %258, %259 : vector<8x128xf32>
    %261 = arith.negf %260 : vector<8x128xf32>
    %262 = math.exp %261 : vector<8x128xf32>
    %cst_50 = arith.constant 1.000000e+00 : f32
    %263 = vector.broadcast %cst_50 : f32 to vector<8x128xf32>
    %264 = arith.addf %263, %262 : vector<8x128xf32>
    %265 = arith.divf %263, %264 : vector<8x128xf32>
    %266 = math.tanh %260 : vector<8x128xf32>
    %267 = vector.extract_strided_slice %265 {offsets = [0, 0], sizes = [8, 32], strides = [1, 1]} : vector<8x128xf32> to vector<8x32xf32>
    %268 = vector.extract_strided_slice %265 {offsets = [0, 32], sizes = [8, 32], strides = [1, 1]} : vector<8x128xf32> to vector<8x32xf32>
    %269 = vector.extract_strided_slice %266 {offsets = [0, 64], sizes = [8, 32], strides = [1, 1]} : vector<8x128xf32> to vector<8x32xf32>
    %270 = vector.extract_strided_slice %265 {offsets = [0, 96], sizes = [8, 32], strides = [1, 1]} : vector<8x128xf32> to vector<8x32xf32>
    %271 = arith.mulf %268, %255 : vector<8x32xf32>
    %272 = arith.mulf %267, %269 : vector<8x32xf32>
    %273 = arith.addf %271, %272 : vector<8x32xf32>
    %274 = math.tanh %273 : vector<8x32xf32>
    %275 = arith.mulf %270, %274 : vector<8x32xf32>
    %276 = vector.extract_strided_slice %163 {offsets = [48, 0], sizes = [8, 128], strides = [1, 1]} : vector<64x128xf32> to vector<8x128xf32>
    %cst_51 = arith.constant dense<0.000000e+00> : vector<8x128xf32>
    %277 = tpu.matmul %275, %165, %cst_51 {dimension_numbers = #tpu.dot_dimension_numbers<[1], [0], [0], [1], [0, 0, 1, 1], [], []>} : vector<8x32xf32>, vector<32x128xf32>, vector<8x128xf32> -> vector<8x128xf32>
    %278 = arith.addf %276, %277 : vector<8x128xf32>
    %279 = arith.negf %278 : vector<8x128xf32>
    %280 = math.exp %279 : vector<8x128xf32>
    %cst_52 = arith.constant 1.000000e+00 : f32
    %281 = vector.broadcast %cst_52 : f32 to vector<8x128xf32>
    %282 = arith.addf %281, %280 : vector<8x128xf32>
    %283 = arith.divf %281, %282 : vector<8x128xf32>
    %284 = math.tanh %278 : vector<8x128xf32>
    %285 = vector.extract_strided_slice %283 {offsets = [0, 0], sizes = [8, 32], strides = [1, 1]} : vector<8x128xf32> to vector<8x32xf32>
    %286 = vector.extract_strided_slice %283 {offsets = [0, 32], sizes = [8, 32], strides = [1, 1]} : vector<8x128xf32> to vector<8x32xf32>
    %287 = vector.extract_strided_slice %284 {offsets = [0, 64], sizes = [8, 32], strides = [1, 1]} : vector<8x128xf32> to vector<8x32xf32>
    %288 = vector.extract_strided_slice %283 {offsets = [0, 96], sizes = [8, 32], strides = [1, 1]} : vector<8x128xf32> to vector<8x32xf32>
    %289 = arith.mulf %286, %273 : vector<8x32xf32>
    %290 = arith.mulf %285, %287 : vector<8x32xf32>
    %291 = arith.addf %289, %290 : vector<8x32xf32>
    %292 = math.tanh %291 : vector<8x32xf32>
    %293 = arith.mulf %288, %292 : vector<8x32xf32>
    %294 = vector.extract_strided_slice %163 {offsets = [56, 0], sizes = [8, 128], strides = [1, 1]} : vector<64x128xf32> to vector<8x128xf32>
    %cst_53 = arith.constant dense<0.000000e+00> : vector<8x128xf32>
    %295 = tpu.matmul %293, %165, %cst_53 {dimension_numbers = #tpu.dot_dimension_numbers<[1], [0], [0], [1], [0, 0, 1, 1], [], []>} : vector<8x32xf32>, vector<32x128xf32>, vector<8x128xf32> -> vector<8x128xf32>
    %296 = arith.addf %294, %295 : vector<8x128xf32>
    %297 = arith.negf %296 : vector<8x128xf32>
    %298 = math.exp %297 : vector<8x128xf32>
    %cst_54 = arith.constant 1.000000e+00 : f32
    %299 = vector.broadcast %cst_54 : f32 to vector<8x128xf32>
    %300 = arith.addf %299, %298 : vector<8x128xf32>
    %301 = arith.divf %299, %300 : vector<8x128xf32>
    %302 = math.tanh %296 : vector<8x128xf32>
    %303 = vector.extract_strided_slice %301 {offsets = [0, 0], sizes = [8, 32], strides = [1, 1]} : vector<8x128xf32> to vector<8x32xf32>
    %304 = vector.extract_strided_slice %301 {offsets = [0, 32], sizes = [8, 32], strides = [1, 1]} : vector<8x128xf32> to vector<8x32xf32>
    %305 = vector.extract_strided_slice %302 {offsets = [0, 64], sizes = [8, 32], strides = [1, 1]} : vector<8x128xf32> to vector<8x32xf32>
    %306 = vector.extract_strided_slice %301 {offsets = [0, 96], sizes = [8, 32], strides = [1, 1]} : vector<8x128xf32> to vector<8x32xf32>
    %307 = arith.mulf %304, %291 : vector<8x32xf32>
    %308 = arith.mulf %303, %305 : vector<8x32xf32>
    %309 = arith.addf %307, %308 : vector<8x32xf32>
    %310 = math.tanh %309 : vector<8x32xf32>
    %311 = arith.mulf %306, %310 : vector<8x32xf32>
    %312 = tpu.concatenate %185, %203, %221, %239, %257, %275, %293, %311 in 0 : vector<8x32xf32>, vector<8x32xf32>, vector<8x32xf32>, vector<8x32xf32>, vector<8x32xf32>, vector<8x32xf32>, vector<8x32xf32>, vector<8x32xf32> -> vector<64x32xf32>
    %c2 = arith.constant 2 : index
    %c0_55 = arith.constant 0 : index
    %c0_56 = arith.constant 0 : index
    %313 = vector.load %arg1[%c2, %c0_55, %c0_56] : memref<4x32x128xf32, #tpu.memory_space<vmem>>, vector<1x32x128xf32>
    %314 = vector.shape_cast %313 : vector<1x32x128xf32> to vector<32x128xf32>
    %cst_57 = arith.constant dense<0.000000e+00> : vector<64x128xf32>
    %315 = tpu.matmul %312, %314, %cst_57 {dimension_numbers = #tpu.dot_dimension_numbers<[1], [0], [0], [1], [0, 0, 1, 1], [], []>} : vector<64x32xf32>, vector<32x128xf32>, vector<64x128xf32> -> vector<64x128xf32>
    %c2_58 = arith.constant 2 : index
    %c0_59 = arith.constant 0 : index
    %c0_60 = arith.constant 0 : index
    %316 = vector.load %arg3[%c2_58, %c0_59, %c0_60] : memref<4x1x128xf32, #tpu.memory_space<vmem>>, vector<1x1x128xf32>
    %317 = vector.shape_cast %316 : vector<1x1x128xf32> to vector<1x128xf32>
    %318 = vector.broadcast %317 : vector<1x128xf32> to vector<64x128xf32>
    %319 = arith.addf %315, %318 : vector<64x128xf32>
    %c2_61 = arith.constant 2 : index
    %c0_62 = arith.constant 0 : index
    %c0_63 = arith.constant 0 : index
    %320 = vector.load %arg2[%c2_61, %c0_62, %c0_63] : memref<4x32x128xf32, #tpu.memory_space<vmem>>, vector<1x32x128xf32>
    %321 = vector.shape_cast %320 : vector<1x32x128xf32> to vector<32x128xf32>
    %cst_64 = arith.constant 0.000000e+00 : f32
    %322 = vector.broadcast %cst_64 : f32 to vector<8x32xf32>
    %cst_65 = arith.constant 0.000000e+00 : f32
    %323 = vector.broadcast %cst_65 : f32 to vector<8x32xf32>
    %324 = vector.extract_strided_slice %319 {offsets = [0, 0], sizes = [8, 128], strides = [1, 1]} : vector<64x128xf32> to vector<8x128xf32>
    %cst_66 = arith.constant dense<0.000000e+00> : vector<8x128xf32>
    %325 = tpu.matmul %322, %321, %cst_66 {dimension_numbers = #tpu.dot_dimension_numbers<[1], [0], [0], [1], [0, 0, 1, 1], [], []>} : vector<8x32xf32>, vector<32x128xf32>, vector<8x128xf32> -> vector<8x128xf32>
    %326 = arith.addf %324, %325 : vector<8x128xf32>
    %327 = arith.negf %326 : vector<8x128xf32>
    %328 = math.exp %327 : vector<8x128xf32>
    %cst_67 = arith.constant 1.000000e+00 : f32
    %329 = vector.broadcast %cst_67 : f32 to vector<8x128xf32>
    %330 = arith.addf %329, %328 : vector<8x128xf32>
    %331 = arith.divf %329, %330 : vector<8x128xf32>
    %332 = math.tanh %326 : vector<8x128xf32>
    %333 = vector.extract_strided_slice %331 {offsets = [0, 0], sizes = [8, 32], strides = [1, 1]} : vector<8x128xf32> to vector<8x32xf32>
    %334 = vector.extract_strided_slice %331 {offsets = [0, 32], sizes = [8, 32], strides = [1, 1]} : vector<8x128xf32> to vector<8x32xf32>
    %335 = vector.extract_strided_slice %332 {offsets = [0, 64], sizes = [8, 32], strides = [1, 1]} : vector<8x128xf32> to vector<8x32xf32>
    %336 = vector.extract_strided_slice %331 {offsets = [0, 96], sizes = [8, 32], strides = [1, 1]} : vector<8x128xf32> to vector<8x32xf32>
    %337 = arith.mulf %334, %323 : vector<8x32xf32>
    %338 = arith.mulf %333, %335 : vector<8x32xf32>
    %339 = arith.addf %337, %338 : vector<8x32xf32>
    %340 = math.tanh %339 : vector<8x32xf32>
    %341 = arith.mulf %336, %340 : vector<8x32xf32>
    %342 = vector.extract_strided_slice %319 {offsets = [8, 0], sizes = [8, 128], strides = [1, 1]} : vector<64x128xf32> to vector<8x128xf32>
    %cst_68 = arith.constant dense<0.000000e+00> : vector<8x128xf32>
    %343 = tpu.matmul %341, %321, %cst_68 {dimension_numbers = #tpu.dot_dimension_numbers<[1], [0], [0], [1], [0, 0, 1, 1], [], []>} : vector<8x32xf32>, vector<32x128xf32>, vector<8x128xf32> -> vector<8x128xf32>
    %344 = arith.addf %342, %343 : vector<8x128xf32>
    %345 = arith.negf %344 : vector<8x128xf32>
    %346 = math.exp %345 : vector<8x128xf32>
    %cst_69 = arith.constant 1.000000e+00 : f32
    %347 = vector.broadcast %cst_69 : f32 to vector<8x128xf32>
    %348 = arith.addf %347, %346 : vector<8x128xf32>
    %349 = arith.divf %347, %348 : vector<8x128xf32>
    %350 = math.tanh %344 : vector<8x128xf32>
    %351 = vector.extract_strided_slice %349 {offsets = [0, 0], sizes = [8, 32], strides = [1, 1]} : vector<8x128xf32> to vector<8x32xf32>
    %352 = vector.extract_strided_slice %349 {offsets = [0, 32], sizes = [8, 32], strides = [1, 1]} : vector<8x128xf32> to vector<8x32xf32>
    %353 = vector.extract_strided_slice %350 {offsets = [0, 64], sizes = [8, 32], strides = [1, 1]} : vector<8x128xf32> to vector<8x32xf32>
    %354 = vector.extract_strided_slice %349 {offsets = [0, 96], sizes = [8, 32], strides = [1, 1]} : vector<8x128xf32> to vector<8x32xf32>
    %355 = arith.mulf %352, %339 : vector<8x32xf32>
    %356 = arith.mulf %351, %353 : vector<8x32xf32>
    %357 = arith.addf %355, %356 : vector<8x32xf32>
    %358 = math.tanh %357 : vector<8x32xf32>
    %359 = arith.mulf %354, %358 : vector<8x32xf32>
    %360 = vector.extract_strided_slice %319 {offsets = [16, 0], sizes = [8, 128], strides = [1, 1]} : vector<64x128xf32> to vector<8x128xf32>
    %cst_70 = arith.constant dense<0.000000e+00> : vector<8x128xf32>
    %361 = tpu.matmul %359, %321, %cst_70 {dimension_numbers = #tpu.dot_dimension_numbers<[1], [0], [0], [1], [0, 0, 1, 1], [], []>} : vector<8x32xf32>, vector<32x128xf32>, vector<8x128xf32> -> vector<8x128xf32>
    %362 = arith.addf %360, %361 : vector<8x128xf32>
    %363 = arith.negf %362 : vector<8x128xf32>
    %364 = math.exp %363 : vector<8x128xf32>
    %cst_71 = arith.constant 1.000000e+00 : f32
    %365 = vector.broadcast %cst_71 : f32 to vector<8x128xf32>
    %366 = arith.addf %365, %364 : vector<8x128xf32>
    %367 = arith.divf %365, %366 : vector<8x128xf32>
    %368 = math.tanh %362 : vector<8x128xf32>
    %369 = vector.extract_strided_slice %367 {offsets = [0, 0], sizes = [8, 32], strides = [1, 1]} : vector<8x128xf32> to vector<8x32xf32>
    %370 = vector.extract_strided_slice %367 {offsets = [0, 32], sizes = [8, 32], strides = [1, 1]} : vector<8x128xf32> to vector<8x32xf32>
    %371 = vector.extract_strided_slice %368 {offsets = [0, 64], sizes = [8, 32], strides = [1, 1]} : vector<8x128xf32> to vector<8x32xf32>
    %372 = vector.extract_strided_slice %367 {offsets = [0, 96], sizes = [8, 32], strides = [1, 1]} : vector<8x128xf32> to vector<8x32xf32>
    %373 = arith.mulf %370, %357 : vector<8x32xf32>
    %374 = arith.mulf %369, %371 : vector<8x32xf32>
    %375 = arith.addf %373, %374 : vector<8x32xf32>
    %376 = math.tanh %375 : vector<8x32xf32>
    %377 = arith.mulf %372, %376 : vector<8x32xf32>
    %378 = vector.extract_strided_slice %319 {offsets = [24, 0], sizes = [8, 128], strides = [1, 1]} : vector<64x128xf32> to vector<8x128xf32>
    %cst_72 = arith.constant dense<0.000000e+00> : vector<8x128xf32>
    %379 = tpu.matmul %377, %321, %cst_72 {dimension_numbers = #tpu.dot_dimension_numbers<[1], [0], [0], [1], [0, 0, 1, 1], [], []>} : vector<8x32xf32>, vector<32x128xf32>, vector<8x128xf32> -> vector<8x128xf32>
    %380 = arith.addf %378, %379 : vector<8x128xf32>
    %381 = arith.negf %380 : vector<8x128xf32>
    %382 = math.exp %381 : vector<8x128xf32>
    %cst_73 = arith.constant 1.000000e+00 : f32
    %383 = vector.broadcast %cst_73 : f32 to vector<8x128xf32>
    %384 = arith.addf %383, %382 : vector<8x128xf32>
    %385 = arith.divf %383, %384 : vector<8x128xf32>
    %386 = math.tanh %380 : vector<8x128xf32>
    %387 = vector.extract_strided_slice %385 {offsets = [0, 0], sizes = [8, 32], strides = [1, 1]} : vector<8x128xf32> to vector<8x32xf32>
    %388 = vector.extract_strided_slice %385 {offsets = [0, 32], sizes = [8, 32], strides = [1, 1]} : vector<8x128xf32> to vector<8x32xf32>
    %389 = vector.extract_strided_slice %386 {offsets = [0, 64], sizes = [8, 32], strides = [1, 1]} : vector<8x128xf32> to vector<8x32xf32>
    %390 = vector.extract_strided_slice %385 {offsets = [0, 96], sizes = [8, 32], strides = [1, 1]} : vector<8x128xf32> to vector<8x32xf32>
    %391 = arith.mulf %388, %375 : vector<8x32xf32>
    %392 = arith.mulf %387, %389 : vector<8x32xf32>
    %393 = arith.addf %391, %392 : vector<8x32xf32>
    %394 = math.tanh %393 : vector<8x32xf32>
    %395 = arith.mulf %390, %394 : vector<8x32xf32>
    %396 = vector.extract_strided_slice %319 {offsets = [32, 0], sizes = [8, 128], strides = [1, 1]} : vector<64x128xf32> to vector<8x128xf32>
    %cst_74 = arith.constant dense<0.000000e+00> : vector<8x128xf32>
    %397 = tpu.matmul %395, %321, %cst_74 {dimension_numbers = #tpu.dot_dimension_numbers<[1], [0], [0], [1], [0, 0, 1, 1], [], []>} : vector<8x32xf32>, vector<32x128xf32>, vector<8x128xf32> -> vector<8x128xf32>
    %398 = arith.addf %396, %397 : vector<8x128xf32>
    %399 = arith.negf %398 : vector<8x128xf32>
    %400 = math.exp %399 : vector<8x128xf32>
    %cst_75 = arith.constant 1.000000e+00 : f32
    %401 = vector.broadcast %cst_75 : f32 to vector<8x128xf32>
    %402 = arith.addf %401, %400 : vector<8x128xf32>
    %403 = arith.divf %401, %402 : vector<8x128xf32>
    %404 = math.tanh %398 : vector<8x128xf32>
    %405 = vector.extract_strided_slice %403 {offsets = [0, 0], sizes = [8, 32], strides = [1, 1]} : vector<8x128xf32> to vector<8x32xf32>
    %406 = vector.extract_strided_slice %403 {offsets = [0, 32], sizes = [8, 32], strides = [1, 1]} : vector<8x128xf32> to vector<8x32xf32>
    %407 = vector.extract_strided_slice %404 {offsets = [0, 64], sizes = [8, 32], strides = [1, 1]} : vector<8x128xf32> to vector<8x32xf32>
    %408 = vector.extract_strided_slice %403 {offsets = [0, 96], sizes = [8, 32], strides = [1, 1]} : vector<8x128xf32> to vector<8x32xf32>
    %409 = arith.mulf %406, %393 : vector<8x32xf32>
    %410 = arith.mulf %405, %407 : vector<8x32xf32>
    %411 = arith.addf %409, %410 : vector<8x32xf32>
    %412 = math.tanh %411 : vector<8x32xf32>
    %413 = arith.mulf %408, %412 : vector<8x32xf32>
    %414 = vector.extract_strided_slice %319 {offsets = [40, 0], sizes = [8, 128], strides = [1, 1]} : vector<64x128xf32> to vector<8x128xf32>
    %cst_76 = arith.constant dense<0.000000e+00> : vector<8x128xf32>
    %415 = tpu.matmul %413, %321, %cst_76 {dimension_numbers = #tpu.dot_dimension_numbers<[1], [0], [0], [1], [0, 0, 1, 1], [], []>} : vector<8x32xf32>, vector<32x128xf32>, vector<8x128xf32> -> vector<8x128xf32>
    %416 = arith.addf %414, %415 : vector<8x128xf32>
    %417 = arith.negf %416 : vector<8x128xf32>
    %418 = math.exp %417 : vector<8x128xf32>
    %cst_77 = arith.constant 1.000000e+00 : f32
    %419 = vector.broadcast %cst_77 : f32 to vector<8x128xf32>
    %420 = arith.addf %419, %418 : vector<8x128xf32>
    %421 = arith.divf %419, %420 : vector<8x128xf32>
    %422 = math.tanh %416 : vector<8x128xf32>
    %423 = vector.extract_strided_slice %421 {offsets = [0, 0], sizes = [8, 32], strides = [1, 1]} : vector<8x128xf32> to vector<8x32xf32>
    %424 = vector.extract_strided_slice %421 {offsets = [0, 32], sizes = [8, 32], strides = [1, 1]} : vector<8x128xf32> to vector<8x32xf32>
    %425 = vector.extract_strided_slice %422 {offsets = [0, 64], sizes = [8, 32], strides = [1, 1]} : vector<8x128xf32> to vector<8x32xf32>
    %426 = vector.extract_strided_slice %421 {offsets = [0, 96], sizes = [8, 32], strides = [1, 1]} : vector<8x128xf32> to vector<8x32xf32>
    %427 = arith.mulf %424, %411 : vector<8x32xf32>
    %428 = arith.mulf %423, %425 : vector<8x32xf32>
    %429 = arith.addf %427, %428 : vector<8x32xf32>
    %430 = math.tanh %429 : vector<8x32xf32>
    %431 = arith.mulf %426, %430 : vector<8x32xf32>
    %432 = vector.extract_strided_slice %319 {offsets = [48, 0], sizes = [8, 128], strides = [1, 1]} : vector<64x128xf32> to vector<8x128xf32>
    %cst_78 = arith.constant dense<0.000000e+00> : vector<8x128xf32>
    %433 = tpu.matmul %431, %321, %cst_78 {dimension_numbers = #tpu.dot_dimension_numbers<[1], [0], [0], [1], [0, 0, 1, 1], [], []>} : vector<8x32xf32>, vector<32x128xf32>, vector<8x128xf32> -> vector<8x128xf32>
    %434 = arith.addf %432, %433 : vector<8x128xf32>
    %435 = arith.negf %434 : vector<8x128xf32>
    %436 = math.exp %435 : vector<8x128xf32>
    %cst_79 = arith.constant 1.000000e+00 : f32
    %437 = vector.broadcast %cst_79 : f32 to vector<8x128xf32>
    %438 = arith.addf %437, %436 : vector<8x128xf32>
    %439 = arith.divf %437, %438 : vector<8x128xf32>
    %440 = math.tanh %434 : vector<8x128xf32>
    %441 = vector.extract_strided_slice %439 {offsets = [0, 0], sizes = [8, 32], strides = [1, 1]} : vector<8x128xf32> to vector<8x32xf32>
    %442 = vector.extract_strided_slice %439 {offsets = [0, 32], sizes = [8, 32], strides = [1, 1]} : vector<8x128xf32> to vector<8x32xf32>
    %443 = vector.extract_strided_slice %440 {offsets = [0, 64], sizes = [8, 32], strides = [1, 1]} : vector<8x128xf32> to vector<8x32xf32>
    %444 = vector.extract_strided_slice %439 {offsets = [0, 96], sizes = [8, 32], strides = [1, 1]} : vector<8x128xf32> to vector<8x32xf32>
    %445 = arith.mulf %442, %429 : vector<8x32xf32>
    %446 = arith.mulf %441, %443 : vector<8x32xf32>
    %447 = arith.addf %445, %446 : vector<8x32xf32>
    %448 = math.tanh %447 : vector<8x32xf32>
    %449 = arith.mulf %444, %448 : vector<8x32xf32>
    %450 = vector.extract_strided_slice %319 {offsets = [56, 0], sizes = [8, 128], strides = [1, 1]} : vector<64x128xf32> to vector<8x128xf32>
    %cst_80 = arith.constant dense<0.000000e+00> : vector<8x128xf32>
    %451 = tpu.matmul %449, %321, %cst_80 {dimension_numbers = #tpu.dot_dimension_numbers<[1], [0], [0], [1], [0, 0, 1, 1], [], []>} : vector<8x32xf32>, vector<32x128xf32>, vector<8x128xf32> -> vector<8x128xf32>
    %452 = arith.addf %450, %451 : vector<8x128xf32>
    %453 = arith.negf %452 : vector<8x128xf32>
    %454 = math.exp %453 : vector<8x128xf32>
    %cst_81 = arith.constant 1.000000e+00 : f32
    %455 = vector.broadcast %cst_81 : f32 to vector<8x128xf32>
    %456 = arith.addf %455, %454 : vector<8x128xf32>
    %457 = arith.divf %455, %456 : vector<8x128xf32>
    %458 = math.tanh %452 : vector<8x128xf32>
    %459 = vector.extract_strided_slice %457 {offsets = [0, 0], sizes = [8, 32], strides = [1, 1]} : vector<8x128xf32> to vector<8x32xf32>
    %460 = vector.extract_strided_slice %457 {offsets = [0, 32], sizes = [8, 32], strides = [1, 1]} : vector<8x128xf32> to vector<8x32xf32>
    %461 = vector.extract_strided_slice %458 {offsets = [0, 64], sizes = [8, 32], strides = [1, 1]} : vector<8x128xf32> to vector<8x32xf32>
    %462 = vector.extract_strided_slice %457 {offsets = [0, 96], sizes = [8, 32], strides = [1, 1]} : vector<8x128xf32> to vector<8x32xf32>
    %463 = arith.mulf %460, %447 : vector<8x32xf32>
    %464 = arith.mulf %459, %461 : vector<8x32xf32>
    %465 = arith.addf %463, %464 : vector<8x32xf32>
    %466 = math.tanh %465 : vector<8x32xf32>
    %467 = arith.mulf %462, %466 : vector<8x32xf32>
    %468 = tpu.concatenate %341, %359, %377, %395, %413, %431, %449, %467 in 0 : vector<8x32xf32>, vector<8x32xf32>, vector<8x32xf32>, vector<8x32xf32>, vector<8x32xf32>, vector<8x32xf32>, vector<8x32xf32>, vector<8x32xf32> -> vector<64x32xf32>
    %c3 = arith.constant 3 : index
    %c0_82 = arith.constant 0 : index
    %c0_83 = arith.constant 0 : index
    %469 = vector.load %arg1[%c3, %c0_82, %c0_83] : memref<4x32x128xf32, #tpu.memory_space<vmem>>, vector<1x32x128xf32>
    %470 = vector.shape_cast %469 : vector<1x32x128xf32> to vector<32x128xf32>
    %cst_84 = arith.constant dense<0.000000e+00> : vector<64x128xf32>
    %471 = tpu.matmul %468, %470, %cst_84 {dimension_numbers = #tpu.dot_dimension_numbers<[1], [0], [0], [1], [0, 0, 1, 1], [], []>} : vector<64x32xf32>, vector<32x128xf32>, vector<64x128xf32> -> vector<64x128xf32>
    %c3_85 = arith.constant 3 : index
    %c0_86 = arith.constant 0 : index
    %c0_87 = arith.constant 0 : index
    %472 = vector.load %arg3[%c3_85, %c0_86, %c0_87] : memref<4x1x128xf32, #tpu.memory_space<vmem>>, vector<1x1x128xf32>
    %473 = vector.shape_cast %472 : vector<1x1x128xf32> to vector<1x128xf32>
    %474 = vector.broadcast %473 : vector<1x128xf32> to vector<64x128xf32>
    %475 = arith.addf %471, %474 : vector<64x128xf32>
    %c3_88 = arith.constant 3 : index
    %c0_89 = arith.constant 0 : index
    %c0_90 = arith.constant 0 : index
    %476 = vector.load %arg2[%c3_88, %c0_89, %c0_90] : memref<4x32x128xf32, #tpu.memory_space<vmem>>, vector<1x32x128xf32>
    %477 = vector.shape_cast %476 : vector<1x32x128xf32> to vector<32x128xf32>
    %cst_91 = arith.constant 0.000000e+00 : f32
    %478 = vector.broadcast %cst_91 : f32 to vector<8x32xf32>
    %cst_92 = arith.constant 0.000000e+00 : f32
    %479 = vector.broadcast %cst_92 : f32 to vector<8x32xf32>
    %480 = vector.extract_strided_slice %475 {offsets = [0, 0], sizes = [8, 128], strides = [1, 1]} : vector<64x128xf32> to vector<8x128xf32>
    %cst_93 = arith.constant dense<0.000000e+00> : vector<8x128xf32>
    %481 = tpu.matmul %478, %477, %cst_93 {dimension_numbers = #tpu.dot_dimension_numbers<[1], [0], [0], [1], [0, 0, 1, 1], [], []>} : vector<8x32xf32>, vector<32x128xf32>, vector<8x128xf32> -> vector<8x128xf32>
    %482 = arith.addf %480, %481 : vector<8x128xf32>
    %483 = arith.negf %482 : vector<8x128xf32>
    %484 = math.exp %483 : vector<8x128xf32>
    %cst_94 = arith.constant 1.000000e+00 : f32
    %485 = vector.broadcast %cst_94 : f32 to vector<8x128xf32>
    %486 = arith.addf %485, %484 : vector<8x128xf32>
    %487 = arith.divf %485, %486 : vector<8x128xf32>
    %488 = math.tanh %482 : vector<8x128xf32>
    %489 = vector.extract_strided_slice %487 {offsets = [0, 0], sizes = [8, 32], strides = [1, 1]} : vector<8x128xf32> to vector<8x32xf32>
    %490 = vector.extract_strided_slice %487 {offsets = [0, 32], sizes = [8, 32], strides = [1, 1]} : vector<8x128xf32> to vector<8x32xf32>
    %491 = vector.extract_strided_slice %488 {offsets = [0, 64], sizes = [8, 32], strides = [1, 1]} : vector<8x128xf32> to vector<8x32xf32>
    %492 = vector.extract_strided_slice %487 {offsets = [0, 96], sizes = [8, 32], strides = [1, 1]} : vector<8x128xf32> to vector<8x32xf32>
    %493 = arith.mulf %490, %479 : vector<8x32xf32>
    %494 = arith.mulf %489, %491 : vector<8x32xf32>
    %495 = arith.addf %493, %494 : vector<8x32xf32>
    %496 = math.tanh %495 : vector<8x32xf32>
    %497 = arith.mulf %492, %496 : vector<8x32xf32>
    %498 = vector.extract_strided_slice %475 {offsets = [8, 0], sizes = [8, 128], strides = [1, 1]} : vector<64x128xf32> to vector<8x128xf32>
    %cst_95 = arith.constant dense<0.000000e+00> : vector<8x128xf32>
    %499 = tpu.matmul %497, %477, %cst_95 {dimension_numbers = #tpu.dot_dimension_numbers<[1], [0], [0], [1], [0, 0, 1, 1], [], []>} : vector<8x32xf32>, vector<32x128xf32>, vector<8x128xf32> -> vector<8x128xf32>
    %500 = arith.addf %498, %499 : vector<8x128xf32>
    %501 = arith.negf %500 : vector<8x128xf32>
    %502 = math.exp %501 : vector<8x128xf32>
    %cst_96 = arith.constant 1.000000e+00 : f32
    %503 = vector.broadcast %cst_96 : f32 to vector<8x128xf32>
    %504 = arith.addf %503, %502 : vector<8x128xf32>
    %505 = arith.divf %503, %504 : vector<8x128xf32>
    %506 = math.tanh %500 : vector<8x128xf32>
    %507 = vector.extract_strided_slice %505 {offsets = [0, 0], sizes = [8, 32], strides = [1, 1]} : vector<8x128xf32> to vector<8x32xf32>
    %508 = vector.extract_strided_slice %505 {offsets = [0, 32], sizes = [8, 32], strides = [1, 1]} : vector<8x128xf32> to vector<8x32xf32>
    %509 = vector.extract_strided_slice %506 {offsets = [0, 64], sizes = [8, 32], strides = [1, 1]} : vector<8x128xf32> to vector<8x32xf32>
    %510 = vector.extract_strided_slice %505 {offsets = [0, 96], sizes = [8, 32], strides = [1, 1]} : vector<8x128xf32> to vector<8x32xf32>
    %511 = arith.mulf %508, %495 : vector<8x32xf32>
    %512 = arith.mulf %507, %509 : vector<8x32xf32>
    %513 = arith.addf %511, %512 : vector<8x32xf32>
    %514 = math.tanh %513 : vector<8x32xf32>
    %515 = arith.mulf %510, %514 : vector<8x32xf32>
    %516 = vector.extract_strided_slice %475 {offsets = [16, 0], sizes = [8, 128], strides = [1, 1]} : vector<64x128xf32> to vector<8x128xf32>
    %cst_97 = arith.constant dense<0.000000e+00> : vector<8x128xf32>
    %517 = tpu.matmul %515, %477, %cst_97 {dimension_numbers = #tpu.dot_dimension_numbers<[1], [0], [0], [1], [0, 0, 1, 1], [], []>} : vector<8x32xf32>, vector<32x128xf32>, vector<8x128xf32> -> vector<8x128xf32>
    %518 = arith.addf %516, %517 : vector<8x128xf32>
    %519 = arith.negf %518 : vector<8x128xf32>
    %520 = math.exp %519 : vector<8x128xf32>
    %cst_98 = arith.constant 1.000000e+00 : f32
    %521 = vector.broadcast %cst_98 : f32 to vector<8x128xf32>
    %522 = arith.addf %521, %520 : vector<8x128xf32>
    %523 = arith.divf %521, %522 : vector<8x128xf32>
    %524 = math.tanh %518 : vector<8x128xf32>
    %525 = vector.extract_strided_slice %523 {offsets = [0, 0], sizes = [8, 32], strides = [1, 1]} : vector<8x128xf32> to vector<8x32xf32>
    %526 = vector.extract_strided_slice %523 {offsets = [0, 32], sizes = [8, 32], strides = [1, 1]} : vector<8x128xf32> to vector<8x32xf32>
    %527 = vector.extract_strided_slice %524 {offsets = [0, 64], sizes = [8, 32], strides = [1, 1]} : vector<8x128xf32> to vector<8x32xf32>
    %528 = vector.extract_strided_slice %523 {offsets = [0, 96], sizes = [8, 32], strides = [1, 1]} : vector<8x128xf32> to vector<8x32xf32>
    %529 = arith.mulf %526, %513 : vector<8x32xf32>
    %530 = arith.mulf %525, %527 : vector<8x32xf32>
    %531 = arith.addf %529, %530 : vector<8x32xf32>
    %532 = math.tanh %531 : vector<8x32xf32>
    %533 = arith.mulf %528, %532 : vector<8x32xf32>
    %534 = vector.extract_strided_slice %475 {offsets = [24, 0], sizes = [8, 128], strides = [1, 1]} : vector<64x128xf32> to vector<8x128xf32>
    %cst_99 = arith.constant dense<0.000000e+00> : vector<8x128xf32>
    %535 = tpu.matmul %533, %477, %cst_99 {dimension_numbers = #tpu.dot_dimension_numbers<[1], [0], [0], [1], [0, 0, 1, 1], [], []>} : vector<8x32xf32>, vector<32x128xf32>, vector<8x128xf32> -> vector<8x128xf32>
    %536 = arith.addf %534, %535 : vector<8x128xf32>
    %537 = arith.negf %536 : vector<8x128xf32>
    %538 = math.exp %537 : vector<8x128xf32>
    %cst_100 = arith.constant 1.000000e+00 : f32
    %539 = vector.broadcast %cst_100 : f32 to vector<8x128xf32>
    %540 = arith.addf %539, %538 : vector<8x128xf32>
    %541 = arith.divf %539, %540 : vector<8x128xf32>
    %542 = math.tanh %536 : vector<8x128xf32>
    %543 = vector.extract_strided_slice %541 {offsets = [0, 0], sizes = [8, 32], strides = [1, 1]} : vector<8x128xf32> to vector<8x32xf32>
    %544 = vector.extract_strided_slice %541 {offsets = [0, 32], sizes = [8, 32], strides = [1, 1]} : vector<8x128xf32> to vector<8x32xf32>
    %545 = vector.extract_strided_slice %542 {offsets = [0, 64], sizes = [8, 32], strides = [1, 1]} : vector<8x128xf32> to vector<8x32xf32>
    %546 = vector.extract_strided_slice %541 {offsets = [0, 96], sizes = [8, 32], strides = [1, 1]} : vector<8x128xf32> to vector<8x32xf32>
    %547 = arith.mulf %544, %531 : vector<8x32xf32>
    %548 = arith.mulf %543, %545 : vector<8x32xf32>
    %549 = arith.addf %547, %548 : vector<8x32xf32>
    %550 = math.tanh %549 : vector<8x32xf32>
    %551 = arith.mulf %546, %550 : vector<8x32xf32>
    %552 = vector.extract_strided_slice %475 {offsets = [32, 0], sizes = [8, 128], strides = [1, 1]} : vector<64x128xf32> to vector<8x128xf32>
    %cst_101 = arith.constant dense<0.000000e+00> : vector<8x128xf32>
    %553 = tpu.matmul %551, %477, %cst_101 {dimension_numbers = #tpu.dot_dimension_numbers<[1], [0], [0], [1], [0, 0, 1, 1], [], []>} : vector<8x32xf32>, vector<32x128xf32>, vector<8x128xf32> -> vector<8x128xf32>
    %554 = arith.addf %552, %553 : vector<8x128xf32>
    %555 = arith.negf %554 : vector<8x128xf32>
    %556 = math.exp %555 : vector<8x128xf32>
    %cst_102 = arith.constant 1.000000e+00 : f32
    %557 = vector.broadcast %cst_102 : f32 to vector<8x128xf32>
    %558 = arith.addf %557, %556 : vector<8x128xf32>
    %559 = arith.divf %557, %558 : vector<8x128xf32>
    %560 = math.tanh %554 : vector<8x128xf32>
    %561 = vector.extract_strided_slice %559 {offsets = [0, 0], sizes = [8, 32], strides = [1, 1]} : vector<8x128xf32> to vector<8x32xf32>
    %562 = vector.extract_strided_slice %559 {offsets = [0, 32], sizes = [8, 32], strides = [1, 1]} : vector<8x128xf32> to vector<8x32xf32>
    %563 = vector.extract_strided_slice %560 {offsets = [0, 64], sizes = [8, 32], strides = [1, 1]} : vector<8x128xf32> to vector<8x32xf32>
    %564 = vector.extract_strided_slice %559 {offsets = [0, 96], sizes = [8, 32], strides = [1, 1]} : vector<8x128xf32> to vector<8x32xf32>
    %565 = arith.mulf %562, %549 : vector<8x32xf32>
    %566 = arith.mulf %561, %563 : vector<8x32xf32>
    %567 = arith.addf %565, %566 : vector<8x32xf32>
    %568 = math.tanh %567 : vector<8x32xf32>
    %569 = arith.mulf %564, %568 : vector<8x32xf32>
    %570 = vector.extract_strided_slice %475 {offsets = [40, 0], sizes = [8, 128], strides = [1, 1]} : vector<64x128xf32> to vector<8x128xf32>
    %cst_103 = arith.constant dense<0.000000e+00> : vector<8x128xf32>
    %571 = tpu.matmul %569, %477, %cst_103 {dimension_numbers = #tpu.dot_dimension_numbers<[1], [0], [0], [1], [0, 0, 1, 1], [], []>} : vector<8x32xf32>, vector<32x128xf32>, vector<8x128xf32> -> vector<8x128xf32>
    %572 = arith.addf %570, %571 : vector<8x128xf32>
    %573 = arith.negf %572 : vector<8x128xf32>
    %574 = math.exp %573 : vector<8x128xf32>
    %cst_104 = arith.constant 1.000000e+00 : f32
    %575 = vector.broadcast %cst_104 : f32 to vector<8x128xf32>
    %576 = arith.addf %575, %574 : vector<8x128xf32>
    %577 = arith.divf %575, %576 : vector<8x128xf32>
    %578 = math.tanh %572 : vector<8x128xf32>
    %579 = vector.extract_strided_slice %577 {offsets = [0, 0], sizes = [8, 32], strides = [1, 1]} : vector<8x128xf32> to vector<8x32xf32>
    %580 = vector.extract_strided_slice %577 {offsets = [0, 32], sizes = [8, 32], strides = [1, 1]} : vector<8x128xf32> to vector<8x32xf32>
    %581 = vector.extract_strided_slice %578 {offsets = [0, 64], sizes = [8, 32], strides = [1, 1]} : vector<8x128xf32> to vector<8x32xf32>
    %582 = vector.extract_strided_slice %577 {offsets = [0, 96], sizes = [8, 32], strides = [1, 1]} : vector<8x128xf32> to vector<8x32xf32>
    %583 = arith.mulf %580, %567 : vector<8x32xf32>
    %584 = arith.mulf %579, %581 : vector<8x32xf32>
    %585 = arith.addf %583, %584 : vector<8x32xf32>
    %586 = math.tanh %585 : vector<8x32xf32>
    %587 = arith.mulf %582, %586 : vector<8x32xf32>
    %588 = vector.extract_strided_slice %475 {offsets = [48, 0], sizes = [8, 128], strides = [1, 1]} : vector<64x128xf32> to vector<8x128xf32>
    %cst_105 = arith.constant dense<0.000000e+00> : vector<8x128xf32>
    %589 = tpu.matmul %587, %477, %cst_105 {dimension_numbers = #tpu.dot_dimension_numbers<[1], [0], [0], [1], [0, 0, 1, 1], [], []>} : vector<8x32xf32>, vector<32x128xf32>, vector<8x128xf32> -> vector<8x128xf32>
    %590 = arith.addf %588, %589 : vector<8x128xf32>
    %591 = arith.negf %590 : vector<8x128xf32>
    %592 = math.exp %591 : vector<8x128xf32>
    %cst_106 = arith.constant 1.000000e+00 : f32
    %593 = vector.broadcast %cst_106 : f32 to vector<8x128xf32>
    %594 = arith.addf %593, %592 : vector<8x128xf32>
    %595 = arith.divf %593, %594 : vector<8x128xf32>
    %596 = math.tanh %590 : vector<8x128xf32>
    %597 = vector.extract_strided_slice %595 {offsets = [0, 0], sizes = [8, 32], strides = [1, 1]} : vector<8x128xf32> to vector<8x32xf32>
    %598 = vector.extract_strided_slice %595 {offsets = [0, 32], sizes = [8, 32], strides = [1, 1]} : vector<8x128xf32> to vector<8x32xf32>
    %599 = vector.extract_strided_slice %596 {offsets = [0, 64], sizes = [8, 32], strides = [1, 1]} : vector<8x128xf32> to vector<8x32xf32>
    %600 = vector.extract_strided_slice %595 {offsets = [0, 96], sizes = [8, 32], strides = [1, 1]} : vector<8x128xf32> to vector<8x32xf32>
    %601 = arith.mulf %598, %585 : vector<8x32xf32>
    %602 = arith.mulf %597, %599 : vector<8x32xf32>
    %603 = arith.addf %601, %602 : vector<8x32xf32>
    %604 = math.tanh %603 : vector<8x32xf32>
    %605 = arith.mulf %600, %604 : vector<8x32xf32>
    %606 = vector.extract_strided_slice %475 {offsets = [56, 0], sizes = [8, 128], strides = [1, 1]} : vector<64x128xf32> to vector<8x128xf32>
    %cst_107 = arith.constant dense<0.000000e+00> : vector<8x128xf32>
    %607 = tpu.matmul %605, %477, %cst_107 {dimension_numbers = #tpu.dot_dimension_numbers<[1], [0], [0], [1], [0, 0, 1, 1], [], []>} : vector<8x32xf32>, vector<32x128xf32>, vector<8x128xf32> -> vector<8x128xf32>
    %608 = arith.addf %606, %607 : vector<8x128xf32>
    %609 = arith.negf %608 : vector<8x128xf32>
    %610 = math.exp %609 : vector<8x128xf32>
    %cst_108 = arith.constant 1.000000e+00 : f32
    %611 = vector.broadcast %cst_108 : f32 to vector<8x128xf32>
    %612 = arith.addf %611, %610 : vector<8x128xf32>
    %613 = arith.divf %611, %612 : vector<8x128xf32>
    %614 = math.tanh %608 : vector<8x128xf32>
    %615 = vector.extract_strided_slice %613 {offsets = [0, 0], sizes = [8, 32], strides = [1, 1]} : vector<8x128xf32> to vector<8x32xf32>
    %616 = vector.extract_strided_slice %613 {offsets = [0, 32], sizes = [8, 32], strides = [1, 1]} : vector<8x128xf32> to vector<8x32xf32>
    %617 = vector.extract_strided_slice %614 {offsets = [0, 64], sizes = [8, 32], strides = [1, 1]} : vector<8x128xf32> to vector<8x32xf32>
    %618 = vector.extract_strided_slice %613 {offsets = [0, 96], sizes = [8, 32], strides = [1, 1]} : vector<8x128xf32> to vector<8x32xf32>
    %619 = arith.mulf %616, %603 : vector<8x32xf32>
    %620 = arith.mulf %615, %617 : vector<8x32xf32>
    %621 = arith.addf %619, %620 : vector<8x32xf32>
    %622 = math.tanh %621 : vector<8x32xf32>
    %623 = arith.mulf %618, %622 : vector<8x32xf32>
    %624 = tpu.concatenate %497, %515, %533, %551, %569, %587, %605, %623 in 0 : vector<8x32xf32>, vector<8x32xf32>, vector<8x32xf32>, vector<8x32xf32>, vector<8x32xf32>, vector<8x32xf32>, vector<8x32xf32>, vector<8x32xf32> -> vector<64x32xf32>
    %c0_109 = arith.constant 0 : index
    %c0_110 = arith.constant 0 : index
    %625 = vector.load %arg4[%c0_109, %c0_110] : memref<32x128xf32, #tpu.memory_space<vmem>>, vector<32x128xf32>
    %cst_111 = arith.constant dense<0.000000e+00> : vector<64x128xf32>
    %626 = tpu.matmul %624, %625, %cst_111 {dimension_numbers = #tpu.dot_dimension_numbers<[1], [0], [0], [1], [0, 0, 1, 1], [], []>} : vector<64x32xf32>, vector<32x128xf32>, vector<64x128xf32> -> vector<64x128xf32>
    %c0_112 = arith.constant 0 : index
    %c0_113 = arith.constant 0 : index
    %627 = vector.load %arg5[%c0_112, %c0_113] : memref<1x128xf32, #tpu.memory_space<vmem>>, vector<1x128xf32>
    %628 = vector.broadcast %627 : vector<1x128xf32> to vector<64x128xf32>
    %629 = arith.addf %626, %628 : vector<64x128xf32>
    %cst_114 = arith.constant dense<0xFF800000> : vector<64xf32>
    %630 = vector.multi_reduction <maximumf>, %629, %cst_114 [1] : vector<64x128xf32> to vector<64xf32>
    %631 = vector.shape_cast %630 : vector<64xf32> to vector<64x1xf32>
    %632 = vector.broadcast %631 : vector<64x1xf32> to vector<64x128xf32>
    %633 = arith.subf %629, %632 : vector<64x128xf32>
    %634 = math.exp %633 : vector<64x128xf32>
    %cst_115 = arith.constant dense<0.000000e+00> : vector<64xf32>
    %635 = vector.multi_reduction <add>, %634, %cst_115 [1] : vector<64x128xf32> to vector<64xf32>
    %636 = vector.shape_cast %635 : vector<64xf32> to vector<64x1xf32>
    %637 = math.log %636 : vector<64x1xf32>
    %638 = arith.addf %637, %631 : vector<64x1xf32>
    %639 = vector.broadcast %638 : vector<64x1xf32> to vector<64x128xf32>
    %640 = arith.subf %629, %639 : vector<64x128xf32>
    %c0_116 = arith.constant 0 : index
    %c0_117 = arith.constant 0 : index
    %641 = vector.load %arg6[%c0_116, %c0_117] : memref<64x128xf32, #tpu.memory_space<vmem>>, vector<64x128xf32>
    tpu.vector_store %arg6[%c0_116, %c0_117], %640 {strides = array<i32>} : memref<64x128xf32, #tpu.memory_space<vmem>>, vector<64x128xf32>,
    return
  }
}

</mosaic_0001>

<bundles_post_ra>
// kernel: tpu_custom_call.1
= control target key start
LH: loop header
LB: loop body
LE: loop exit
PB: predicated region body
PF: predicated region fallthrough
CT: control target
= control target key end

     0   :  { %11 = vsyncpa [#allocation3], 0  ;;  %s3665_s0 = inlined_call_operand.vmem [shape: f32[64,32], index: 0, kind: input, shape index: {}]   ;;  %s3666_s1 = inlined_call_operand.hbm [shape: f32[4,32,128], index: 1, kind: input, shape index: {}]   ;;  %s3667_s2 = inlined_call_operand.hbm [shape: f32[4,32,128], index: 2, kind: input, shape index: {}]   ;;  %s3668_s3 = inlined_call_operand.vmem [shape: f32[4,1,128], index: 3, kind: input, shape index: {}]   ;;  %s3669_s4 = inlined_call_operand.vmem [shape: f32[32,128], index: 4, kind: input, shape index: {}]   ;;  %s3670_s5 = inlined_call_operand.vmem [shape: f32[1,128], index: 5, kind: input, shape index: {}]   ;;  %s3671_s6 = inlined_call_operand.hbm [shape: f32[64,128], index: 6, kind: output, shape index: {}]  }
   0x1   :  { %12 = vsyncpa [#allocation6], 0 }
   0x2   :  { %13 = vsyncpa [#allocation4], 0  ;;  %s20_s23 = sshll.u32 %s3666_s1, 4  ;;  %s2991_s24 = smov [#allocation2]   ;;  %s21_s23 = int_to_ptr.hbm [resolvable:$true] %s20_s23 }
   0x3   :  { %s22_s25 = sshll.u32 %s2991_s24, 4  ;;  %s33_s28 = sshll.u32 %s3667_s2, 4  ;;  %s23_s25 = int_to_ptr.vmem [resolvable:$true] %s22_s25  ;;  %s34_s28 = int_to_ptr.hbm [resolvable:$true] %s33_s28 }
   0x4   :  { %s2992_s29 = smov 128   ;;  %s2993_s30 = smov 8  }
   0x5   :  { %28 = dma.hbm_to_vmem [thread:$0]  %s21_s23, 2048, %s23_s25, [#allocation3], %s2992_s29, %s2992_s29, %s2993_s30  }
   0x6   :  { %s2994_s7 = smov [#allocation5]  }
   0x7   :  { %s35_s8 = sshll.u32 %s2994_s7, 4  ;;  %s36_s8 = int_to_ptr.vmem [resolvable:$true] %s35_s8 }
   0x8   :  { %41 = dma.hbm_to_vmem [thread:$0]  %s34_s28, 2048, %s36_s8, [#allocation6], %s2992_s29, %s2992_s29, %s2993_s30  }
   0x9   :  { %2985 = dma.done.wait [#allocation3], 2048  }
   0xa   :  { %2986 = vsyncadd [#allocation3], 4294965248 }
   0xb   :  { %2987 = dma.done.wait [#allocation6], 2048  }
   0xc   :  { %2988 = vsyncadd [#allocation6], 4294965248  ;;  %v67_v0 = vld [vmem:[#allocation2 + $0x18] sm:$0xff]  ;;  %v66_v1 = vld [vmem:[#allocation2 + $0x10] sm:$0xff]  ;;  %vm72_vm0 = vcmask 261120   ;;  %v2995_v9 = vmov 0.0  }
   0xd   :  { %v3046_v2 = vld [vmem:[#allocation5 + $0x18] sm:$0xff]  ;;  %109 = vmatpush.msra.mxu0 %v67_v0  ;;  %v3049_v3 = vld [vmem:[#allocation5 + $0x10] sm:$0xff]  ;;  %v65_v4 = vld [vmem:[#allocation2 + $0x8] sm:$0xff]  ;;  %2597 = vmatpush.msra.mxu3 %v67_v0  ;;  %s2996_s11 = smov 64   ;;  %s2997_s12 = smov 32  }
   0xe   :  { %157 = vmatpush.msra.mxu1 %v3046_v2  ;;  %v64_v5 = vld [vmem:[#allocation2] sm:$0xff]  ;;  %v3051_v6 = vld [vmem:[#allocation5 + $0x8] sm:$0xff]  ;;  %220 = vmatpush.msra.mxu2 %v3046_v2  ;;  %v63_v63 = vld [vmem:[%s3665_s0 + $0x38] sm:$0xff]  ;;  %s2480_s25 = sshll.u32 %s3671_s6, 4  ;;  %s2481_s25 = int_to_ptr.hbm [resolvable:$true] %s2480_s25 }
   0xf   :  { %110 = vmatpush.msra.mxu0 %v66_v1  ;;  %v3055_v7 = vld [vmem:[#allocation5] sm:$0xff]  ;;  %2598 = vmatpush.msra.mxu3 %v66_v1  ;;  %v57_v37 = vld [vmem:[%s3665_s0 + $0x8] sm:$0xff] }
  0x10   :  { %158 = vmatpush.msra.mxu1 %v3049_v3  ;;  %221 = vmatpush.msra.mxu2 %v3049_v3  ;;  %v56_v8 = vld [vmem:[%s3665_s0] sm:$0xff] }
  0x11   :  { %111 = vmatpush.msra.mxu0 %v65_v4  ;;  %2599 = vmatpush.msra.mxu3 %v65_v4  ;;  %v3086_v10 = vld [vmem:[%s3668_s3] ss:$0 sm:$0xff]  ;;  %v58_v4 = vld [vmem:[%s3665_s0 + $0x10] sm:$0xff] }
  0x12   :  { %159 = vmatpush.msra.mxu1 %v3051_v6  ;;  %222 = vmatpush.msra.mxu2 %v3051_v6 }
  0x13   :  { %112 = vmatpush.msra.mxu0 %v64_v5  ;;  %2600 = vmatpush.msra.mxu3 %v64_v5 }
  0x14   :  { %160 = vmatpush.msra.mxu1 %v3055_v7  ;;  %2494 = vmatmul.msk.f32.vlgmr.msra.gmra.mxu0 %vm72_vm0, %v56_v8 }
  0x15   :  { %161 = vmatmul.f32.vlgmr.msra.gmra.mxu1 %v2995_v9  ;;  %223 = vmatpush.msra.mxu2 %v3055_v7 }
  0x16   :  { %283 = vmatpush.msrb.mxu3 %v3046_v2  ;;  %346 = vmatpush.msrb.mxu1 %v3046_v2 }
  0x17   :  { %409 = vmatpush.msrb.mxu2 %v3046_v2  ;;  %2501 = vmatmul.msk.f32.vlgmr.msra.gmra.mxu3 %vm72_vm0, %v63_v63 }
  0x18   :  { %284 = vmatpush.msrb.mxu3 %v3049_v3  ;;  %347 = vmatpush.msrb.mxu1 %v3049_v3 }
  0x19   :  { %410 = vmatpush.msrb.mxu2 %v3049_v3 }
  0x1a   :  { %285 = vmatpush.msrb.mxu3 %v3051_v6  ;;  %348 = vmatpush.msrb.mxu1 %v3051_v6 }
  0x1b   :  { %411 = vmatpush.msrb.mxu2 %v3051_v6 }
  0x1c   :  { %286 = vmatpush.msrb.mxu3 %v3055_v7  ;;  %349 = vmatpush.msrb.mxu1 %v3055_v7 }
  0x1d   :  { %412 = vmatpush.msrb.mxu2 %v3055_v7  ;;  %2495 = vmatmul.msk.f32.gmra.mxu0 %vm72_vm0, %v57_v37 }
  0x1e   :  { %535 = vmatpush.msra.mxu1 %v3046_v2  ;;  %472 = vmatpush.msra.mxu3 %v3046_v2 }
  0x20   :  { %536 = vmatpush.msra.mxu1 %v3049_v3  ;;  %473 = vmatpush.msra.mxu3 %v3049_v3 }
  0x22   :  { %537 = vmatpush.msra.mxu1 %v3051_v6  ;;  %474 = vmatpush.msra.mxu3 %v3051_v6 }
  0x24   :  { %538 = vmatpush.msra.mxu1 %v3055_v7  ;;  %475 = vmatpush.msra.mxu3 %v3055_v7 }
  0x25   :  { %2496 = vmatmul.msk.f32.gmra.mxu0 %vm72_vm0, %v58_v4 }
  0x91   :  { %v114_v11 = vpop.f32.mrf.mxu0 }
  0x92   :  { %v162_v12 = vpop.f32.mrf.mxu1  ;;  %v115_v13 = vadd.f32 %v3086_v10, %v114_v11 }
  0x94   :  { %v165_v14 = vadd.f32 %v162_v12, %v115_v13 }
  0x96   :  { %2622 = vtanh.f32 %v165_v14  ;;  %v2502_v16 = vmul.f32 -1.442695, %v165_v14 }
  0x98   :  { %2624 = vpow2.f32 %v2502_v16 }
  0x9a   :  { %v117_v39 = vpop.f32.mrf.mxu0 }
  0x9b   :  { %v118_v40 = vadd.f32 %v3086_v10, %v117_v39 }
  0x9c   :  { %v2623_v15 = vpop.eup %2622 }
  0x9d   :  { %188 = vrot.lane.b32.xlu0 %v2623_v15, %s2996_s11 }
  0x9e   :  { %v2625_v17 = vpop.eup %2624 }
  0x9f   :  { %v169_v18 = vadd.f32 1.0, %v2625_v17 }
  0xa1   :  { %2626 = vrcp.f32 %v169_v18  ;;  %v181_v24 = vand.u32 2147483648, %v169_v18  ;;  %vm175_vm2 = vweird.f32 %v169_v18  ;;  %v179_v25 = vand.u32 2147483647, %v169_v18 }
  0xa3   :  { %v182_v27 = vor.u32 1.1754944e-38, %v181_v24  ;;  %vm180_vm4 = vcmp.eq.f32.partialorder %v179_v25, 8.507059e+37 }
  0xa7   :  { %v2627_v19 = vpop.eup %2626 }
  0xa8   :  { %v171_v20 = vmul.f32 %v2627_v19, %v169_v18  ;;  %vm176_vm1 = vweird.f32 %v2627_v19 }
  0xa9   :  { %vm177_vm3 = vmor %vm175_vm2, %vm176_vm1 }
  0xaa   :  { %v172_v21 = vsub.f32 1.0, %v171_v20 }
  0xac   :  { %v173_v22 = vmul.f32 %v2627_v19, %v172_v21 }
  0xae   :  { %v174_v23 = vadd.f32 %v2627_v19, %v173_v22 }
  0xb0   :  { %v178_v26 = vsel %vm177_vm3, %v2627_v19, %v174_v23 }
  0xb1   :  { %v183_v29 = vsel %vm180_vm4, %v182_v27, %v178_v26 }
  0xb2   :  { %v186_v31 = vmul.f32 0.0, %v183_v29 }
 0x10f   :  { %v189_v28 = vpop.permute.xlu0 %188 }
 0x110   :  { %v191_v30 = vmul.f32 %v189_v28, %v183_v29 }
 0x112   :  { %193 = vrot.lane.b32.xlu0 %v191_v30, %s2997_s12 }
 0x184   :  { %v194_v32 = vpop.permute.xlu0 %193 }
 0x185   :  { %v196_v33 = vadd.f32 %v194_v32, %v186_v31  ;;  %v59_v31 = vld [vmem:[%s3665_s0 + $0x18] sm:$0xff] }
 0x186   :  { %2497 = vmatmul.msk.f32.gmra.mxu0 %vm72_vm0, %v59_v31  ;;  %v647_v31 = vld [vmem:[#allocation2 + $0x30] sm:$0xff] }
 0x187   :  { %2628 = vtanh.f32 %v196_v33 }
 0x18d   :  { %v2629_v34 = vpop.eup %2628 }
 0x18e   :  { %199 = vrot.lane.b32.xlu1 %v2629_v34, %s2996_s11 }
 0x200   :  { %v200_v35 = vpop.permute.xlu1 %199 }
 0x201   :  { %v202_v36 = vmul.f32 %v200_v35, %v183_v29 }
 0x203   :  { %204 = vrot.lane.b32.xlu1 %v202_v36, %s2997_s12 }
 0x275   :  { %v3097_v38 = vpop.permute.xlu1 %204 }
 0x276   :  { %2503 = vmatmul.msk.f32.vlgmr.msra.gmra.mxu2 %vm72_vm0, %v3097_v38 }
 0x277   :  { %598 = vmatpush.msra.mxu2 %v3046_v2  ;;  %v3126_v2 = vpop.f32.mrf.mxu3 }
 0x279   :  { %599 = vmatpush.msra.mxu2 %v3049_v3  ;;  %v120_v3 = vpop.f32.mrf.mxu0 }
 0x27b   :  { %600 = vmatpush.msra.mxu2 %v3051_v6  ;;  %v121_v6 = vadd.f32 %v3086_v10, %v120_v3 }
 0x27d   :  { %601 = vmatpush.msra.mxu2 %v3055_v7 }
 0x281   :  { %v123_v35 = vpop.f32.mrf.mxu0 }
 0x282   :  { %v124_v36 = vadd.f32 %v3086_v10, %v123_v35  ;;  %v645_v35 = vld [vmem:[#allocation2 + $0x20] sm:$0xff] }
 0x2f9   :  { %v225_v41 = vpop.f32.mrf.mxu2 }
 0x2fa   :  { %v228_v42 = vadd.f32 %v225_v41, %v118_v40 }
 0x2fc   :  { %2630 = vtanh.f32 %v228_v42  ;;  %v2504_v44 = vmul.f32 -1.442695, %v228_v42 }
 0x2fe   :  { %2632 = vpow2.f32 %v2504_v44 }
 0x302   :  { %v2631_v43 = vpop.eup %2630 }
 0x303   :  { %251 = vrot.lane.b32.xlu2 %v2631_v43, %s2996_s11 }
 0x304   :  { %v2633_v45 = vpop.eup %2632 }
 0x305   :  { %v232_v46 = vadd.f32 1.0, %v2633_v45 }
 0x307   :  { %2634 = vrcp.f32 %v232_v46  ;;  %v244_v52 = vand.u32 2147483648, %v232_v46  ;;  %vm238_vm6 = vweird.f32 %v232_v46  ;;  %v242_v53 = vand.u32 2147483647, %v232_v46 }
 0x309   :  { %v245_v55 = vor.u32 1.1754944e-38, %v244_v52  ;;  %vm243_vm8 = vcmp.eq.f32.partialorder %v242_v53, 8.507059e+37 }
 0x30d   :  { %v2635_v47 = vpop.eup %2634 }
 0x30e   :  { %v234_v48 = vmul.f32 %v2635_v47, %v232_v46  ;;  %vm239_vm5 = vweird.f32 %v2635_v47 }
 0x30f   :  { %vm240_vm7 = vmor %vm238_vm6, %vm239_vm5 }
 0x310   :  { %v235_v49 = vsub.f32 1.0, %v234_v48 }
 0x312   :  { %v236_v50 = vmul.f32 %v2635_v47, %v235_v49 }
 0x314   :  { %v237_v51 = vadd.f32 %v2635_v47, %v236_v50 }
 0x316   :  { %v241_v54 = vsel %vm240_vm7, %v2635_v47, %v237_v51 }
 0x317   :  { %v246_v57 = vsel %vm243_vm8, %v245_v55, %v241_v54 }
 0x318   :  { %v249_v59 = vmul.f32 %v246_v57, %v196_v33 }
 0x35d   :  { %v252_v56 = vpop.permute.xlu2 %251 }
 0x35e   :  { %v254_v58 = vmul.f32 %v252_v56, %v246_v57 }
 0x360   :  { %256 = vrot.lane.b32.xlu2 %v254_v58, %s2997_s12 }
 0x3ba   :  { %v257_v60 = vpop.permute.xlu2 %256 }
 0x3bb   :  { %v259_v61 = vadd.f32 %v257_v60, %v249_v59 }
 0x3bd   :  { %2636 = vtanh.f32 %v259_v61 }
 0x3c3   :  { %v2637_v62 = vpop.eup %2636 }
 0x3c4   :  { %262 = vrot.lane.b32.xlu0 %v2637_v62, %s2996_s11  ;;  %v60_v62 = vld [vmem:[%s3665_s0 + $0x20] sm:$0xff] }
 0x3c5   :  { %2498 = vmatmul.msk.f32.gmra.mxu0 %vm72_vm0, %v60_v62  ;;  %v3181_v62 = vld [vmem:[#allocation5 + $0x38] sm:$0xff] }
 0x436   :  { %v263_v0 = vpop.permute.xlu0 %262 }
 0x437   :  { %v265_v1 = vmul.f32 %v263_v0, %v246_v57 }
 0x439   :  { %267 = vrot.lane.b32.xlu1 %v265_v1, %s2997_s12 }
 0x442   :  { %v126_v0 = vpop.f32.mrf.mxu0 }
 0x443   :  { %v127_v1 = vadd.f32 %v3086_v10, %v126_v0  ;;  %v3187_v0 = vld [vmem:[#allocation5 + $0x28] sm:$0xff] }
 0x4ab   :  { %v3122_v5 = vpop.permute.xlu1 %267 }
 0x4ac   :  { %2505 = vmatmul.msk.f32.vlgmr.msrb.gmra.mxu3 %vm72_vm0, %v3122_v5 }
 0x52f   :  { %v288_v7 = vpop.f32.mrf.mxu3 }
 0x530   :  { %v291_v8 = vadd.f32 %v288_v7, %v121_v6 }
 0x532   :  { %2638 = vtanh.f32 %v291_v8  ;;  %v2506_v12 = vmul.f32 -1.442695, %v291_v8 }
 0x534   :  { %2640 = vpow2.f32 %v2506_v12 }
 0x538   :  { %v2639_v11 = vpop.eup %2638 }
 0x539   :  { %314 = vrot.lane.b32.xlu2 %v2639_v11, %s2996_s11 }
 0x53a   :  { %v2641_v13 = vpop.eup %2640 }
 0x53b   :  { %v295_v14 = vadd.f32 1.0, %v2641_v13 }
 0x53d   :  { %2642 = vrcp.f32 %v295_v14  ;;  %v307_v20 = vand.u32 2147483648, %v295_v14  ;;  %vm301_vm10 = vweird.f32 %v295_v14  ;;  %v305_v21 = vand.u32 2147483647, %v295_v14 }
 0x53f   :  { %v308_v23 = vor.u32 1.1754944e-38, %v307_v20  ;;  %vm306_vm12 = vcmp.eq.f32.partialorder %v305_v21, 8.507059e+37 }
 0x543   :  { %v2643_v15 = vpop.eup %2642 }
 0x544   :  { %v297_v16 = vmul.f32 %v2643_v15, %v295_v14  ;;  %vm302_vm9 = vweird.f32 %v2643_v15 }
 0x545   :  { %vm303_vm11 = vmor %vm301_vm10, %vm302_vm9 }
 0x546   :  { %v298_v17 = vsub.f32 1.0, %v297_v16 }
 0x548   :  { %v299_v18 = vmul.f32 %v2643_v15, %v298_v17 }
 0x54a   :  { %v300_v19 = vadd.f32 %v2643_v15, %v299_v18 }
 0x54c   :  { %v304_v22 = vsel %vm303_vm11, %v2643_v15, %v300_v19 }
 0x54d   :  { %v309_v25 = vsel %vm306_vm12, %v308_v23, %v304_v22 }
 0x54e   :  { %v312_v27 = vmul.f32 %v309_v25, %v259_v61 }
 0x593   :  { %v315_v24 = vpop.permute.xlu2 %314 }
 0x594   :  { %v317_v26 = vmul.f32 %v315_v24, %v309_v25 }
 0x596   :  { %319 = vrot.lane.b32.xlu0 %v317_v26, %s2997_s12 }
 0x608   :  { %v320_v28 = vpop.permute.xlu0 %319 }
 0x609   :  { %v322_v29 = vadd.f32 %v320_v28, %v312_v27 }
 0x60b   :  { %2644 = vtanh.f32 %v322_v29 }
 0x611   :  { %v2645_v30 = vpop.eup %2644 }
 0x612   :  { %325 = vrot.lane.b32.xlu1 %v2645_v30, %s2996_s11  ;;  %v648_v30 = vld [vmem:[#allocation2 + $0x38] sm:$0xff] }
 0x613   :  { %671 = vmatpush.msrb.mxu3 %v648_v30 }
 0x615   :  { %672 = vmatpush.msrb.mxu3 %v647_v31 }
 0x684   :  { %v326_v32 = vpop.permute.xlu1 %325 }
 0x685   :  { %v328_v33 = vmul.f32 %v326_v32, %v309_v25  ;;  %v61_v32 = vld [vmem:[%s3665_s0 + $0x28] sm:$0xff] }
 0x686   :  { %2499 = vmatmul.msk.f32.gmra.mxu0 %vm72_vm0, %v61_v32 }
 0x687   :  { %330 = vrot.lane.b32.xlu2 %v328_v33, %s2997_s12  ;;  %v646_v33 = vld [vmem:[#allocation2 + $0x28] sm:$0xff] }
 0x688   :  { %673 = vmatpush.msrb.mxu3 %v646_v33 }
 0x68a   :  { %674 = vmatpush.msrb.mxu3 %v645_v35 }
 0x6e1   :  { %v3137_v34 = vpop.permute.xlu2 %330 }
 0x6e2   :  { %2507 = vmatmul.msk.f32.vlgmr.msrb.gmra.mxu1 %vm72_vm0, %v3137_v34 }
 0x6e3   :  { %717 = vmatpush.msrb.mxu1 %v3181_v62 }
 0x75f   :  { %v351_v37 = vpop.f32.mrf.mxu1 }
 0x760   :  { %v354_v39 = vadd.f32 %v351_v37, %v124_v36  ;;  %v129_v37 = vpop.f32.mrf.mxu0 }
 0x762   :  { %2646 = vtanh.f32 %v354_v39  ;;  %v2508_v41 = vmul.f32 -1.442695, %v354_v39  ;;  %v130_v39 = vadd.f32 %v3086_v10, %v129_v37 }
 0x764   :  { %2648 = vpow2.f32 %v2508_v41 }
 0x768   :  { %v2647_v40 = vpop.eup %2646 }
 0x769   :  { %377 = vrot.lane.b32.xlu0 %v2647_v40, %s2996_s11 }
 0x76a   :  { %v2649_v42 = vpop.eup %2648 }
 0x76b   :  { %v358_v43 = vadd.f32 1.0, %v2649_v42 }
 0x76d   :  { %2650 = vrcp.f32 %v358_v43  ;;  %v370_v49 = vand.u32 2147483648, %v358_v43  ;;  %vm364_vm14 = vweird.f32 %v358_v43  ;;  %v368_v50 = vand.u32 2147483647, %v358_v43 }
 0x76f   :  { %v371_v52 = vor.u32 1.1754944e-38, %v370_v49  ;;  %vm369_vm1 = vcmp.eq.f32.partialorder %v368_v50, 8.507059e+37 }
 0x773   :  { %v2651_v44 = vpop.eup %2650 }
 0x774   :  { %v360_v45 = vmul.f32 %v2651_v44, %v358_v43  ;;  %vm365_vm13 = vweird.f32 %v2651_v44 }
 0x775   :  { %vm366_vm15 = vmor %vm364_vm14, %vm365_vm13 }
 0x776   :  { %v361_v46 = vsub.f32 1.0, %v360_v45 }
 0x778   :  { %v362_v47 = vmul.f32 %v2651_v44, %v361_v46 }
 0x77a   :  { %v363_v48 = vadd.f32 %v2651_v44, %v362_v47 }
 0x77c   :  { %v367_v51 = vsel %vm366_vm15, %v2651_v44, %v363_v48 }
 0x77d   :  { %v372_v54 = vsel %vm369_vm1, %v371_v52, %v367_v51 }
 0x77e   :  { %v375_v56 = vmul.f32 %v372_v54, %v322_v29 }
 0x7db   :  { %v378_v53 = vpop.permute.xlu0 %377 }
 0x7dc   :  { %v380_v55 = vmul.f32 %v378_v53, %v372_v54 }
 0x7de   :  { %382 = vrot.lane.b32.xlu1 %v380_v55, %s2997_s12 }
 0x850   :  { %v383_v57 = vpop.permute.xlu1 %382 }
 0x851   :  { %v385_v58 = vadd.f32 %v383_v57, %v375_v56 }
 0x853   :  { %2652 = vtanh.f32 %v385_v58 }
 0x859   :  { %v2653_v59 = vpop.eup %2652 }
 0x85a   :  { %388 = vrot.lane.b32.xlu2 %v2653_v59, %s2996_s11  ;;  %v62_v59 = vld [vmem:[%s3665_s0 + $0x30] sm:$0xff] }
 0x85b   :  { %2500 = vmatmul.msk.f32.gmra.mxu0 %vm72_vm0, %v62_v59 }
 0x8b4   :  { %v389_v60 = vpop.permute.xlu2 %388 }
 0x8b5   :  { %v391_v61 = vmul.f32 %v389_v60, %v372_v54 }
 0x8b7   :  { %393 = vrot.lane.b32.xlu0 %v391_v61, %s2997_s12 }
 0x929   :  { %v394_v63 = vpop.permute.xlu0 %393 }
 0x92a   :  { %2509 = vmatmul.msk.f32.vlgmr.msrb.gmra.mxu2 %vm72_vm0, %v394_v63 }
 0x92b   :  { %780 = vmatpush.msrb.mxu2 %v3181_v62 }
 0x9ad   :  { %v414_v4 = vpop.f32.mrf.mxu2 }
 0x9ae   :  { %v417_v3 = vadd.f32 %v414_v4, %v127_v1  ;;  %v3191_v1 = vld [vmem:[#allocation5 + $0x20] sm:$0xff] }
 0x9b0   :  { %2654 = vtanh.f32 %v417_v3  ;;  %v2510_v7 = vmul.f32 -1.442695, %v417_v3  ;;  %v132_v3 = vpop.f32.mrf.mxu0 }
 0x9b2   :  { %2656 = vpow2.f32 %v2510_v7 }
 0x9b6   :  { %v2655_v6 = vpop.eup %2654 }
 0x9b7   :  { %440 = vrot.lane.b32.xlu1 %v2655_v6, %s2996_s11  ;;  %v133_v6 = vadd.f32 %v3086_v10, %v132_v3 }
 0x9b8   :  { %v2657_v8 = vpop.eup %2656 }
 0x9b9   :  { %v421_v11 = vadd.f32 1.0, %v2657_v8 }
 0x9bb   :  { %2658 = vrcp.f32 %v421_v11  ;;  %v433_v17 = vand.u32 2147483648, %v421_v11  ;;  %vm427_vm3 = vweird.f32 %v421_v11  ;;  %v431_v18 = vand.u32 2147483647, %v421_v11 }
 0x9bd   :  { %v434_v20 = vor.u32 1.1754944e-38, %v433_v17  ;;  %vm432_vm5 = vcmp.eq.f32.partialorder %v431_v18, 8.507059e+37 }
 0x9c1   :  { %v2659_v12 = vpop.eup %2658 }
 0x9c2   :  { %v423_v13 = vmul.f32 %v2659_v12, %v421_v11  ;;  %vm428_vm2 = vweird.f32 %v2659_v12  ;;  %v3212_v11 = vld [vmem:[%s3668_s3 + $0x1] ss:$0 sm:$0xff] }
 0x9c3   :  { %vm429_vm4 = vmor %vm427_vm3, %vm428_vm2 }
 0x9c4   :  { %v424_v14 = vsub.f32 1.0, %v423_v13 }
 0x9c6   :  { %v425_v15 = vmul.f32 %v2659_v12, %v424_v14 }
 0x9c8   :  { %v426_v16 = vadd.f32 %v2659_v12, %v425_v15 }
 0x9ca   :  { %v430_v19 = vsel %vm429_vm4, %v2659_v12, %v426_v16 }
 0x9cb   :  { %v435_v22 = vsel %vm432_vm5, %v434_v20, %v430_v19 }
 0x9cc   :  { %v438_v24 = vmul.f32 %v435_v22, %v385_v58 }
 0xa29   :  { %v441_v21 = vpop.permute.xlu1 %440 }
 0xa2a   :  { %v443_v23 = vmul.f32 %v441_v21, %v435_v22 }
 0xa2c   :  { %445 = vrot.lane.b32.xlu2 %v443_v23, %s2997_s12 }
 0xa86   :  { %v446_v25 = vpop.permute.xlu2 %445 }
 0xa87   :  { %v448_v26 = vadd.f32 %v446_v25, %v438_v24 }
 0xa89   :  { %2660 = vtanh.f32 %v448_v26 }
 0xa8f   :  { %v2661_v27 = vpop.eup %2660 }
 0xa90   :  { %451 = vrot.lane.b32.xlu0 %v2661_v27, %s2996_s11 }
 0xb02   :  { %v452_v28 = vpop.permute.xlu0 %451 }
 0xb03   :  { %v454_v29 = vmul.f32 %v452_v28, %v435_v22 }
 0xb05   :  { %456 = vrot.lane.b32.xlu1 %v454_v29, %s2997_s12 }
 0xb77   :  { %v457_v36 = vpop.permute.xlu1 %456 }
 0xb78   :  { %2511 = vmatmul.msk.f32.vlgmr.msra.gmra.mxu3 %vm72_vm0, %v457_v36 }
 0xb80   :  { %2518 = vmatmul.msk.f32.vlgmr.msrb.gmra.mxu3 %vm72_vm0, %v3097_v38 }
 0xb88   :  { %2519 = vmatmul.msk.f32.gmra.mxu3 %vm72_vm0, %v3122_v5 }
 0xb90   :  { %2520 = vmatmul.msk.f32.gmra.mxu3 %vm72_vm0, %v3137_v34 }
 0xb98   :  { %2521 = vmatmul.msk.f32.gmra.mxu3 %vm72_vm0, %v394_v63  ;;  %v3183_v63 = vld [vmem:[#allocation5 + $0x30] sm:$0xff] }
 0xb99   :  { %718 = vmatpush.msrb.mxu1 %v3183_v63  ;;  %781 = vmatpush.msrb.mxu2 %v3183_v63 }
 0xb9b   :  { %719 = vmatpush.msrb.mxu1 %v3187_v0  ;;  %782 = vmatpush.msrb.mxu2 %v3187_v0 }
 0xb9d   :  { %720 = vmatpush.msrb.mxu1 %v3191_v1  ;;  %783 = vmatpush.msrb.mxu2 %v3191_v1 }
 0xba0   :  { %2522 = vmatmul.msk.f32.gmra.mxu3 %vm72_vm0, %v457_v36 }
 0xbfb   :  { %v477_v40 = vpop.f32.mrf.mxu3 }
 0xbfc   :  { %v480_v41 = vadd.f32 %v477_v40, %v130_v39 }
 0xbfe   :  { %2662 = vtanh.f32 %v480_v41  ;;  %v2512_v38 = vmul.f32 -1.442695, %v480_v41 }
 0xc00   :  { %2664 = vpow2.f32 %v2512_v38 }
 0xc03   :  { %v676_v12 = vpop.f32.mrf.mxu3 }
 0xc04   :  { %v2663_v42 = vpop.eup %2662  ;;  %v677_v13 = vadd.f32 %v3212_v11, %v676_v12 }
 0xc05   :  { %503 = vrot.lane.b32.xlu2 %v2663_v42, %s2996_s11 }
 0xc06   :  { %v2665_v43 = vpop.eup %2664 }
 0xc07   :  { %v484_v5 = vadd.f32 1.0, %v2665_v43 }
 0xc09   :  { %2666 = vrcp.f32 %v484_v5  ;;  %v496_v48 = vand.u32 2147483648, %v484_v5  ;;  %vm490_vm7 = vweird.f32 %v484_v5  ;;  %v494_v49 = vand.u32 2147483647, %v484_v5 }
 0xc0b   :  { %v497_v51 = vor.u32 1.1754944e-38, %v496_v48  ;;  %vm495_vm9 = vcmp.eq.f32.partialorder %v494_v49, 8.507059e+37 }
 0xc0f   :  { %v2667_v44 = vpop.eup %2666 }
 0xc10   :  { %v486_v34 = vmul.f32 %v2667_v44, %v484_v5  ;;  %vm491_vm6 = vweird.f32 %v2667_v44 }
 0xc11   :  { %vm492_vm8 = vmor %vm490_vm7, %vm491_vm6 }
 0xc12   :  { %v487_v45 = vsub.f32 1.0, %v486_v34 }
 0xc14   :  { %v488_v46 = vmul.f32 %v2667_v44, %v487_v45 }
 0xc16   :  { %v489_v47 = vadd.f32 %v2667_v44, %v488_v46 }
 0xc18   :  { %v493_v50 = vsel %vm492_vm8, %v2667_v44, %v489_v47 }
 0xc19   :  { %v498_v53 = vsel %vm495_vm9, %v497_v51, %v493_v50 }
 0xc1a   :  { %v501_v55 = vmul.f32 %v498_v53, %v448_v26 }
 0xc5f   :  { %v504_v52 = vpop.permute.xlu2 %503 }
 0xc60   :  { %v506_v54 = vmul.f32 %v504_v52, %v498_v53 }
 0xc62   :  { %508 = vrot.lane.b32.xlu0 %v506_v54, %s2997_s12 }
 0xcd4   :  { %v509_v56 = vpop.permute.xlu0 %508 }
 0xcd5   :  { %v3172_v57 = vadd.f32 %v509_v56, %v501_v55 }
 0xcd7   :  { %2668 = vtanh.f32 %v3172_v57 }
 0xcdd   :  { %v2669_v58 = vpop.eup %2668 }
 0xcde   :  { %514 = vrot.lane.b32.xlu1 %v2669_v58, %s2996_s11 }
 0xd50   :  { %v515_v60 = vpop.permute.xlu1 %514 }
 0xd51   :  { %v517_v61 = vmul.f32 %v515_v60, %v498_v53 }
 0xd53   :  { %519 = vrot.lane.b32.xlu2 %v517_v61, %s2997_s12  ;;  %v679_v61 = vpop.f32.mrf.mxu3 }
 0xdad   :  { %v520_v4 = vpop.permute.xlu2 %519 }
 0xdae   :  { %2513 = vmatmul.msk.f32.vlgmr.msra.gmra.mxu1 %vm72_vm0, %v520_v4  ;;  %2523 = vmatmul.msk.f32.gmra.mxu3 %vm72_vm0, %v520_v4  ;;  %v680_v4 = vadd.f32 %v3212_v11, %v679_v61 }
 0xdaf   :  { %843 = vmatpush.msra.mxu1 %v3181_v62 }
 0xdb1   :  { %844 = vmatpush.msra.mxu1 %v3183_v63 }
 0xdb3   :  { %845 = vmatpush.msra.mxu1 %v3187_v0 }
 0xdb5   :  { %846 = vmatpush.msra.mxu1 %v3191_v1 }
 0xdb6   :  { %721 = vmatmul.f32.vlgmr.msrb.gmra.mxu1 %v2995_v9 }
 0xdb7   :  { %969 = vmatpush.msrb.mxu1 %v3181_v62 }
 0xdb9   :  { %970 = vmatpush.msrb.mxu1 %v3183_v63 }
 0xdbb   :  { %971 = vmatpush.msrb.mxu1 %v3187_v0 }
 0xdbd   :  { %972 = vmatpush.msrb.mxu1 %v3191_v1 }
 0xe2b   :  { %v540_v7 = vpop.f32.mrf.mxu1 }
 0xe2c   :  { %v543_v8 = vadd.f32 %v540_v7, %v133_v6 }
 0xe2e   :  { %2670 = vtanh.f32 %v543_v8  ;;  %v2514_v10 = vmul.f32 -1.442695, %v543_v8 }
 0xe33   :  { %v722_v14 = vpop.f32.mrf.mxu1 }
 0xe34   :  { %v2671_v15 = vpop.eup %2670  ;;  %v725_v16 = vadd.f32 %v722_v14, %v677_v13 }
 0xe35   :  { %566 = vrot.lane.b32.xlu0 %v2671_v15, %s2996_s11 }
 0xe36   :  { %2672 = vtanh.f32 %v725_v16  ;;  %v2526_v18 = vmul.f32 -1.442695, %v725_v16 }
 0xe37   :  { %2674 = vpow2.f32 %v2514_v10 }
 0xe38   :  { %2676 = vpow2.f32 %v2526_v18 }
 0xe3c   :  { %v2673_v17 = vpop.eup %2672 }
 0xe3d   :  { %748 = vrot.lane.b32.xlu1 %v2673_v17, %s2996_s11  ;;  %v2675_v19 = vpop.eup %2674 }
 0xe3e   :  { %v547_v20 = vadd.f32 1.0, %v2675_v19  ;;  %v2677_v21 = vpop.eup %2676 }
 0xe3f   :  { %v729_v22 = vadd.f32 1.0, %v2677_v21 }
 0xe40   :  { %2678 = vrcp.f32 %v547_v20  ;;  %v559_v31 = vand.u32 2147483648, %v547_v20  ;;  %vm553_vm11 = vweird.f32 %v547_v20  ;;  %v557_v32 = vand.u32 2147483647, %v547_v20 }
 0xe41   :  { %2680 = vrcp.f32 %v729_v22  ;;  %v741_v42 = vand.u32 2147483648, %v729_v22  ;;  %vm735_vm15 = vweird.f32 %v729_v22  ;;  %v739_v38 = vand.u32 2147483647, %v729_v22 }
 0xe42   :  { %v560_v36 = vor.u32 1.1754944e-38, %v559_v31  ;;  %vm558_vm13 = vcmp.eq.f32.partialorder %v557_v32, 8.507059e+37  ;;  %v682_v32 = vpop.f32.mrf.mxu3 }
 0xe43   :  { %v742_v5 = vor.u32 1.1754944e-38, %v741_v42  ;;  %vm740_vm2 = vcmp.eq.f32.partialorder %v739_v38, 8.507059e+37 }
 0xe46   :  { %v2679_v23 = vpop.eup %2678 }
 0xe47   :  { %v549_v24 = vmul.f32 %v2679_v23, %v547_v20  ;;  %v2681_v26 = vpop.eup %2680  ;;  %vm554_vm10 = vweird.f32 %v2679_v23 }
 0xe48   :  { %v731_v28 = vmul.f32 %v2681_v26, %v729_v22  ;;  %vm555_vm12 = vmor %vm553_vm11, %vm554_vm10  ;;  %vm736_vm14 = vweird.f32 %v2681_v26 }
 0xe49   :  { %v550_v25 = vsub.f32 1.0, %v549_v24  ;;  %vm737_vm1 = vmor %vm735_vm15, %vm736_vm14 }
 0xe4a   :  { %v732_v30 = vsub.f32 1.0, %v731_v28  ;;  %v685_v61 = vpop.f32.mrf.mxu3 }
 0xe4b   :  { %v551_v27 = vmul.f32 %v2679_v23, %v550_v25 }
 0xe4c   :  { %v733_v35 = vmul.f32 %v2681_v26, %v732_v30 }
 0xe4d   :  { %v552_v29 = vadd.f32 %v2679_v23, %v551_v27 }
 0xe4e   :  { %v734_v41 = vadd.f32 %v2681_v26, %v733_v35 }
 0xe4f   :  { %v556_v33 = vsel %vm555_vm12, %v2679_v23, %v552_v29 }
 0xe50   :  { %v561_v39 = vsel %vm558_vm13, %v560_v36, %v556_v33  ;;  %v738_v43 = vsel %vm737_vm1, %v2681_v26, %v734_v41  ;;  %v683_v33 = vadd.f32 %v3212_v11, %v682_v32 }
 0xe51   :  { %v743_v34 = vsel %vm740_vm2, %v742_v5, %v738_v43  ;;  %v564_v46 = vmul.f32 %v561_v39, %v3172_v57 }
 0xe52   :  { %v746_v50 = vmul.f32 0.0, %v743_v34 }
 0xea7   :  { %v567_v37 = vpop.permute.xlu0 %566 }
 0xea8   :  { %v569_v40 = vmul.f32 %v567_v37, %v561_v39 }
 0xeaa   :  { %571 = vrot.lane.b32.xlu2 %v569_v40, %s2997_s12 }
 0xeaf   :  { %v749_v44 = vpop.permute.xlu1 %748 }
 0xeb0   :  { %v751_v45 = vmul.f32 %v749_v44, %v743_v34 }
 0xeb2   :  { %753 = vrot.lane.b32.xlu0 %v751_v45, %s2997_s12 }
 0xf04   :  { %v572_v47 = vpop.permute.xlu2 %571 }
 0xf05   :  { %v3220_v48 = vadd.f32 %v572_v47, %v564_v46 }
 0xf07   :  { %2682 = vtanh.f32 %v3220_v48 }
 0xf0d   :  { %v2683_v49 = vpop.eup %2682 }
 0xf0e   :  { %577 = vrot.lane.b32.xlu1 %v2683_v49, %s2996_s11 }
 0xf24   :  { %v754_v51 = vpop.permute.xlu0 %753 }
 0xf25   :  { %v756_v52 = vadd.f32 %v754_v51, %v746_v50 }
 0xf27   :  { %2684 = vtanh.f32 %v756_v52 }
 0xf2d   :  { %v2685_v53 = vpop.eup %2684 }
 0xf2e   :  { %759 = vrot.lane.b32.xlu2 %v2685_v53, %s2996_s11 }
 0xf80   :  { %v578_v54 = vpop.permute.xlu1 %577 }
 0xf81   :  { %v580_v55 = vmul.f32 %v578_v54, %v561_v39 }
 0xf83   :  { %582 = vrot.lane.b32.xlu0 %v580_v55, %s2997_s12 }
 0xf88   :  { %v760_v56 = vpop.permute.xlu2 %759 }
 0xf89   :  { %v762_v57 = vmul.f32 %v760_v56, %v743_v34 }
 0xf8b   :  { %764 = vrot.lane.b32.xlu1 %v762_v57, %s2997_s12 }
 0xff5   :  { %v583_v58 = vpop.permute.xlu0 %582 }
 0xff6   :  { %2515 = vmatmul.msk.f32.vlgmr.msra.gmra.mxu2 %vm72_vm0, %v583_v58  ;;  %2524 = vmatmul.msk.f32.gmra.mxu3 %vm72_vm0, %v583_v58 }
 0xff7   :  { %906 = vmatpush.msra.mxu2 %v3181_v62 }
 0xff9   :  { %907 = vmatpush.msra.mxu2 %v3183_v63 }
 0xffb   :  { %908 = vmatpush.msra.mxu2 %v3187_v0 }
 0xffd   :  { %v3232_v59 = vpop.permute.xlu1 %764  ;;  %909 = vmatpush.msra.mxu2 %v3191_v1 }
 0xffe   :  { %2527 = vmatmul.msk.f32.vlgmr.msrb.gmra.mxu2 %vm72_vm0, %v3232_v59 }
 0xfff   :  { %1032 = vmatpush.msrb.mxu2 %v3181_v62 }
0x1001   :  { %1033 = vmatpush.msrb.mxu2 %v3183_v63 }
0x1003   :  { %1034 = vmatpush.msrb.mxu2 %v3187_v0 }
0x1005   :  { %1035 = vmatpush.msrb.mxu2 %v3191_v1 }
0x1079   :  { %v3241_v60 = vpop.f32.mrf.mxu2 }
0x1081   :  { %v785_v3 = vpop.f32.mrf.mxu2 }
0x1082   :  { %v788_v6 = vadd.f32 %v785_v3, %v680_v4  ;;  %v686_v4 = vadd.f32 %v3212_v11, %v685_v61 }
0x1084   :  { %2686 = vtanh.f32 %v788_v6  ;;  %v2528_v8 = vmul.f32 -1.442695, %v788_v6 }
0x1086   :  { %2688 = vpow2.f32 %v2528_v8 }
0x108a   :  { %v2687_v7 = vpop.eup %2686 }
0x108b   :  { %811 = vrot.lane.b32.xlu2 %v2687_v7, %s2996_s11 }
0x108c   :  { %v2689_v12 = vpop.eup %2688 }
0x108d   :  { %v792_v13 = vadd.f32 1.0, %v2689_v12 }
0x108f   :  { %2690 = vrcp.f32 %v792_v13  ;;  %v804_v18 = vand.u32 2147483648, %v792_v13  ;;  %vm798_vm4 = vweird.f32 %v792_v13  ;;  %v802_v19 = vand.u32 2147483647, %v792_v13 }
0x1091   :  { %v805_v21 = vor.u32 1.1754944e-38, %v804_v18  ;;  %vm803_vm6 = vcmp.eq.f32.partialorder %v802_v19, 8.507059e+37 }
0x1095   :  { %v2691_v14 = vpop.eup %2690 }
0x1096   :  { %v794_v15 = vmul.f32 %v2691_v14, %v792_v13  ;;  %vm799_vm3 = vweird.f32 %v2691_v14 }
0x1097   :  { %vm800_vm5 = vmor %vm798_vm4, %vm799_vm3 }
0x1098   :  { %v795_v16 = vsub.f32 1.0, %v794_v15 }
0x109a   :  { %v796_v17 = vmul.f32 %v2691_v14, %v795_v16 }
0x109c   :  { %v797_v10 = vadd.f32 %v2691_v14, %v796_v17 }
0x109e   :  { %v801_v20 = vsel %vm800_vm5, %v2691_v14, %v797_v10 }
0x109f   :  { %v806_v23 = vsel %vm803_vm6, %v805_v21, %v801_v20 }
0x10a0   :  { %v809_v25 = vmul.f32 %v806_v23, %v756_v52 }
0x10e5   :  { %v812_v22 = vpop.permute.xlu2 %811 }
0x10e6   :  { %v814_v24 = vmul.f32 %v812_v22, %v806_v23 }
0x10e8   :  { %816 = vrot.lane.b32.xlu0 %v814_v24, %s2997_s12 }
0x115a   :  { %v817_v26 = vpop.permute.xlu0 %816 }
0x115b   :  { %v819_v27 = vadd.f32 %v817_v26, %v809_v25 }
0x115d   :  { %2692 = vtanh.f32 %v819_v27 }
0x1163   :  { %v2693_v28 = vpop.eup %2692 }
0x1164   :  { %822 = vrot.lane.b32.xlu1 %v2693_v28, %s2996_s11  ;;  %v688_v28 = vpop.f32.mrf.mxu3 }
0x11d6   :  { %v823_v29 = vpop.permute.xlu1 %822 }
0x11d7   :  { %v825_v30 = vmul.f32 %v823_v29, %v806_v23  ;;  %v689_v29 = vadd.f32 %v3212_v11, %v688_v28  ;;  %v1206_v28 = vld [vmem:[#allocation2 + $0x48] sm:$0xff] }
0x11d9   :  { %827 = vrot.lane.b32.xlu2 %v825_v30, %s2997_s12 }
0x1233   :  { %v3248_v31 = vpop.permute.xlu2 %827 }
0x1234   :  { %2529 = vmatmul.msk.f32.vlgmr.msra.gmra.mxu1 %vm72_vm0, %v3248_v31 }
0x1235   :  { %1095 = vmatpush.msra.mxu1 %v3181_v62 }
0x1237   :  { %1096 = vmatpush.msra.mxu1 %v3183_v63 }
0x1239   :  { %1097 = vmatpush.msra.mxu1 %v3187_v0 }
0x123b   :  { %1098 = vmatpush.msra.mxu1 %v3191_v1 }
0x12b1   :  { %v848_v35 = vpop.f32.mrf.mxu1 }
0x12b2   :  { %v851_v36 = vadd.f32 %v848_v35, %v683_v33 }
0x12b4   :  { %2694 = vtanh.f32 %v851_v36  ;;  %v2530_v39 = vmul.f32 -1.442695, %v851_v36 }
0x12b6   :  { %2696 = vpow2.f32 %v2530_v39 }
0x12ba   :  { %v2695_v37 = vpop.eup %2694 }
0x12bb   :  { %874 = vrot.lane.b32.xlu0 %v2695_v37, %s2996_s11 }
0x12bc   :  { %v2697_v40 = vpop.eup %2696 }
0x12bd   :  { %v855_v41 = vadd.f32 1.0, %v2697_v40 }
0x12bf   :  { %2698 = vrcp.f32 %v855_v41  ;;  %v867_v34 = vand.u32 2147483648, %v855_v41  ;;  %vm861_vm8 = vweird.f32 %v855_v41  ;;  %v865_v45 = vand.u32 2147483647, %v855_v41 }
0x12c1   :  { %v868_v47 = vor.u32 1.1754944e-38, %v867_v34  ;;  %vm866_vm10 = vcmp.eq.f32.partialorder %v865_v45, 8.507059e+37 }
0x12c5   :  { %v2699_v42 = vpop.eup %2698 }
0x12c6   :  { %v857_v38 = vmul.f32 %v2699_v42, %v855_v41  ;;  %vm862_vm7 = vweird.f32 %v2699_v42 }
0x12c7   :  { %vm863_vm9 = vmor %vm861_vm8, %vm862_vm7 }
0x12c8   :  { %v858_v43 = vsub.f32 1.0, %v857_v38 }
0x12ca   :  { %v859_v5 = vmul.f32 %v2699_v42, %v858_v43 }
0x12cc   :  { %v860_v44 = vadd.f32 %v2699_v42, %v859_v5 }
0x12ce   :  { %v864_v46 = vsel %vm863_vm9, %v2699_v42, %v860_v44 }
0x12cf   :  { %v869_v50 = vsel %vm866_vm10, %v868_v47, %v864_v46 }
0x12d0   :  { %v872_v52 = vmul.f32 %v869_v50, %v819_v27 }
0x132d   :  { %v875_v49 = vpop.permute.xlu0 %874 }
0x132e   :  { %v877_v51 = vmul.f32 %v875_v49, %v869_v50 }
0x1330   :  { %879 = vrot.lane.b32.xlu1 %v877_v51, %s2997_s12 }
0x13a2   :  { %v880_v53 = vpop.permute.xlu1 %879 }
0x13a3   :  { %v882_v54 = vadd.f32 %v880_v53, %v872_v52 }
0x13a5   :  { %2700 = vtanh.f32 %v882_v54 }
0x13ab   :  { %v2701_v55 = vpop.eup %2700 }
0x13ac   :  { %885 = vrot.lane.b32.xlu2 %v2701_v55, %s2996_s11 }
0x1406   :  { %v886_v56 = vpop.permute.xlu2 %885 }
0x1407   :  { %v888_v57 = vmul.f32 %v886_v56, %v869_v50  ;;  %v691_v56 = vpop.f32.mrf.mxu3 }
0x1409   :  { %890 = vrot.lane.b32.xlu0 %v888_v57, %s2997_s12  ;;  %v692_v57 = vadd.f32 %v3212_v11, %v691_v56  ;;  %v3314_v56 = vld [vmem:[#allocation5 + $0x50] sm:$0xff] }
0x147b   :  { %v3261_v58 = vpop.permute.xlu0 %890 }
0x147c   :  { %2531 = vmatmul.msk.f32.vlgmr.msra.gmra.mxu2 %vm72_vm0, %v3261_v58 }
0x147d   :  { %1158 = vmatpush.msra.mxu2 %v3181_v62 }
0x147f   :  { %1159 = vmatpush.msra.mxu2 %v3183_v63 }
0x1481   :  { %1160 = vmatpush.msra.mxu2 %v3187_v0 }
0x1483   :  { %1161 = vmatpush.msra.mxu2 %v3191_v1 }
0x14ff   :  { %v911_v3 = vpop.f32.mrf.mxu2 }
0x1500   :  { %v914_v6 = vadd.f32 %v911_v3, %v686_v4 }
0x1502   :  { %2702 = vtanh.f32 %v914_v6  ;;  %v2532_v8 = vmul.f32 -1.442695, %v914_v6 }
0x1504   :  { %2704 = vpow2.f32 %v2532_v8 }
0x1508   :  { %v2703_v7 = vpop.eup %2702 }
0x1509   :  { %937 = vrot.lane.b32.xlu1 %v2703_v7, %s2996_s11 }
0x150a   :  { %v2705_v12 = vpop.eup %2704 }
0x150b   :  { %v918_v13 = vadd.f32 1.0, %v2705_v12 }
0x150d   :  { %2706 = vrcp.f32 %v918_v13  ;;  %v930_v1 = vand.u32 2147483648, %v918_v13  ;;  %vm924_vm12 = vweird.f32 %v918_v13  ;;  %v928_v16 = vand.u32 2147483647, %v918_v13 }
0x150f   :  { %v931_v10 = vor.u32 1.1754944e-38, %v930_v1  ;;  %vm929_vm14 = vcmp.eq.f32.partialorder %v928_v16, 8.507059e+37 }
0x1513   :  { %v2707_v62 = vpop.eup %2706 }
0x1514   :  { %v920_v63 = vmul.f32 %v2707_v62, %v918_v13  ;;  %vm925_vm11 = vweird.f32 %v2707_v62 }
0x1515   :  { %vm926_vm13 = vmor %vm924_vm12, %vm925_vm11 }
0x1516   :  { %v921_v14 = vsub.f32 1.0, %v920_v63 }
0x1518   :  { %v922_v0 = vmul.f32 %v2707_v62, %v921_v14 }
0x151a   :  { %v923_v15 = vadd.f32 %v2707_v62, %v922_v0 }
0x151c   :  { %v927_v17 = vsel %vm926_vm13, %v2707_v62, %v923_v15 }
0x151d   :  { %v932_v19 = vsel %vm929_vm14, %v931_v10, %v927_v17 }
0x151e   :  { %v935_v21 = vmul.f32 %v932_v19, %v882_v54 }
0x157b   :  { %v938_v18 = vpop.permute.xlu1 %937 }
0x157c   :  { %v940_v20 = vmul.f32 %v938_v18, %v932_v19 }
0x157e   :  { %942 = vrot.lane.b32.xlu2 %v940_v20, %s2997_s12 }
0x15d8   :  { %v943_v22 = vpop.permute.xlu2 %942 }
0x15d9   :  { %v945_v23 = vadd.f32 %v943_v22, %v935_v21 }
0x15db   :  { %2708 = vtanh.f32 %v945_v23 }
0x15e1   :  { %v2709_v24 = vpop.eup %2708 }
0x15e2   :  { %948 = vrot.lane.b32.xlu0 %v2709_v24, %s2996_s11 }
0x1654   :  { %v949_v25 = vpop.permute.xlu0 %948 }
0x1655   :  { %v951_v26 = vmul.f32 %v949_v25, %v932_v19  ;;  %v1208_v25 = vld [vmem:[#allocation2 + $0x58] sm:$0xff] }
0x1656   :  { %2602 = vmatpush.msra.mxu3 %v1208_v25 }
0x1657   :  { %953 = vrot.lane.b32.xlu1 %v951_v26, %s2997_s12  ;;  %v1207_v26 = vld [vmem:[#allocation2 + $0x50] sm:$0xff] }
0x1658   :  { %2604 = vmatpush.msra.mxu3 %v1207_v26 }
0x165a   :  { %2606 = vmatpush.msra.mxu3 %v1206_v28 }
0x16c9   :  { %v3274_v27 = vpop.permute.xlu1 %953 }
0x16ca   :  { %2533 = vmatmul.msk.f32.vlgmr.msrb.gmra.mxu1 %vm72_vm0, %v3274_v27 }
0x16cb   :  { %1231 = vmatpush.msrb.mxu1 %v1208_v25 }
0x16cd   :  { %1232 = vmatpush.msrb.mxu1 %v1207_v26 }
0x16cf   :  { %1233 = vmatpush.msrb.mxu1 %v1206_v28 }
0x1747   :  { %v974_v30 = vpop.f32.mrf.mxu1 }
0x1748   :  { %v977_v32 = vadd.f32 %v974_v30, %v689_v29  ;;  %v1205_v29 = vld [vmem:[#allocation2 + $0x40] sm:$0xff] }
0x1749   :  { %1234 = vmatpush.msrb.mxu1 %v1205_v29  ;;  %2608 = vmatpush.msra.mxu3 %v1205_v29 }
0x174a   :  { %2710 = vtanh.f32 %v977_v32  ;;  %v2534_v35 = vmul.f32 -1.442695, %v977_v32  ;;  %v694_v32 = vpop.f32.mrf.mxu3 }
0x174c   :  { %2712 = vpow2.f32 %v2534_v35 }
0x1750   :  { %v2711_v33 = vpop.eup %2710 }
0x1751   :  { %1000 = vrot.lane.b32.xlu2 %v2711_v33, %s2996_s11  ;;  %v695_v33 = vadd.f32 %v3212_v11, %v694_v32 }
0x1752   :  { %v2713_v36 = vpop.eup %2712 }
0x1753   :  { %v981_v37 = vadd.f32 1.0, %v2713_v36 }
0x1755   :  { %2714 = vrcp.f32 %v981_v37  ;;  %v993_v43 = vand.u32 2147483648, %v981_v37  ;;  %vm987_vm1 = vweird.f32 %v981_v37  ;;  %v991_v5 = vand.u32 2147483647, %v981_v37 }
0x1757   :  { %v994_v34 = vor.u32 1.1754944e-38, %v993_v43  ;;  %vm992_vm3 = vcmp.eq.f32.partialorder %v991_v5, 8.507059e+37 }
0x175b   :  { %v2715_v39 = vpop.eup %2714 }
0x175c   :  { %v983_v40 = vmul.f32 %v2715_v39, %v981_v37  ;;  %vm988_vm15 = vweird.f32 %v2715_v39 }
0x175d   :  { %vm989_vm2 = vmor %vm987_vm1, %vm988_vm15 }
0x175e   :  { %v984_v41 = vsub.f32 1.0, %v983_v40 }
0x1760   :  { %v985_v42 = vmul.f32 %v2715_v39, %v984_v41 }
0x1762   :  { %v986_v38 = vadd.f32 %v2715_v39, %v985_v42 }
0x1764   :  { %v990_v44 = vsel %vm989_vm2, %v2715_v39, %v986_v38 }
0x1765   :  { %v995_v46 = vsel %vm992_vm3, %v994_v34, %v990_v44 }
0x1766   :  { %v998_v49 = vmul.f32 %v995_v46, %v945_v23 }
0x17ab   :  { %v1001_v45 = vpop.permute.xlu2 %1000 }
0x17ac   :  { %v1003_v47 = vmul.f32 %v1001_v45, %v995_v46 }
0x17ae   :  { %1005 = vrot.lane.b32.xlu0 %v1003_v47, %s2997_s12 }
0x1820   :  { %v1006_v50 = vpop.permute.xlu0 %1005 }
0x1821   :  { %v1008_v51 = vadd.f32 %v1006_v50, %v998_v49 }
0x1823   :  { %2716 = vtanh.f32 %v1008_v51 }
0x1829   :  { %v2717_v52 = vpop.eup %2716 }
0x182a   :  { %1011 = vrot.lane.b32.xlu1 %v2717_v52, %s2996_s11 }
0x189c   :  { %v1012_v53 = vpop.permute.xlu1 %1011 }
0x189d   :  { %v1014_v54 = vmul.f32 %v1012_v53, %v995_v46 }
0x189f   :  { %1016 = vrot.lane.b32.xlu2 %v1014_v54, %s2997_s12  ;;  %v3310_v54 = vld [vmem:[#allocation5 + $0x58] sm:$0xff] }
0x18a0   :  { %1340 = vmatpush.msrb.mxu0 %v3310_v54  ;;  %1718 = vmatpush.msrb.mxu3 %v3310_v54 }
0x18a2   :  { %1341 = vmatpush.msrb.mxu0 %v3314_v56  ;;  %1719 = vmatpush.msrb.mxu3 %v3314_v56 }
0x18f9   :  { %v3283_v55 = vpop.permute.xlu2 %1016 }
0x18fa   :  { %2535 = vmatmul.msk.f32.vlgmr.msrb.gmra.mxu2 %vm72_vm0, %v3283_v55 }
0x18fb   :  { %2601 = vmatpush.msrb.mxu2 %v1208_v25 }
0x18fd   :  { %2603 = vmatpush.msrb.mxu2 %v1207_v26 }
0x18ff   :  { %2605 = vmatpush.msrb.mxu2 %v1206_v28 }
0x1901   :  { %2607 = vmatpush.msrb.mxu2 %v1205_v29 }
0x197d   :  { %v1037_v61 = vpop.f32.mrf.mxu2 }
0x197e   :  { %v1040_v4 = vadd.f32 %v1037_v61, %v692_v57  ;;  %v3318_v57 = vld [vmem:[#allocation5 + $0x48] sm:$0xff]  ;;  %v3322_v61 = vld [vmem:[#allocation5 + $0x40] sm:$0xff] }
0x197f   :  { %1342 = vmatpush.msrb.mxu0 %v3318_v57  ;;  %1720 = vmatpush.msrb.mxu3 %v3318_v57 }
0x1980   :  { %2718 = vtanh.f32 %v1040_v4  ;;  %v2536_v6 = vmul.f32 -1.442695, %v1040_v4 }
0x1981   :  { %1343 = vmatpush.msrb.mxu0 %v3322_v61  ;;  %1721 = vmatpush.msrb.mxu3 %v3322_v61 }
0x1982   :  { %2720 = vpow2.f32 %v2536_v6 }
0x1983   :  { %1466 = vmatpush.msra.mxu0 %v3310_v54 }
0x1985   :  { %1467 = vmatpush.msra.mxu0 %v3314_v56 }
0x1986   :  { %v2719_v3 = vpop.eup %2718 }
0x1987   :  { %1063 = vrot.lane.b32.xlu0 %v2719_v3, %s2996_s11  ;;  %1468 = vmatpush.msra.mxu0 %v3318_v57 }
0x1988   :  { %v2721_v7 = vpop.eup %2720 }
0x1989   :  { %v1044_v8 = vadd.f32 1.0, %v2721_v7  ;;  %1469 = vmatpush.msra.mxu0 %v3322_v61  ;;  %v3364_v7 = vld [vmem:[%s3668_s3 + $0x2] ss:$0 sm:$0xff] }
0x198b   :  { %2722 = vrcp.f32 %v1044_v8  ;;  %v1056_v0 = vand.u32 2147483648, %v1044_v8  ;;  %vm1050_vm5 = vweird.f32 %v1044_v8  ;;  %v1054_v15 = vand.u32 2147483647, %v1044_v8 }
0x198d   :  { %v1057_v16 = vor.u32 1.1754944e-38, %v1056_v0  ;;  %vm1055_vm7 = vcmp.eq.f32.partialorder %v1054_v15, 8.507059e+37 }
0x1991   :  { %v2723_v12 = vpop.eup %2722 }
0x1992   :  { %v1046_v13 = vmul.f32 %v2723_v12, %v1044_v8  ;;  %vm1051_vm4 = vweird.f32 %v2723_v12 }
0x1993   :  { %vm1052_vm6 = vmor %vm1050_vm5, %vm1051_vm4 }
0x1994   :  { %v1047_v62 = vsub.f32 1.0, %v1046_v13 }
0x1996   :  { %v1048_v63 = vmul.f32 %v2723_v12, %v1047_v62 }
0x1998   :  { %v1049_v14 = vadd.f32 %v2723_v12, %v1048_v63 }
0x199a   :  { %v1053_v1 = vsel %vm1052_vm6, %v2723_v12, %v1049_v14 }
0x199b   :  { %v1058_v10 = vsel %vm1055_vm7, %v1057_v16, %v1053_v1 }
0x199c   :  { %v1061_v19 = vmul.f32 %v1058_v10, %v1008_v51 }
0x19f9   :  { %v1064_v17 = vpop.permute.xlu0 %1063 }
0x19fa   :  { %v1066_v18 = vmul.f32 %v1064_v17, %v1058_v10 }
0x19fc   :  { %1068 = vrot.lane.b32.xlu1 %v1066_v18, %s2997_s12 }
0x1a6e   :  { %v1069_v20 = vpop.permute.xlu1 %1068 }
0x1a6f   :  { %v1071_v21 = vadd.f32 %v1069_v20, %v1061_v19 }
0x1a71   :  { %2724 = vtanh.f32 %v1071_v21 }
0x1a77   :  { %v2725_v22 = vpop.eup %2724 }
0x1a78   :  { %1074 = vrot.lane.b32.xlu2 %v2725_v22, %s2996_s11 }
0x1ad2   :  { %v1075_v23 = vpop.permute.xlu2 %1074 }
0x1ad3   :  { %v1077_v24 = vmul.f32 %v1075_v23, %v1058_v10 }
0x1ad5   :  { %1079 = vrot.lane.b32.xlu0 %v1077_v24, %s2997_s12 }
0x1b47   :  { %v3292_v30 = vpop.permute.xlu0 %1079 }
0x1b48   :  { %2537 = vmatmul.msk.f32.vlgmr.msra.gmra.mxu1 %vm72_vm0, %v3292_v30 }
0x1b50   :  { %2542 = vmatmul.msk.f32.vlgmr.msrb.gmra.mxu1 %vm72_vm0, %v3232_v59 }
0x1b58   :  { %2543 = vmatmul.msk.f32.gmra.mxu1 %vm72_vm0, %v3248_v31 }
0x1b60   :  { %2544 = vmatmul.msk.f32.gmra.mxu1 %vm72_vm0, %v3261_v58 }
0x1bc5   :  { %v1100_v35 = vpop.f32.mrf.mxu1 }
0x1bc6   :  { %v1103_v36 = vadd.f32 %v1100_v35, %v695_v33 }
0x1bc8   :  { %2726 = vtanh.f32 %v1103_v36  ;;  %v2538_v39 = vmul.f32 -1.442695, %v1103_v36 }
0x1bca   :  { %2728 = vpow2.f32 %v2538_v39 }
0x1bcd   :  { %v1236_v8 = vpop.f32.mrf.mxu1 }
0x1bce   :  { %v2727_v37 = vpop.eup %2726  ;;  %v1237_v12 = vadd.f32 %v3364_v7, %v1236_v8 }
0x1bcf   :  { %1126 = vrot.lane.b32.xlu1 %v2727_v37, %s2996_s11 }
0x1bd0   :  { %v2729_v40 = vpop.eup %2728 }
0x1bd1   :  { %v1107_v41 = vadd.f32 1.0, %v2729_v40 }
0x1bd3   :  { %2730 = vrcp.f32 %v1107_v41  ;;  %v1119_v58 = vand.u32 2147483648, %v1107_v41  ;;  %vm1113_vm9 = vweird.f32 %v1107_v41  ;;  %v1117_v11 = vand.u32 2147483647, %v1107_v41 }
0x1bd5   :  { %v1120_v44 = vor.u32 1.1754944e-38, %v1119_v58  ;;  %vm1118_vm11 = vcmp.eq.f32.partialorder %v1117_v11, 8.507059e+37  ;;  %v1239_v36 = vpop.f32.mrf.mxu1 }
0x1bd6   :  { %v1240_v37 = vadd.f32 %v3364_v7, %v1239_v36 }
0x1bd9   :  { %v2731_v59 = vpop.eup %2730 }
0x1bda   :  { %v1109_v42 = vmul.f32 %v2731_v59, %v1107_v41  ;;  %vm1114_vm8 = vweird.f32 %v2731_v59 }
0x1bdb   :  { %vm1115_vm10 = vmor %vm1113_vm9, %vm1114_vm8 }
0x1bdc   :  { %v1110_v31 = vsub.f32 1.0, %v1109_v42 }
0x1bde   :  { %v1111_v38 = vmul.f32 %v2731_v59, %v1110_v31 }
0x1be0   :  { %v1112_v43 = vadd.f32 %v2731_v59, %v1111_v38 }
0x1be2   :  { %v1116_v5 = vsel %vm1115_vm10, %v2731_v59, %v1112_v43 }
0x1be3   :  { %v1121_v45 = vsel %vm1118_vm11, %v1120_v44, %v1116_v5 }
0x1be4   :  { %v1124_v47 = vmul.f32 %v1121_v45, %v1071_v21 }
0x1c41   :  { %v1127_v34 = vpop.permute.xlu1 %1126 }
0x1c42   :  { %v1129_v46 = vmul.f32 %v1127_v34, %v1121_v45 }
0x1c44   :  { %1131 = vrot.lane.b32.xlu2 %v1129_v46, %s2997_s12 }
0x1c9e   :  { %v1132_v49 = vpop.permute.xlu2 %1131 }
0x1c9f   :  { %v3305_v50 = vadd.f32 %v1132_v49, %v1124_v47 }
0x1ca1   :  { %2732 = vtanh.f32 %v3305_v50 }
0x1ca7   :  { %v2733_v51 = vpop.eup %2732 }
0x1ca8   :  { %1137 = vrot.lane.b32.xlu0 %v2733_v51, %s2996_s11 }
0x1d1a   :  { %v1138_v52 = vpop.permute.xlu0 %1137 }
0x1d1b   :  { %v1140_v53 = vmul.f32 %v1138_v52, %v1121_v45 }
0x1d1d   :  { %1142 = vrot.lane.b32.xlu1 %v1140_v53, %s2997_s12 }
0x1d8f   :  { %v3329_v4 = vpop.permute.xlu1 %1142 }
0x1d90   :  { %2539 = vmatmul.msk.f32.vlgmr.msra.gmra.mxu2 %vm72_vm0, %v3329_v4 }
0x1d91   :  { %1277 = vmatpush.msra.mxu2 %v3310_v54 }
0x1d93   :  { %1278 = vmatpush.msra.mxu2 %v3314_v56 }
0x1d95   :  { %1279 = vmatpush.msra.mxu2 %v3318_v57 }
0x1d97   :  { %1280 = vmatpush.msra.mxu2 %v3322_v61 }
0x1d98   :  { %2545 = vmatmul.msk.f32.vlgmr.msrb.gmra.mxu2 %vm72_vm0, %v3274_v27 }
0x1d99   :  { %1403 = vmatpush.msrb.mxu2 %v3310_v54 }
0x1d9b   :  { %1404 = vmatpush.msrb.mxu2 %v3314_v56 }
0x1d9d   :  { %1405 = vmatpush.msrb.mxu2 %v3318_v57 }
0x1d9f   :  { %1406 = vmatpush.msrb.mxu2 %v3322_v61 }
0x1da0   :  { %2546 = vmatmul.msk.f32.gmra.mxu2 %vm72_vm0, %v3283_v55 }
0x1da8   :  { %2547 = vmatmul.msk.f32.gmra.mxu2 %vm72_vm0, %v3292_v30 }
0x1db0   :  { %1281 = vmatmul.f32.vlgmr.msra.gmra.mxu2 %v2995_v9 }
0x1db1   :  { %1529 = vmatpush.msra.mxu2 %v3310_v54 }
0x1db3   :  { %1530 = vmatpush.msra.mxu2 %v3314_v56 }
0x1db5   :  { %1531 = vmatpush.msra.mxu2 %v3318_v57 }
0x1db7   :  { %1532 = vmatpush.msra.mxu2 %v3322_v61 }
0x1e13   :  { %v3353_v27 = vpop.f32.mrf.mxu2 }
0x1e1b   :  { %v3355_v3 = vpop.f32.mrf.mxu2 }
0x1e23   :  { %v3357_v6 = vpop.f32.mrf.mxu2 }
0x1e2b   :  { %v3359_v55 = vpop.f32.mrf.mxu2 }
0x1e33   :  { %v1282_v13 = vpop.f32.mrf.mxu2 }
0x1e34   :  { %v1285_v62 = vadd.f32 %v1282_v13, %v1237_v12 }
0x1e36   :  { %2734 = vtanh.f32 %v1285_v62  ;;  %v2550_v14 = vmul.f32 -1.442695, %v1285_v62 }
0x1e38   :  { %2736 = vpow2.f32 %v2550_v14  ;;  %v1242_v14 = vpop.f32.mrf.mxu1 }
0x1e3c   :  { %v2735_v63 = vpop.eup %2734 }
0x1e3d   :  { %1308 = vrot.lane.b32.xlu2 %v2735_v63, %s2996_s11 }
0x1e3e   :  { %v2737_v0 = vpop.eup %2736 }
0x1e3f   :  { %v1289_v15 = vadd.f32 1.0, %v2737_v0  ;;  %v1243_v0 = vadd.f32 %v3364_v7, %v1242_v14 }
0x1e41   :  { %2738 = vrcp.f32 %v1289_v15  ;;  %v1301_v19 = vand.u32 2147483648, %v1289_v15  ;;  %vm1295_vm13 = vweird.f32 %v1289_v15  ;;  %v1299_v20 = vand.u32 2147483647, %v1289_v15 }
0x1e43   :  { %v1302_v22 = vor.u32 1.1754944e-38, %v1301_v19  ;;  %vm1300_vm15 = vcmp.eq.f32.partialorder %v1299_v20, 8.507059e+37 }
0x1e47   :  { %v2739_v1 = vpop.eup %2738 }
0x1e48   :  { %v1291_v16 = vmul.f32 %v2739_v1, %v1289_v15  ;;  %vm1296_vm12 = vweird.f32 %v2739_v1 }
0x1e49   :  { %vm1297_vm14 = vmor %vm1295_vm13, %vm1296_vm12 }
0x1e4a   :  { %v1292_v17 = vsub.f32 1.0, %v1291_v16 }
0x1e4c   :  { %v1293_v10 = vmul.f32 %v2739_v1, %v1292_v17 }
0x1e4e   :  { %v1294_v18 = vadd.f32 %v2739_v1, %v1293_v10 }
0x1e50   :  { %v1298_v21 = vsel %vm1297_vm14, %v2739_v1, %v1294_v18 }
0x1e51   :  { %v1303_v24 = vsel %vm1300_vm15, %v1302_v22, %v1298_v21 }
0x1e52   :  { %v1306_v26 = vmul.f32 0.0, %v1303_v24 }
0x1e97   :  { %v1309_v23 = vpop.permute.xlu2 %1308 }
0x1e98   :  { %v1311_v25 = vmul.f32 %v1309_v23, %v1303_v24 }
0x1e9a   :  { %1313 = vrot.lane.b32.xlu0 %v1311_v25, %s2997_s12 }
0x1f0c   :  { %v1314_v28 = vpop.permute.xlu0 %1313 }
0x1f0d   :  { %v1316_v29 = vadd.f32 %v1314_v28, %v1306_v26 }
0x1f0f   :  { %2740 = vtanh.f32 %v1316_v29 }
0x1f15   :  { %v2741_v30 = vpop.eup %2740 }
0x1f16   :  { %1319 = vrot.lane.b32.xlu1 %v2741_v30, %s2996_s11 }
0x1f88   :  { %v1320_v32 = vpop.permute.xlu1 %1319 }
0x1f89   :  { %v1322_v33 = vmul.f32 %v1320_v32, %v1303_v24 }
0x1f8b   :  { %1324 = vrot.lane.b32.xlu2 %v1322_v33, %s2997_s12 }
0x1fe5   :  { %v3371_v35 = vpop.permute.xlu2 %1324 }
0x1fe6   :  { %2551 = vmatmul.msk.f32.vlgmr.msrb.gmra.mxu0 %vm72_vm0, %v3371_v35 }
0x1fe7   :  { %1592 = vmatpush.msrb.mxu0 %v3310_v54 }
0x1fe9   :  { %1593 = vmatpush.msrb.mxu0 %v3314_v56 }
0x1feb   :  { %1594 = vmatpush.msrb.mxu0 %v3318_v57 }
0x1fed   :  { %1595 = vmatpush.msrb.mxu0 %v3322_v61 }
0x2063   :  { %v1345_v39 = vpop.f32.mrf.mxu0 }
0x2064   :  { %v1348_v40 = vadd.f32 %v1345_v39, %v1240_v37  ;;  %v1246_v39 = vadd.f32 %v3364_v7, %v3355_v3 }
0x2066   :  { %2742 = vtanh.f32 %v1348_v40  ;;  %v2552_v59 = vmul.f32 -1.442695, %v1348_v40 }
0x2068   :  { %2744 = vpow2.f32 %v2552_v59 }
0x206c   :  { %v2743_v41 = vpop.eup %2742 }
0x206d   :  { %1371 = vrot.lane.b32.xlu0 %v2743_v41, %s2996_s11 }
0x206e   :  { %v2745_v42 = vpop.eup %2744 }
0x206f   :  { %v1352_v31 = vadd.f32 1.0, %v2745_v42 }
0x2071   :  { %2746 = vrcp.f32 %v1352_v31  ;;  %v1364_v44 = vand.u32 2147483648, %v1352_v31  ;;  %vm1358_vm2 = vweird.f32 %v1352_v31  ;;  %v1362_v34 = vand.u32 2147483647, %v1352_v31 }
0x2073   :  { %v1365_v46 = vor.u32 1.1754944e-38, %v1364_v44  ;;  %vm1363_vm4 = vcmp.eq.f32.partialorder %v1362_v34, 8.507059e+37 }
0x2077   :  { %v2747_v38 = vpop.eup %2746 }
0x2078   :  { %v1354_v43 = vmul.f32 %v2747_v38, %v1352_v31  ;;  %vm1359_vm1 = vweird.f32 %v2747_v38 }
0x2079   :  { %vm1360_vm3 = vmor %vm1358_vm2, %vm1359_vm1 }
0x207a   :  { %v1355_v58 = vsub.f32 1.0, %v1354_v43 }
0x207c   :  { %v1356_v11 = vmul.f32 %v2747_v38, %v1355_v58 }
0x207e   :  { %v1357_v5 = vadd.f32 %v2747_v38, %v1356_v11 }
0x2080   :  { %v1361_v45 = vsel %vm1360_vm3, %v2747_v38, %v1357_v5 }
0x2081   :  { %v1366_v49 = vsel %vm1363_vm4, %v1365_v46, %v1361_v45 }
0x2082   :  { %v1369_v52 = vmul.f32 %v1366_v49, %v1316_v29 }
0x20df   :  { %v1372_v47 = vpop.permute.xlu0 %1371 }
0x20e0   :  { %v1374_v51 = vmul.f32 %v1372_v47, %v1366_v49 }
0x20e2   :  { %1376 = vrot.lane.b32.xlu1 %v1374_v51, %s2997_s12 }
0x2154   :  { %v1377_v53 = vpop.permute.xlu1 %1376 }
0x2155   :  { %v1379_v8 = vadd.f32 %v1377_v53, %v1369_v52 }
0x2157   :  { %2748 = vtanh.f32 %v1379_v8 }
0x215d   :  { %v2749_v12 = vpop.eup %2748 }
0x215e   :  { %1382 = vrot.lane.b32.xlu2 %v2749_v12, %s2996_s11 }
0x21b8   :  { %v1383_v13 = vpop.permute.xlu2 %1382 }
0x21b9   :  { %v1385_v62 = vmul.f32 %v1383_v13, %v1366_v49 }
0x21bb   :  { %1387 = vrot.lane.b32.xlu0 %v1385_v62, %s2997_s12 }
0x222d   :  { %v3384_v63 = vpop.permute.xlu0 %1387 }
0x222e   :  { %2553 = vmatmul.msk.f32.vlgmr.msrb.gmra.mxu2 %vm72_vm0, %v3384_v63 }
0x222f   :  { %1655 = vmatpush.msrb.mxu2 %v3310_v54 }
0x2231   :  { %1656 = vmatpush.msrb.mxu2 %v3314_v56 }
0x2233   :  { %1657 = vmatpush.msrb.mxu2 %v3318_v57 }
0x2235   :  { %1658 = vmatpush.msrb.mxu2 %v3322_v61 }
0x22b1   :  { %v1408_v15 = vpop.f32.mrf.mxu2 }
0x22b2   :  { %v1411_v1 = vadd.f32 %v1408_v15, %v1243_v0  ;;  %v1249_v0 = vadd.f32 %v3364_v7, %v3357_v6 }
0x22b4   :  { %2750 = vtanh.f32 %v1411_v1  ;;  %v2554_v17 = vmul.f32 -1.442695, %v1411_v1 }
0x22b6   :  { %2752 = vpow2.f32 %v2554_v17 }
0x22ba   :  { %v2751_v16 = vpop.eup %2750 }
0x22bb   :  { %1434 = vrot.lane.b32.xlu1 %v2751_v16, %s2996_s11 }
0x22bc   :  { %v2753_v10 = vpop.eup %2752 }
0x22bd   :  { %v1415_v18 = vadd.f32 1.0, %v2753_v10 }
0x22bf   :  { %2754 = vrcp.f32 %v1415_v18  ;;  %v1427_v61 = vand.u32 2147483648, %v1415_v18  ;;  %vm1421_vm6 = vweird.f32 %v1415_v18  ;;  %v1425_v21 = vand.u32 2147483647, %v1415_v18 }
0x22c1   :  { %v1428_v23 = vor.u32 1.1754944e-38, %v1427_v61  ;;  %vm1426_vm8 = vcmp.eq.f32.partialorder %v1425_v21, 8.507059e+37 }
0x22c5   :  { %v2755_v54 = vpop.eup %2754 }
0x22c6   :  { %v1417_v56 = vmul.f32 %v2755_v54, %v1415_v18  ;;  %vm1422_vm5 = vweird.f32 %v2755_v54 }
0x22c7   :  { %vm1423_vm7 = vmor %vm1421_vm6, %vm1422_vm5 }
0x22c8   :  { %v1418_v19 = vsub.f32 1.0, %v1417_v56 }
0x22ca   :  { %v1419_v57 = vmul.f32 %v2755_v54, %v1418_v19 }
0x22cc   :  { %v1420_v20 = vadd.f32 %v2755_v54, %v1419_v57 }
0x22ce   :  { %v1424_v22 = vsel %vm1423_vm7, %v2755_v54, %v1420_v20 }
0x22cf   :  { %v1429_v25 = vsel %vm1426_vm8, %v1428_v23, %v1424_v22  ;;  %v2910_v22 = vld [vmem:[%s3668_s3] ss:$0 sm:$0xff] }
0x22d0   :  { %v1432_v28 = vmul.f32 %v1429_v25, %v1379_v8  ;;  %v136_v23 = vadd.f32 %v2910_v22, %v3126_v2 }
0x232d   :  { %v1435_v24 = vpop.permute.xlu1 %1434 }
0x232e   :  { %v1437_v26 = vmul.f32 %v1435_v24, %v1429_v25 }
0x2330   :  { %1439 = vrot.lane.b32.xlu2 %v1437_v26, %s2997_s12 }
0x238a   :  { %v1440_v29 = vpop.permute.xlu2 %1439 }
0x238b   :  { %v1442_v30 = vadd.f32 %v1440_v29, %v1432_v28 }
0x238d   :  { %2756 = vtanh.f32 %v1442_v30 }
0x2393   :  { %v2757_v32 = vpop.eup %2756 }
0x2394   :  { %1445 = vrot.lane.b32.xlu0 %v2757_v32, %s2996_s11 }
0x2406   :  { %v1446_v33 = vpop.permute.xlu0 %1445 }
0x2407   :  { %v1448_v36 = vmul.f32 %v1446_v33, %v1429_v25  ;;  %v606_v25 = vadd.f32 %v3241_v60, %v136_v23 }
0x2409   :  { %1450 = vrot.lane.b32.xlu1 %v1448_v36, %s2997_s12 }
0x247b   :  { %v3397_v37 = vpop.permute.xlu1 %1450 }
0x247c   :  { %2555 = vmatmul.msk.f32.vlgmr.msra.gmra.mxu0 %vm72_vm0, %v3397_v37 }
0x24f9   :  { %v1471_v40 = vpop.f32.mrf.mxu0 }
0x24fa   :  { %v1474_v41 = vadd.f32 %v1471_v40, %v1246_v39  ;;  %v2516_v39 = vmul.f32 -1.442695, %v606_v25 }
0x24fc   :  { %2758 = vtanh.f32 %v1474_v41  ;;  %v2556_v42 = vmul.f32 -1.442695, %v1474_v41 }
0x24fe   :  { %2760 = vpow2.f32 %v2556_v42 }
0x2502   :  { %v2759_v59 = vpop.eup %2758 }
0x2503   :  { %1497 = vrot.lane.b32.xlu2 %v2759_v59, %s2996_s11 }
0x2504   :  { %v2761_v31 = vpop.eup %2760 }
0x2505   :  { %v1478_v38 = vadd.f32 1.0, %v2761_v31 }
0x2507   :  { %2762 = vrcp.f32 %v1478_v38  ;;  %v1490_v34 = vand.u32 2147483648, %v1478_v38  ;;  %vm1484_vm10 = vweird.f32 %v1478_v38  ;;  %v1488_v3 = vand.u32 2147483647, %v1478_v38 }
0x2509   :  { %v1491_v46 = vor.u32 1.1754944e-38, %v1490_v34  ;;  %vm1489_vm12 = vcmp.eq.f32.partialorder %v1488_v3, 8.507059e+37 }
0x250d   :  { %v2763_v43 = vpop.eup %2762 }
0x250e   :  { %v1480_v58 = vmul.f32 %v2763_v43, %v1478_v38  ;;  %vm1485_vm9 = vweird.f32 %v2763_v43 }
0x250f   :  { %vm1486_vm11 = vmor %vm1484_vm10, %vm1485_vm9 }
0x2510   :  { %v1481_v11 = vsub.f32 1.0, %v1480_v58 }
0x2512   :  { %v1482_v5 = vmul.f32 %v2763_v43, %v1481_v11 }
0x2514   :  { %v1483_v44 = vadd.f32 %v2763_v43, %v1482_v5 }
0x2516   :  { %v1487_v45 = vsel %vm1486_vm11, %v2763_v43, %v1483_v44 }
0x2517   :  { %v1492_v49 = vsel %vm1489_vm12, %v1491_v46, %v1487_v45 }
0x2518   :  { %v1495_v52 = vmul.f32 %v1492_v49, %v1442_v30 }
0x255d   :  { %v1498_v47 = vpop.permute.xlu2 %1497 }
0x255e   :  { %v1500_v51 = vmul.f32 %v1498_v47, %v1492_v49  ;;  %v1768_v47 = vld [vmem:[#allocation2 + $0x78] sm:$0xff] }
0x255f   :  { %1791 = vmatpush.msra.mxu0 %v1768_v47 }
0x2560   :  { %1502 = vrot.lane.b32.xlu0 %v1500_v51, %s2997_s12  ;;  %v1766_v51 = vld [vmem:[#allocation2 + $0x68] sm:$0xff] }
0x25d2   :  { %v1503_v53 = vpop.permute.xlu0 %1502 }
0x25d3   :  { %v1505_v8 = vadd.f32 %v1503_v53, %v1495_v52  ;;  %v1765_v52 = vld [vmem:[#allocation2 + $0x60] sm:$0xff] }
0x25d5   :  { %2764 = vtanh.f32 %v1505_v8 }
0x25db   :  { %v2765_v12 = vpop.eup %2764 }
0x25dc   :  { %1508 = vrot.lane.b32.xlu1 %v2765_v12, %s2996_s11 }
0x264e   :  { %v1509_v13 = vpop.permute.xlu1 %1508 }
0x264f   :  { %v1511_v62 = vmul.f32 %v1509_v13, %v1492_v49  ;;  %v1767_v49 = vld [vmem:[#allocation2 + $0x70] sm:$0xff] }
0x2650   :  { %1792 = vmatpush.msra.mxu0 %v1767_v49 }
0x2651   :  { %1513 = vrot.lane.b32.xlu2 %v1511_v62, %s2997_s12 }
0x2652   :  { %1793 = vmatpush.msra.mxu0 %v1766_v51 }
0x2654   :  { %1794 = vmatpush.msra.mxu0 %v1765_v52 }
0x26ab   :  { %v3407_v14 = vpop.permute.xlu2 %1513 }
0x26ac   :  { %2557 = vmatmul.msk.f32.vlgmr.msra.gmra.mxu2 %vm72_vm0, %v3407_v14 }
0x272f   :  { %v1534_v15 = vpop.f32.mrf.mxu2 }
0x2730   :  { %v1537_v1 = vadd.f32 %v1534_v15, %v1249_v0 }
0x2732   :  { %2766 = vtanh.f32 %v1537_v1  ;;  %v2558_v17 = vmul.f32 -1.442695, %v1537_v1 }
0x2734   :  { %2768 = vpow2.f32 %v2558_v17 }
0x2738   :  { %v2767_v16 = vpop.eup %2766 }
0x2739   :  { %1560 = vrot.lane.b32.xlu0 %v2767_v16, %s2996_s11 }
0x273a   :  { %v2769_v10 = vpop.eup %2768 }
0x273b   :  { %v1541_v18 = vadd.f32 1.0, %v2769_v10 }
0x273d   :  { %2770 = vrcp.f32 %v1541_v18  ;;  %v1553_v61 = vand.u32 2147483648, %v1541_v18  ;;  %vm1547_vm14 = vweird.f32 %v1541_v18  ;;  %v1551_v6 = vand.u32 2147483647, %v1541_v18 }
0x273e   :  { %2772 = vtanh.f32 %v606_v25 }
0x273f   :  { %v1554_v24 = vor.u32 1.1754944e-38, %v1553_v61  ;;  %vm1552_vm1 = vcmp.eq.f32.partialorder %v1551_v6, 8.507059e+37 }
0x2743   :  { %v2771_v54 = vpop.eup %2770 }
0x2744   :  { %v1543_v56 = vmul.f32 %v2771_v54, %v1541_v18  ;;  %vm1548_vm13 = vweird.f32 %v2771_v54  ;;  %v2773_v30 = vpop.eup %2772 }
0x2745   :  { %vm1549_vm15 = vmor %vm1547_vm14, %vm1548_vm13 }
0x2746   :  { %v1544_v19 = vsub.f32 1.0, %v1543_v56 }
0x2748   :  { %v1545_v57 = vmul.f32 %v2771_v54, %v1544_v19 }
0x274a   :  { %v1546_v20 = vadd.f32 %v2771_v54, %v1545_v57 }
0x274c   :  { %v1550_v21 = vsel %vm1549_vm15, %v2771_v54, %v1546_v20 }
0x274d   :  { %v1555_v28 = vsel %vm1552_vm1, %v1554_v24, %v1550_v21 }
0x274e   :  { %v1558_v32 = vmul.f32 %v1555_v28, %v1505_v8  ;;  %v1252_v8 = vadd.f32 %v3364_v7, %v3359_v55 }
0x27ab   :  { %v1561_v26 = vpop.permute.xlu0 %1560 }
0x27ac   :  { %v1563_v29 = vmul.f32 %v1561_v26, %v1555_v28 }
0x27ae   :  { %1565 = vrot.lane.b32.xlu1 %v1563_v29, %s2997_s12 }
0x27b6   :  { %629 = vrot.lane.b32.xlu1 %v2773_v30, %s2996_s11 }
0x2820   :  { %v1566_v33 = vpop.permute.xlu1 %1565 }
0x2821   :  { %v3421_v36 = vadd.f32 %v1566_v33, %v1558_v32  ;;  %v2911_v32 = vld [vmem:[%s3668_s3 + $0x1] ss:$0 sm:$0xff] }
0x2823   :  { %2774 = vtanh.f32 %v3421_v36 }
0x2824   :  { %2776 = vpow2.f32 %v2516_v39  ;;  %v3458_v39 = vld [vmem:[#allocation5 + $0x78] sm:$0xff] }
0x2825   :  { %1837 = vmatpush.msra.mxu2 %v3458_v39 }
0x2828   :  { %v630_v3 = vpop.permute.xlu1 %629 }
0x2829   :  { %v2775_v2 = vpop.eup %2774 }
0x282a   :  { %1571 = vrot.lane.b32.xlu2 %v2775_v2, %s2996_s11  ;;  %v2777_v60 = vpop.eup %2776 }
0x282b   :  { %v610_v40 = vadd.f32 1.0, %v2777_v60  ;;  %v3460_v60 = vld [vmem:[#allocation5 + $0x70] sm:$0xff] }
0x282c   :  { %1838 = vmatpush.msra.mxu2 %v3460_v60 }
0x282d   :  { %2778 = vrcp.f32 %v610_v40  ;;  %v622_v11 = vand.u32 2147483648, %v610_v40  ;;  %vm616_vm3 = vweird.f32 %v610_v40  ;;  %v620_v5 = vand.u32 2147483647, %v610_v40 }
0x282f   :  { %v623_v34 = vor.u32 1.1754944e-38, %v622_v11  ;;  %vm621_vm5 = vcmp.eq.f32.partialorder %v620_v5, 8.507059e+37 }
0x2833   :  { %v2779_v41 = vpop.eup %2778 }
0x2834   :  { %v612_v59 = vmul.f32 %v2779_v41, %v610_v40  ;;  %vm617_vm2 = vweird.f32 %v2779_v41  ;;  %v3468_v40 = vld [vmem:[#allocation5 + $0x60] sm:$0xff] }
0x2835   :  { %vm618_vm4 = vmor %vm616_vm3, %vm617_vm2 }
0x2836   :  { %v613_v42 = vsub.f32 1.0, %v612_v59 }
0x2838   :  { %v614_v31 = vmul.f32 %v2779_v41, %v613_v42 }
0x283a   :  { %v615_v43 = vadd.f32 %v2779_v41, %v614_v31 }
0x283c   :  { %v619_v44 = vsel %vm618_vm4, %v2779_v41, %v615_v43 }
0x283d   :  { %v624_v45 = vsel %vm621_vm5, %v623_v34, %v619_v44 }
0x283e   :  { %v632_v46 = vmul.f32 %v630_v3, %v624_v45 }
0x2884   :  { %v1572_v38 = vpop.permute.xlu2 %1571 }
0x2885   :  { %v1574_v58 = vmul.f32 %v1572_v38, %v1555_v28 }
0x2887   :  { %1576 = vrot.lane.b32.xlu0 %v1574_v58, %s2997_s12 }
0x288f   :  { %634 = vrot.lane.b32.xlu0 %v632_v46, %s2997_s12 }
0x28f9   :  { %v1577_v53 = vpop.permute.xlu0 %1576 }
0x28fa   :  { %2559 = vmatmul.msk.f32.vlgmr.msrb.gmra.mxu0 %vm72_vm0, %v1577_v53 }
0x2901   :  { %v635_v62 = vpop.permute.xlu0 %634 }
0x2902   :  { %2566 = vmatmul.msk.f32.vlgmr.msra.gmra.mxu0 %vm72_vm0, %v3371_v35  ;;  %v627_v35 = vmul.f32 %v624_v45, %v3220_v48 }
0x2904   :  { %v637_v0 = vadd.f32 %v635_v62, %v627_v35 }
0x290a   :  { %2567 = vmatmul.msk.f32.gmra.mxu0 %vm72_vm0, %v3384_v63 }
0x2912   :  { %2568 = vmatmul.msk.f32.gmra.mxu0 %vm72_vm0, %v3397_v37 }
0x291a   :  { %2569 = vmatmul.msk.f32.gmra.mxu0 %vm72_vm0, %v3407_v14 }
0x2922   :  { %2570 = vmatmul.msk.f32.gmra.mxu0 %vm72_vm0, %v1577_v53  ;;  %v3493_v53 = vld [vmem:[%s3668_s3 + $0x3] ss:$0 sm:$0xff] }
0x2977   :  { %v1597_v12 = vpop.f32.mrf.mxu0 }
0x2978   :  { %v1600_v13 = vadd.f32 %v1597_v12, %v1252_v8 }
0x297a   :  { %2780 = vtanh.f32 %v1600_v13  ;;  %v2560_v37 = vmul.f32 -1.442695, %v1600_v13 }
0x297b   :  { %2782 = vtanh.f32 %v637_v0 }
0x297c   :  { %2784 = vpow2.f32 %v2560_v37 }
0x297f   :  { %v1796_v8 = vpop.f32.mrf.mxu0 }
0x2980   :  { %v2781_v15 = vpop.eup %2780  ;;  %v1797_v12 = vadd.f32 %v3493_v53, %v1796_v8 }
0x2981   :  { %1623 = vrot.lane.b32.xlu2 %v2781_v15, %s2996_s11  ;;  %v2783_v63 = vpop.eup %2782 }
0x2982   :  { %v2785_v14 = vpop.eup %2784 }
0x2983   :  { %v1604_v1 = vadd.f32 1.0, %v2785_v14 }
0x2985   :  { %2786 = vrcp.f32 %v1604_v1  ;;  %v1616_v48 = vand.u32 2147483648, %v1604_v1  ;;  %vm1610_vm7 = vweird.f32 %v1604_v1  ;;  %v1614_v54 = vand.u32 2147483647, %v1604_v1 }
0x2987   :  { %v1617_v19 = vor.u32 1.1754944e-38, %v1616_v48  ;;  %vm1615_vm9 = vcmp.eq.f32.partialorder %v1614_v54, 8.507059e+37 }
0x2989   :  { %640 = vrot.lane.b32.xlu2 %v2783_v63, %s2996_s11 }
0x298b   :  { %v2787_v55 = vpop.eup %2786 }
0x298c   :  { %v1606_v16 = vmul.f32 %v2787_v55, %v1604_v1  ;;  %vm1611_vm6 = vweird.f32 %v2787_v55 }
0x298d   :  { %vm1612_vm8 = vmor %vm1610_vm7, %vm1611_vm6 }
0x298e   :  { %v1607_v17 = vsub.f32 1.0, %v1606_v16 }
0x2990   :  { %v1608_v10 = vmul.f32 %v2787_v55, %v1607_v17 }
0x2992   :  { %v1609_v18 = vadd.f32 %v2787_v55, %v1608_v10 }
0x2994   :  { %v1613_v56 = vsel %vm1612_vm8, %v2787_v55, %v1609_v18 }
0x2995   :  { %v1618_v20 = vsel %vm1615_vm9, %v1617_v19, %v1613_v56 }
0x2996   :  { %v1621_v22 = vmul.f32 %v1618_v20, %v3421_v36 }
0x29db   :  { %v1624_v57 = vpop.permute.xlu2 %1623 }
0x29dc   :  { %v1626_v61 = vmul.f32 %v1624_v57, %v1618_v20 }
0x29de   :  { %1628 = vrot.lane.b32.xlu1 %v1626_v61, %s2997_s12 }
0x29e3   :  { %v641_v6 = vpop.permute.xlu2 %640 }
0x29e4   :  { %v643_v21 = vmul.f32 %v641_v6, %v624_v45 }
0x29e6   :  { %655 = vrot.lane.b32.xlu1 %v643_v21, %s2997_s12 }
0x2a50   :  { %v1629_v23 = vpop.permute.xlu1 %1628 }
0x2a51   :  { %v3445_v24 = vadd.f32 %v1629_v23, %v1621_v22 }
0x2a53   :  { %2788 = vtanh.f32 %v3445_v24 }
0x2a58   :  { %v656_v25 = vpop.permute.xlu1 %655 }
0x2a59   :  { %v2789_v26 = vpop.eup %2788  ;;  %2525 = vmatmul.msk.f32.gmra.mxu3 %vm72_vm0, %v656_v25 }
0x2a5a   :  { %1634 = vrot.lane.b32.xlu0 %v2789_v26, %s2996_s11 }
0x2a61   :  { %2548 = vmatmul.msk.f32.vlgmr.msra.gmra.mxu3 %vm72_vm0, %v3329_v4  ;;  %v3464_v4 = vld [vmem:[#allocation5 + $0x68] sm:$0xff] }
0x2a62   :  { %1900 = vmatpush.msra.mxu3 %v3458_v39  ;;  %1839 = vmatpush.msra.mxu2 %v3464_v4 }
0x2a64   :  { %1901 = vmatpush.msra.mxu3 %v3460_v60  ;;  %1840 = vmatpush.msra.mxu2 %v3468_v40 }
0x2a66   :  { %1902 = vmatpush.msra.mxu3 %v3464_v4 }
0x2a68   :  { %1903 = vmatpush.msra.mxu3 %v3468_v40 }
0x2acc   :  { %v1635_v28 = vpop.permute.xlu0 %1634 }
0x2acd   :  { %v1637_v29 = vmul.f32 %v1635_v28, %v1618_v20 }
0x2acf   :  { %1639 = vrot.lane.b32.xlu2 %v1637_v29, %s2997_s12 }
0x2adc   :  { %v697_v30 = vpop.f32.mrf.mxu3 }
0x2add   :  { %v698_v33 = vadd.f32 %v2911_v32, %v697_v30 }
0x2adf   :  { %v1166_v36 = vadd.f32 %v3353_v27, %v698_v33 }
0x2ae1   :  { %2790 = vtanh.f32 %v1166_v36  ;;  %v2540_v41 = vmul.f32 -1.442695, %v1166_v36 }
0x2ae3   :  { %2792 = vpow2.f32 %v2540_v41 }
0x2ae4   :  { %v1254_v47 = vpop.f32.mrf.mxu3 }
0x2ae5   :  { %v1255_v49 = vadd.f32 %v3364_v7, %v1254_v47  ;;  %v2325_v47 = vld [vmem:[%s3669_s4 + $0x8] sm:$0xff] }
0x2ae7   :  { %v2791_v2 = vpop.eup %2790 }
0x2ae8   :  { %1189 = vrot.lane.b32.xlu0 %v2791_v2, %s2996_s11 }
0x2ae9   :  { %v2793_v59 = vpop.eup %2792 }
0x2aea   :  { %v1170_v42 = vadd.f32 1.0, %v2793_v59 }
0x2aec   :  { %2794 = vrcp.f32 %v1170_v42  ;;  %v1182_v5 = vand.u32 2147483648, %v1170_v42  ;;  %vm1176_vm11 = vweird.f32 %v1170_v42 }
0x2aee   :  { %v1183_v34 = vor.u32 1.1754944e-38, %v1182_v5 }
0x2af2   :  { %v2795_v31 = vpop.eup %2794 }
0x2af3   :  { %v1172_v38 = vmul.f32 %v2795_v31, %v1170_v42  ;;  %vm1177_vm10 = vweird.f32 %v2795_v31 }
0x2af4   :  { %vm1178_vm12 = vmor %vm1176_vm11, %vm1177_vm10 }
0x2af5   :  { %v1173_v43 = vsub.f32 1.0, %v1172_v38 }
0x2af7   :  { %v1174_v58 = vmul.f32 %v2795_v31, %v1173_v43 }
0x2af9   :  { %v1175_v11 = vadd.f32 %v2795_v31, %v1174_v58 }
0x2afb   :  { %v1179_v44 = vsel %vm1178_vm12, %v2795_v31, %v1175_v11 }
0x2b29   :  { %v1640_v27 = vpop.permute.xlu2 %1639 }
0x2b2a   :  { %2561 = vmatmul.msk.f32.vlgmr.msrb.gmra.mxu2 %vm72_vm0, %v1640_v27  ;;  %2571 = vmatmul.msk.f32.gmra.mxu0 %vm72_vm0, %v1640_v27 }
0x2b2b   :  { %1963 = vmatpush.msrb.mxu2 %v3458_v39 }
0x2b2d   :  { %1964 = vmatpush.msrb.mxu2 %v3460_v60 }
0x2b2f   :  { %1965 = vmatpush.msrb.mxu2 %v3464_v4 }
0x2b31   :  { %1966 = vmatpush.msrb.mxu2 %v3468_v40 }
0x2b32   :  { %1841 = vmatmul.f32.vlgmr.msra.gmra.mxu2 %v2995_v9  ;;  %v1180_v9 = vand.u32 2147483647, %v1170_v42 }
0x2b33   :  { %2089 = vmatpush.msra.mxu2 %v3458_v39 }
0x2b34   :  { %vm1181_vm13 = vcmp.eq.f32.partialorder %v1180_v9, 8.507059e+37 }
0x2b35   :  { %2090 = vmatpush.msra.mxu2 %v3460_v60  ;;  %v3485_v3 = vsel %vm1181_vm13, %v1183_v34, %v1179_v44 }
0x2b36   :  { %v1187_v7 = vmul.f32 %v3485_v3, %v3305_v50 }
0x2b37   :  { %2091 = vmatpush.msra.mxu2 %v3464_v4 }
0x2b39   :  { %2092 = vmatpush.msra.mxu2 %v3468_v40 }
0x2b5a   :  { %v1190_v45 = vpop.permute.xlu0 %1189 }
0x2b5b   :  { %v1192_v46 = vmul.f32 %v1190_v45, %v3485_v3 }
0x2b5d   :  { %1194 = vrot.lane.b32.xlu0 %v1192_v46, %s2997_s12  ;;  %v2327_v46 = vld [vmem:[%s3669_s4 + $0x18] sm:$0xff] }
0x2b5e   :  { %2349 = vmatpush.msra.mxu1 %v2327_v46 }
0x2bad   :  { %v1660_v51 = vpop.f32.mrf.mxu2 }
0x2bae   :  { %v1663_v52 = vadd.f32 %v1660_v51, %v1255_v49  ;;  %v2324_v49 = vld [vmem:[%s3669_s4] sm:$0xff] }
0x2bb0   :  { %2796 = vtanh.f32 %v1663_v52  ;;  %v2562_v16 = vmul.f32 -1.442695, %v1663_v52 }
0x2bb5   :  { %v1842_v13 = vpop.f32.mrf.mxu2 }
0x2bb6   :  { %v2797_v62 = vpop.eup %2796  ;;  %v1845_v35 = vadd.f32 %v1842_v13, %v1797_v12 }
0x2bb7   :  { %1686 = vrot.lane.b32.xlu1 %v2797_v62, %s2996_s11 }
0x2bb8   :  { %2798 = vtanh.f32 %v1845_v35  ;;  %v2574_v14 = vmul.f32 -1.442695, %v1845_v35  ;;  %v1799_v35 = vpop.f32.mrf.mxu0 }
0x2bbe   :  { %v2799_v0 = vpop.eup %2798 }
0x2bbf   :  { %1868 = vrot.lane.b32.xlu2 %v2799_v0, %s2996_s11  ;;  %v1800_v0 = vadd.f32 %v3493_v53, %v1799_v35 }
0x2bcf   :  { %v1195_v15 = vpop.permute.xlu0 %1194 }
0x2bd0   :  { %v1197_v63 = vadd.f32 %v1195_v15, %v1187_v7 }
0x2bd2   :  { %2800 = vtanh.f32 %v1197_v63 }
0x2bd3   :  { %2802 = vpow2.f32 %v2574_v14 }
0x2bd8   :  { %v2801_v37 = vpop.eup %2800 }
0x2bd9   :  { %1200 = vrot.lane.b32.xlu0 %v2801_v37, %s2996_s11  ;;  %v2803_v1 = vpop.eup %2802 }
0x2bda   :  { %v1849_v55 = vadd.f32 1.0, %v2803_v1 }
0x2bdc   :  { %2804 = vrcp.f32 %v1849_v55  ;;  %v1861_v57 = vand.u32 2147483648, %v1849_v55  ;;  %vm1855_vm15 = vweird.f32 %v1849_v55  ;;  %v1859_v20 = vand.u32 2147483647, %v1849_v55 }
0x2bdd   :  { %2806 = vpow2.f32 %v2562_v16 }
0x2bde   :  { %v1862_v21 = vor.u32 1.1754944e-38, %v1861_v57  ;;  %vm1860_vm2 = vcmp.eq.f32.partialorder %v1859_v20, 8.507059e+37 }
0x2be2   :  { %v2805_v17 = vpop.eup %2804 }
0x2be3   :  { %v2807_v10 = vpop.eup %2806  ;;  %v1851_v18 = vmul.f32 %v2805_v17, %v1849_v55  ;;  %vm1856_vm14 = vweird.f32 %v2805_v17 }
0x2be4   :  { %v1667_v48 = vadd.f32 1.0, %v2807_v10  ;;  %vm1857_vm1 = vmor %vm1855_vm15, %vm1856_vm14 }
0x2be5   :  { %v1852_v54 = vsub.f32 1.0, %v1851_v18 }
0x2be6   :  { %2808 = vrcp.f32 %v1667_v48  ;;  %v1679_v30 = vand.u32 2147483648, %v1667_v48  ;;  %vm1673_vm4 = vweird.f32 %v1667_v48  ;;  %v1677_v32 = vand.u32 2147483647, %v1667_v48 }
0x2be7   :  { %v1853_v50 = vmul.f32 %v2805_v17, %v1852_v54 }
0x2be8   :  { %v1680_v36 = vor.u32 1.1754944e-38, %v1679_v30  ;;  %vm1678_vm6 = vcmp.eq.f32.partialorder %v1677_v32, 8.507059e+37 }
0x2be9   :  { %v1854_v56 = vadd.f32 %v2805_v17, %v1853_v50 }
0x2beb   :  { %v1858_v61 = vsel %vm1857_vm1, %v2805_v17, %v1854_v56 }
0x2bec   :  { %v2809_v19 = vpop.eup %2808  ;;  %v1863_v23 = vsel %vm1860_vm2, %v1862_v21, %v1858_v61 }
0x2bed   :  { %v1669_v6 = vmul.f32 %v2809_v19, %v1667_v48  ;;  %vm1674_vm3 = vweird.f32 %v2809_v19  ;;  %v1866_v31 = vmul.f32 0.0, %v1863_v23 }
0x2bee   :  { %vm1675_vm5 = vmor %vm1673_vm4, %vm1674_vm3 }
0x2bef   :  { %v1670_v26 = vsub.f32 1.0, %v1669_v6 }
0x2bf1   :  { %v1671_v28 = vmul.f32 %v2809_v19, %v1670_v26 }
0x2bf3   :  { %v1672_v29 = vadd.f32 %v2809_v19, %v1671_v28  ;;  %v1802_v28 = vpop.f32.mrf.mxu0 }
0x2bf5   :  { %v1676_v33 = vsel %vm1675_vm5, %v2809_v19, %v1672_v29  ;;  %v1803_v29 = vadd.f32 %v3493_v53, %v1802_v28 }
0x2bf6   :  { %v1681_v27 = vsel %vm1678_vm6, %v1680_v36, %v1676_v33 }
0x2bf7   :  { %v1684_v11 = vmul.f32 %v1681_v27, %v3445_v24  ;;  %v2326_v24 = vld [vmem:[%s3669_s4 + $0x10] sm:$0xff] }
0x2bf8   :  { %2350 = vmatpush.msra.mxu1 %v2326_v24 }
0x2bfa   :  { %2351 = vmatpush.msra.mxu1 %v2325_v47 }
0x2bfc   :  { %2352 = vmatpush.msra.mxu1 %v2324_v49 }
0x2c19   :  { %v1869_v22 = vpop.permute.xlu2 %1868 }
0x2c1a   :  { %v1871_v25 = vmul.f32 %v1869_v22, %v1863_v23 }
0x2c1c   :  { %1873 = vrot.lane.b32.xlu2 %v1871_v25, %s2997_s12 }
0x2c29   :  { %v1687_v2 = vpop.permute.xlu1 %1686 }
0x2c2a   :  { %v1689_v41 = vmul.f32 %v1687_v2, %v1681_v27 }
0x2c2c   :  { %1691 = vrot.lane.b32.xlu1 %v1689_v41, %s2997_s12 }
0x2c4b   :  { %v1201_v59 = vpop.permute.xlu0 %1200 }
0x2c4c   :  { %v1203_v42 = vmul.f32 %v1201_v59, %v3485_v3 }
0x2c4e   :  { %1215 = vrot.lane.b32.xlu0 %v1203_v42, %s2997_s12 }
0x2c76   :  { %v1874_v38 = vpop.permute.xlu2 %1873 }
0x2c77   :  { %v3505_v43 = vadd.f32 %v1874_v38, %v1866_v31 }
0x2c79   :  { %2810 = vtanh.f32 %v3505_v43 }
0x2c7f   :  { %v2811_v58 = vpop.eup %2810 }
0x2c80   :  { %1879 = vrot.lane.b32.xlu2 %v2811_v58, %s2996_s11 }
0x2c9e   :  { %v1692_v5 = vpop.permute.xlu1 %1691 }
0x2c9f   :  { %v3510_v9 = vadd.f32 %v1692_v5, %v1684_v11 }
0x2ca1   :  { %2812 = vtanh.f32 %v3510_v9 }
0x2ca7   :  { %v2813_v44 = vpop.eup %2812 }
0x2ca8   :  { %1697 = vrot.lane.b32.xlu1 %v2813_v44, %s2996_s11 }
0x2cc0   :  { %v1216_v34 = vpop.permute.xlu0 %1215 }
0x2cc1   :  { %2549 = vmatmul.msk.f32.gmra.mxu3 %vm72_vm0, %v1216_v34 }
0x2cda   :  { %v1880_v3 = vpop.permute.xlu2 %1879 }
0x2cdb   :  { %v1882_v45 = vmul.f32 %v1880_v3, %v1863_v23 }
0x2cdd   :  { %1884 = vrot.lane.b32.xlu2 %v1882_v45, %s2997_s12 }
0x2d1a   :  { %v1698_v51 = vpop.permute.xlu1 %1697 }
0x2d1b   :  { %v1700_v52 = vmul.f32 %v1698_v51, %v1681_v27 }
0x2d1d   :  { %1702 = vrot.lane.b32.xlu1 %v1700_v52, %s2997_s12 }
0x2d37   :  { %v1885_v8 = vpop.permute.xlu2 %1884 }
0x2d38   :  { %2589 = vmatmul.msk.f32.vlgmr.msra.gmra.mxu1 %vm72_vm0, %v1885_v8 }
0x2d44   :  { %v3541_v13 = vpop.f32.mrf.mxu3 }
0x2d8f   :  { %v1703_v12 = vpop.permute.xlu1 %1702 }
0x2d90   :  { %2563 = vmatmul.msk.f32.vlgmr.msrb.gmra.mxu3 %vm72_vm0, %v1703_v12  ;;  %2572 = vmatmul.msk.f32.gmra.mxu0 %vm72_vm0, %v1703_v12 }
0x2d91   :  { %2026 = vmatpush.msrb.mxu3 %v3458_v39 }
0x2d93   :  { %2027 = vmatpush.msrb.mxu3 %v3460_v60 }
0x2d95   :  { %2028 = vmatpush.msrb.mxu3 %v3464_v4 }
0x2d97   :  { %2029 = vmatpush.msrb.mxu3 %v3468_v40 }
0x2d98   :  { %2575 = vmatmul.msk.f32.vlgmr.msra.gmra.mxu3 %vm72_vm0, %v1885_v8  ;;  %v1805_v8 = vpop.f32.mrf.mxu0 }
0x2d99   :  { %2152 = vmatpush.msra.mxu3 %v3458_v39  ;;  %v1806_v12 = vadd.f32 %v3493_v53, %v1805_v8 }
0x2d9b   :  { %2153 = vmatpush.msra.mxu3 %v3460_v60 }
0x2d9d   :  { %2154 = vmatpush.msra.mxu3 %v3464_v4 }
0x2d9f   :  { %2155 = vmatpush.msra.mxu3 %v3468_v40 }
0x2e13   :  { %v3543_v62 = vpop.f32.mrf.mxu3 }
0x2e1b   :  { %v1905_v7 = vpop.f32.mrf.mxu3 }
0x2e1c   :  { %v1908_v15 = vadd.f32 %v1905_v7, %v1800_v0 }
0x2e1e   :  { %2814 = vtanh.f32 %v1908_v15  ;;  %v2576_v37 = vmul.f32 -1.442695, %v1908_v15 }
0x2e20   :  { %2816 = vpow2.f32 %v2576_v37 }
0x2e24   :  { %v2815_v63 = vpop.eup %2814 }
0x2e25   :  { %1931 = vrot.lane.b32.xlu0 %v2815_v63, %s2996_s11 }
0x2e26   :  { %v2817_v14 = vpop.eup %2816 }
0x2e27   :  { %v1912_v1 = vadd.f32 1.0, %v2817_v14 }
0x2e29   :  { %2818 = vrcp.f32 %v1912_v1  ;;  %v1924_v48 = vand.u32 2147483648, %v1912_v1  ;;  %vm1918_vm8 = vweird.f32 %v1912_v1  ;;  %v1922_v54 = vand.u32 2147483647, %v1912_v1 }
0x2e2b   :  { %v1925_v56 = vor.u32 1.1754944e-38, %v1924_v48  ;;  %vm1923_vm10 = vcmp.eq.f32.partialorder %v1922_v54, 8.507059e+37 }
0x2e2f   :  { %v2819_v55 = vpop.eup %2818 }
0x2e30   :  { %v1914_v16 = vmul.f32 %v2819_v55, %v1912_v1  ;;  %vm1919_vm7 = vweird.f32 %v2819_v55 }
0x2e31   :  { %vm1920_vm9 = vmor %vm1918_vm8, %vm1919_vm7 }
0x2e32   :  { %v1915_v17 = vsub.f32 1.0, %v1914_v16 }
0x2e34   :  { %v1916_v10 = vmul.f32 %v2819_v55, %v1915_v17 }
0x2e36   :  { %v1917_v18 = vadd.f32 %v2819_v55, %v1916_v10 }
0x2e38   :  { %v1921_v50 = vsel %vm1920_vm9, %v2819_v55, %v1917_v18 }
0x2e39   :  { %v1926_v57 = vsel %vm1923_vm10, %v1925_v56, %v1921_v50 }
0x2e3a   :  { %v1929_v61 = vmul.f32 %v1926_v57, %v3505_v43 }
0x2e97   :  { %v1932_v19 = vpop.permute.xlu0 %1931 }
0x2e98   :  { %v1934_v20 = vmul.f32 %v1932_v19, %v1926_v57 }
0x2e9a   :  { %1936 = vrot.lane.b32.xlu1 %v1934_v20, %s2997_s12 }
0x2f0c   :  { %v1937_v6 = vpop.permute.xlu1 %1936 }
0x2f0d   :  { %v1939_v21 = vadd.f32 %v1937_v6, %v1929_v61  ;;  %v1808_v6 = vpop.f32.mrf.mxu0 }
0x2f0f   :  { %2820 = vtanh.f32 %v1939_v21 }
0x2f15   :  { %v2821_v22 = vpop.eup %2820 }
0x2f16   :  { %1942 = vrot.lane.b32.xlu2 %v2821_v22, %s2996_s11 }
0x2f70   :  { %v1943_v23 = vpop.permute.xlu2 %1942 }
0x2f71   :  { %v1945_v25 = vmul.f32 %v1943_v23, %v1926_v57 }
0x2f73   :  { %1947 = vrot.lane.b32.xlu0 %v1945_v25, %s2997_s12 }
0x2fe5   :  { %v1948_v26 = vpop.permute.xlu0 %1947 }
0x2fe6   :  { %2577 = vmatmul.msk.f32.vlgmr.msrb.gmra.mxu2 %vm72_vm0, %v1948_v26  ;;  %2590 = vmatmul.msk.f32.gmra.mxu1 %vm72_vm0, %v1948_v26 }
0x2fe7   :  { %2215 = vmatpush.msrb.mxu2 %v3458_v39 }
0x2fe9   :  { %2216 = vmatpush.msrb.mxu2 %v3460_v60 }
0x2feb   :  { %2217 = vmatpush.msrb.mxu2 %v3464_v4 }
0x2fed   :  { %2218 = vmatpush.msrb.mxu2 %v3468_v40 }
0x3069   :  { %v1968_v30 = vpop.f32.mrf.mxu2 }
0x306a   :  { %v1971_v32 = vadd.f32 %v1968_v30, %v1803_v29 }
0x306c   :  { %2822 = vtanh.f32 %v1971_v32  ;;  %v2578_v36 = vmul.f32 -1.442695, %v1971_v32 }
0x306e   :  { %2824 = vpow2.f32 %v2578_v36 }
0x3072   :  { %v2823_v33 = vpop.eup %2822 }
0x3073   :  { %1994 = vrot.lane.b32.xlu1 %v2823_v33, %s2996_s11 }
0x3074   :  { %v2825_v2 = vpop.eup %2824 }
0x3075   :  { %v1975_v27 = vadd.f32 1.0, %v2825_v2 }
0x3077   :  { %2826 = vrcp.f32 %v1975_v27  ;;  %v1987_v43 = vand.u32 2147483648, %v1975_v27  ;;  %vm1981_vm12 = vweird.f32 %v1975_v27  ;;  %v1985_v58 = vand.u32 2147483647, %v1975_v27 }
0x3079   :  { %v1988_v5 = vor.u32 1.1754944e-38, %v1987_v43  ;;  %vm1986_vm14 = vcmp.eq.f32.partialorder %v1985_v58, 8.507059e+37 }
0x307d   :  { %v2827_v41 = vpop.eup %2826 }
0x307e   :  { %v1977_v59 = vmul.f32 %v2827_v41, %v1975_v27  ;;  %vm1982_vm11 = vweird.f32 %v2827_v41 }
0x307f   :  { %vm1983_vm13 = vmor %vm1981_vm12, %vm1982_vm11 }
0x3080   :  { %v1978_v42 = vsub.f32 1.0, %v1977_v59 }
0x3082   :  { %v1979_v31 = vmul.f32 %v2827_v41, %v1978_v42 }
0x3084   :  { %v1980_v38 = vadd.f32 %v2827_v41, %v1979_v31 }
0x3086   :  { %v1984_v11 = vsel %vm1983_vm13, %v2827_v41, %v1980_v38 }
0x3087   :  { %v1989_v34 = vsel %vm1986_vm14, %v1988_v5, %v1984_v11 }
0x3088   :  { %v1992_v45 = vmul.f32 %v1989_v34, %v1939_v21  ;;  %v1809_v21 = vadd.f32 %v3493_v53, %v1808_v6 }
0x30e5   :  { %v1995_v44 = vpop.permute.xlu1 %1994 }
0x30e6   :  { %v1997_v3 = vmul.f32 %v1995_v44, %v1989_v34 }
0x30e8   :  { %1999 = vrot.lane.b32.xlu2 %v1997_v3, %s2997_s12 }
0x3142   :  { %v2000_v46 = vpop.permute.xlu2 %1999 }
0x3143   :  { %v2002_v24 = vadd.f32 %v2000_v46, %v1992_v45  ;;  %v1811_v46 = vpop.f32.mrf.mxu0 }
0x3145   :  { %2828 = vtanh.f32 %v2002_v24 }
0x314b   :  { %v2829_v47 = vpop.eup %2828  ;;  %v1814_v6 = vpop.f32.mrf.mxu0 }
0x314c   :  { %2005 = vrot.lane.b32.xlu0 %v2829_v47, %s2996_s11 }
0x31be   :  { %v2006_v49 = vpop.permute.xlu0 %2005 }
0x31bf   :  { %v2008_v51 = vmul.f32 %v2006_v49, %v1989_v34 }
0x31c1   :  { %2010 = vrot.lane.b32.xlu1 %v2008_v51, %s2997_s12 }
0x3233   :  { %v2011_v52 = vpop.permute.xlu1 %2010 }
0x3234   :  { %2579 = vmatmul.msk.f32.vlgmr.msrb.gmra.mxu3 %vm72_vm0, %v2011_v52  ;;  %2591 = vmatmul.msk.f32.gmra.mxu1 %vm72_vm0, %v2011_v52 }
0x3235   :  { %2278 = vmatpush.msrb.mxu3 %v3458_v39 }
0x3237   :  { %2279 = vmatpush.msrb.mxu3 %v3460_v60 }
0x3239   :  { %2280 = vmatpush.msrb.mxu3 %v3464_v4 }
0x323b   :  { %2281 = vmatpush.msrb.mxu3 %v3468_v40 }
0x32b7   :  { %v2031_v35 = vpop.f32.mrf.mxu3 }
0x32b8   :  { %v2034_v0 = vadd.f32 %v2031_v35, %v1806_v12 }
0x32ba   :  { %2830 = vtanh.f32 %v2034_v0  ;;  %v2580_v15 = vmul.f32 -1.442695, %v2034_v0 }
0x32bc   :  { %2832 = vpow2.f32 %v2580_v15 }
0x32c0   :  { %v2831_v7 = vpop.eup %2830 }
0x32c1   :  { %2057 = vrot.lane.b32.xlu2 %v2831_v7, %s2996_s11 }
0x32c2   :  { %v2833_v63 = vpop.eup %2832 }
0x32c3   :  { %v2038_v37 = vadd.f32 1.0, %v2833_v63 }
0x32c5   :  { %2834 = vrcp.f32 %v2038_v37  ;;  %v2050_v40 = vand.u32 2147483648, %v2038_v37  ;;  %vm2044_vm1 = vweird.f32 %v2038_v37  ;;  %v2048_v55 = vand.u32 2147483647, %v2038_v37 }
0x32c7   :  { %v2051_v17 = vor.u32 1.1754944e-38, %v2050_v40  ;;  %vm2049_vm3 = vcmp.eq.f32.partialorder %v2048_v55, 8.507059e+37 }
0x32cb   :  { %v2835_v39 = vpop.eup %2834 }
0x32cc   :  { %v2040_v60 = vmul.f32 %v2835_v39, %v2038_v37  ;;  %vm2045_vm15 = vweird.f32 %v2835_v39 }
0x32cd   :  { %vm2046_vm2 = vmor %vm2044_vm1, %vm2045_vm15 }
0x32ce   :  { %v2041_v14 = vsub.f32 1.0, %v2040_v60 }
0x32d0   :  { %v2042_v4 = vmul.f32 %v2835_v39, %v2041_v14 }
0x32d2   :  { %v2043_v1 = vadd.f32 %v2835_v39, %v2042_v4 }
0x32d4   :  { %v2047_v16 = vsel %vm2046_vm2, %v2835_v39, %v2043_v1 }
0x32d5   :  { %v2052_v18 = vsel %vm2049_vm3, %v2051_v17, %v2047_v16 }
0x32d6   :  { %v2055_v54 = vmul.f32 %v2052_v18, %v2002_v24  ;;  %v1812_v24 = vadd.f32 %v3493_v53, %v1811_v46 }
0x331b   :  { %v2058_v10 = vpop.permute.xlu2 %2057 }
0x331c   :  { %v2060_v48 = vmul.f32 %v2058_v10, %v2052_v18  ;;  %v2912_v10 = vld [vmem:[%s3668_s3 + $0x2] ss:$0 sm:$0xff] }
0x331e   :  { %2062 = vrot.lane.b32.xlu0 %v2060_v48, %s2997_s12 }
0x3390   :  { %v2063_v50 = vpop.permute.xlu0 %2062 }
0x3391   :  { %v2065_v56 = vadd.f32 %v2063_v50, %v2055_v54 }
0x3393   :  { %2836 = vtanh.f32 %v2065_v56 }
0x3399   :  { %v2837_v19 = vpop.eup %2836 }
0x339a   :  { %2068 = vrot.lane.b32.xlu1 %v2837_v19, %s2996_s11 }
0x340c   :  { %v2069_v57 = vpop.permute.xlu1 %2068 }
0x340d   :  { %v2071_v20 = vmul.f32 %v2069_v57, %v2052_v18  ;;  %v1258_v18 = vadd.f32 %v2912_v10, %v3541_v13 }
0x340f   :  { %2073 = vrot.lane.b32.xlu2 %v2071_v20, %s2997_s12  ;;  %v1726_v48 = vadd.f32 %v3543_v62, %v1258_v18 }
0x3411   :  { %v2564_v20 = vmul.f32 -1.442695, %v1726_v48 }
0x3469   :  { %v2074_v61 = vpop.permute.xlu2 %2073 }
0x346a   :  { %2581 = vmatmul.msk.f32.vlgmr.msra.gmra.mxu2 %vm72_vm0, %v2074_v61  ;;  %2592 = vmatmul.msk.f32.gmra.mxu1 %vm72_vm0, %v2074_v61 }
0x34ed   :  { %v2094_v22 = vpop.f32.mrf.mxu2 }
0x34ee   :  { %v2097_v23 = vadd.f32 %v2094_v22, %v1809_v21  ;;  %v1815_v22 = vadd.f32 %v3493_v53, %v1814_v6 }
0x34f0   :  { %2838 = vtanh.f32 %v2097_v23  ;;  %v2582_v26 = vmul.f32 -1.442695, %v2097_v23 }
0x34f2   :  { %2840 = vpow2.f32 %v2582_v26 }
0x34f6   :  { %v2839_v25 = vpop.eup %2838 }
0x34f7   :  { %2120 = vrot.lane.b32.xlu0 %v2839_v25, %s2996_s11 }
0x34f8   :  { %v2841_v28 = vpop.eup %2840 }
0x34f9   :  { %v2101_v29 = vadd.f32 1.0, %v2841_v28 }
0x34fb   :  { %2842 = vrcp.f32 %v2101_v29  ;;  %v2113_v27 = vand.u32 2147483648, %v2101_v29  ;;  %vm2107_vm5 = vweird.f32 %v2101_v29  ;;  %v2111_v41 = vand.u32 2147483647, %v2101_v29 }
0x34fd   :  { %v2114_v42 = vor.u32 1.1754944e-38, %v2113_v27  ;;  %vm2112_vm7 = vcmp.eq.f32.partialorder %v2111_v41, 8.507059e+37 }
0x3501   :  { %v2843_v30 = vpop.eup %2842 }
0x3502   :  { %v2103_v32 = vmul.f32 %v2843_v30, %v2101_v29  ;;  %vm2108_vm4 = vweird.f32 %v2843_v30 }
0x3503   :  { %vm2109_vm6 = vmor %vm2107_vm5, %vm2108_vm4 }
0x3504   :  { %v2104_v33 = vsub.f32 1.0, %v2103_v32 }
0x3506   :  { %v2105_v36 = vmul.f32 %v2843_v30, %v2104_v33 }
0x3508   :  { %v2106_v2 = vadd.f32 %v2843_v30, %v2105_v36 }
0x350a   :  { %v2110_v59 = vsel %vm2109_vm6, %v2843_v30, %v2106_v2 }
0x350b   :  { %v2115_v38 = vsel %vm2112_vm7, %v2114_v42, %v2110_v59 }
0x350c   :  { %v2118_v58 = vmul.f32 %v2115_v38, %v2065_v56 }
0x3569   :  { %v2121_v31 = vpop.permute.xlu0 %2120 }
0x356a   :  { %v2123_v43 = vmul.f32 %v2121_v31, %v2115_v38 }
0x356c   :  { %2125 = vrot.lane.b32.xlu1 %v2123_v43, %s2997_s12 }
0x35de   :  { %v2126_v11 = vpop.permute.xlu1 %2125 }
0x35df   :  { %v2128_v5 = vadd.f32 %v2126_v11, %v2118_v58 }
0x35e1   :  { %2844 = vtanh.f32 %v2128_v5 }
0x35e7   :  { %v2845_v44 = vpop.eup %2844 }
0x35e8   :  { %2131 = vrot.lane.b32.xlu2 %v2845_v44, %s2996_s11 }
0x3642   :  { %v2132_v34 = vpop.permute.xlu2 %2131 }
0x3643   :  { %v2134_v3 = vmul.f32 %v2132_v34, %v2115_v38 }
0x3645   :  { %2136 = vrot.lane.b32.xlu0 %v2134_v3, %s2997_s12 }
0x36b7   :  { %v2137_v45 = vpop.permute.xlu0 %2136 }
0x36b8   :  { %2583 = vmatmul.msk.f32.vlgmr.msra.gmra.mxu3 %vm72_vm0, %v2137_v45  ;;  %2593 = vmatmul.msk.f32.gmra.mxu1 %vm72_vm0, %v2137_v45 }
0x373b   :  { %v2157_v47 = vpop.f32.mrf.mxu3 }
0x373c   :  { %v2160_v49 = vadd.f32 %v2157_v47, %v1812_v24 }
0x373e   :  { %2846 = vtanh.f32 %v2160_v49  ;;  %v2584_v52 = vmul.f32 -1.442695, %v2160_v49 }
0x3740   :  { %2848 = vpow2.f32 %v2584_v52 }
0x3744   :  { %v2847_v51 = vpop.eup %2846 }
0x3745   :  { %2183 = vrot.lane.b32.xlu1 %v2847_v51, %s2996_s11 }
0x3746   :  { %v2849_v8 = vpop.eup %2848 }
0x3747   :  { %v2164_v12 = vadd.f32 1.0, %v2849_v8 }
0x3749   :  { %2850 = vrcp.f32 %v2164_v12  ;;  %v2176_v37 = vand.u32 2147483648, %v2164_v12  ;;  %vm2170_vm9 = vweird.f32 %v2164_v12  ;;  %v2174_v39 = vand.u32 2147483647, %v2164_v12 }
0x374b   :  { %v2177_v14 = vor.u32 1.1754944e-38, %v2176_v37  ;;  %vm2175_vm11 = vcmp.eq.f32.partialorder %v2174_v39, 8.507059e+37 }
0x374f   :  { %v2851_v35 = vpop.eup %2850 }
0x3750   :  { %v2166_v0 = vmul.f32 %v2851_v35, %v2164_v12  ;;  %vm2171_vm8 = vweird.f32 %v2851_v35 }
0x3751   :  { %vm2172_vm10 = vmor %vm2170_vm9, %vm2171_vm8 }
0x3752   :  { %v2167_v7 = vsub.f32 1.0, %v2166_v0 }
0x3754   :  { %v2168_v15 = vmul.f32 %v2851_v35, %v2167_v7 }
0x3756   :  { %v2169_v63 = vadd.f32 %v2851_v35, %v2168_v15 }
0x3758   :  { %v2173_v60 = vsel %vm2172_vm10, %v2851_v35, %v2169_v63 }
0x3759   :  { %v2178_v1 = vsel %vm2175_vm11, %v2177_v14, %v2173_v60 }
0x375a   :  { %v2181_v55 = vmul.f32 %v2178_v1, %v2128_v5 }
0x37b7   :  { %v2184_v4 = vpop.permute.xlu1 %2183 }
0x37b8   :  { %v2186_v40 = vmul.f32 %v2184_v4, %v2178_v1 }
0x37ba   :  { %2188 = vrot.lane.b32.xlu2 %v2186_v40, %s2997_s12 }
0x3814   :  { %v2189_v16 = vpop.permute.xlu2 %2188 }
0x3815   :  { %v3585_v17 = vadd.f32 %v2189_v16, %v2181_v55 }
0x3817   :  { %2852 = vtanh.f32 %v3585_v17 }
0x3818   :  { %2854 = vtanh.f32 %v1726_v48 }
0x3819   :  { %2856 = vpow2.f32 %v2564_v20 }
0x381d   :  { %v2853_v54 = vpop.eup %2852 }
0x381e   :  { %2194 = vrot.lane.b32.xlu0 %v2853_v54, %s2996_s11  ;;  %v2855_v50 = vpop.eup %2854 }
0x381f   :  { %v2857_v13 = vpop.eup %2856 }
0x3820   :  { %v1730_v62 = vadd.f32 1.0, %v2857_v13 }
0x3822   :  { %2858 = vrcp.f32 %v1730_v62  ;;  %v1742_v32 = vand.u32 2147483648, %v1730_v62  ;;  %vm1736_vm13 = vweird.f32 %v1730_v62  ;;  %v1740_v33 = vand.u32 2147483647, %v1730_v62 }
0x3824   :  { %v1743_v27 = vor.u32 1.1754944e-38, %v1742_v32  ;;  %vm1741_vm15 = vcmp.eq.f32.partialorder %v1740_v33, 8.507059e+37 }
0x3826   :  { %1749 = vrot.lane.b32.xlu0 %v2855_v50, %s2996_s11 }
0x3828   :  { %v2859_v61 = vpop.eup %2858 }
0x3829   :  { %v1732_v21 = vmul.f32 %v2859_v61, %v1730_v62  ;;  %vm1737_vm12 = vweird.f32 %v2859_v61 }
0x382a   :  { %vm1738_vm14 = vmor %vm1736_vm13, %vm1737_vm12 }
0x382b   :  { %v1733_v23 = vsub.f32 1.0, %v1732_v21  ;;  %v2354_v21 = vpop.f32.mrf.mxu1 }
0x382d   :  { %v1734_v28 = vmul.f32 %v2859_v61, %v1733_v23  ;;  %v3617_v23 = vld [vmem:[%s3670_s5] ss:$0 sm:$0xff]  ;;  %s2998_s5 = smov [#allocation7]  }
0x382f   :  { %v1735_v29 = vadd.f32 %v2859_v61, %v1734_v28 }
0x3831   :  { %v1739_v36 = vsel %vm1738_vm14, %v2859_v61, %v1735_v29 }
0x3832   :  { %v1744_v41 = vsel %vm1741_vm15, %v1743_v27, %v1739_v36 }
0x3833   :  { %v1747_v51 = vmul.f32 %v1744_v41, %v3510_v9 }
0x3890   :  { %v2195_v56 = vpop.permute.xlu0 %2194 }
0x3891   :  { %v2197_v19 = vmul.f32 %v2195_v56, %v2178_v1 }
0x3893   :  { %2199 = vrot.lane.b32.xlu1 %v2197_v19, %s2997_s12 }
0x3898   :  { %v1750_v2 = vpop.permute.xlu0 %1749 }
0x3899   :  { %v1752_v59 = vmul.f32 %v1750_v2, %v1744_v41 }
0x3905   :  { %v2200_v57 = vpop.permute.xlu1 %2199 }
0x3906   :  { %2585 = vmatmul.msk.f32.vlgmr.msrb.gmra.mxu2 %vm72_vm0, %v2200_v57  ;;  %2594 = vmatmul.msk.f32.gmra.mxu1 %vm72_vm0, %v2200_v57 }
0x3989   :  { %v2220_v25 = vpop.f32.mrf.mxu2 }
0x398a   :  { %v2223_v26 = vadd.f32 %v2220_v25, %v1815_v22  ;;  %v2357_v22 = vpop.f32.mrf.mxu1 }
0x398c   :  { %2860 = vtanh.f32 %v2223_v26  ;;  %v2586_v42 = vmul.f32 -1.442695, %v2223_v26  ;;  %v2355_v26 = vadd.f32 %v3617_v23, %v2354_v21 }
0x398e   :  { %2862 = vpow2.f32 %v2586_v42 }
0x3992   :  { %v2861_v30 = vpop.eup %2860  ;;  %v2360_v25 = vpop.f32.mrf.mxu1 }
0x3993   :  { %2246 = vrot.lane.b32.xlu2 %v2861_v30, %s2996_s11 }
0x3994   :  { %v2863_v31 = vpop.eup %2862 }
0x3995   :  { %v2227_v38 = vadd.f32 1.0, %v2863_v31 }
0x3997   :  { %2864 = vrcp.f32 %v2227_v38  ;;  %v2239_v34 = vand.u32 2147483648, %v2227_v38  ;;  %vm2233_vm2 = vweird.f32 %v2227_v38  ;;  %v2237_v3 = vand.u32 2147483647, %v2227_v38 }
0x3999   :  { %v2240_v46 = vor.u32 1.1754944e-38, %v2239_v34  ;;  %vm2238_vm4 = vcmp.eq.f32.partialorder %v2237_v3, 8.507059e+37 }
0x399a   :  { %v2363_v28 = vpop.f32.mrf.mxu1 }
0x399b   :  { %1754 = vrot.lane.b32.xlu2 %v1752_v59, %s2997_s12  ;;  %v2364_v29 = vadd.f32 %v3617_v23, %v2363_v28 }
0x399d   :  { %v2865_v43 = vpop.eup %2864 }
0x399e   :  { %v2229_v58 = vmul.f32 %v2865_v43, %v2227_v38  ;;  %vm2234_vm1 = vweird.f32 %v2865_v43 }
0x399f   :  { %vm2235_vm3 = vmor %vm2233_vm2, %vm2234_vm1 }
0x39a0   :  { %v2230_v11 = vsub.f32 1.0, %v2229_v58 }
0x39a2   :  { %v2231_v5 = vmul.f32 %v2865_v43, %v2230_v11  ;;  %v2366_v30 = vpop.f32.mrf.mxu1 }
0x39a3   :  { %v3622_v32 = vadd.f32 %v3617_v23, %v2366_v30 }
0x39a4   :  { %v2232_v44 = vadd.f32 %v2865_v43, %v2231_v5 }
0x39a6   :  { %v2236_v45 = vsel %vm2235_vm3, %v2865_v43, %v2232_v44 }
0x39a7   :  { %v2241_v47 = vsel %vm2238_vm4, %v2240_v46, %v2236_v45  ;;  %v3636_v46 = vadd.f32 %v3617_v23, %v2360_v25 }
0x39a8   :  { %v2244_v35 = vmul.f32 %v2241_v47, %v3585_v17 }
0x39aa   :  { %v2369_v59 = vpop.f32.mrf.mxu1 }
0x39ab   :  { %v3631_v42 = vadd.f32 %v3617_v23, %v2369_v59 }
0x39ed   :  { %v2247_v24 = vpop.permute.xlu2 %2246 }
0x39ee   :  { %v2249_v49 = vmul.f32 %v2247_v24, %v2241_v47 }
0x39f0   :  { %2251 = vrot.lane.b32.xlu1 %v2249_v49, %s2997_s12 }
0x39f5   :  { %v1755_v52 = vpop.permute.xlu2 %1754 }
0x39f6   :  { %v1757_v8 = vadd.f32 %v1755_v52, %v1747_v51 }
0x39f8   :  { %2866 = vtanh.f32 %v1757_v8 }
0x39fe   :  { %v2867_v12 = vpop.eup %2866 }
0x39ff   :  { %1760 = vrot.lane.b32.xlu1 %v2867_v12, %s2996_s11 }
0x3a62   :  { %v2252_v0 = vpop.permute.xlu1 %2251 }
0x3a63   :  { %v2254_v7 = vadd.f32 %v2252_v0, %v2244_v35 }
0x3a65   :  { %2868 = vtanh.f32 %v2254_v7 }
0x3a6b   :  { %v2869_v15 = vpop.eup %2868 }
0x3a6c   :  { %2257 = vrot.lane.b32.xlu0 %v2869_v15, %s2996_s11 }
0x3a71   :  { %v1761_v63 = vpop.permute.xlu1 %1760 }
0x3a72   :  { %v1763_v37 = vmul.f32 %v1761_v63, %v1744_v41  ;;  %v3627_v41 = vadd.f32 %v3617_v23, %v2357_v22 }
0x3a74   :  { %1775 = vrot.lane.b32.xlu0 %v1763_v37, %s2997_s12 }
0x3ade   :  { %v2258_v39 = vpop.permute.xlu0 %2257 }
0x3adf   :  { %v2260_v9 = vmul.f32 %v2258_v39, %v2241_v47 }
0x3ae1   :  { %2262 = vrot.lane.b32.xlu2 %v2260_v9, %s2997_s12 }
0x3ae6   :  { %v1776_v60 = vpop.permute.xlu0 %1775 }
0x3ae7   :  { %2573 = vmatmul.msk.f32.gmra.mxu0 %vm72_vm0, %v1776_v60 }
0x3b3b   :  { %v2263_v14 = vpop.permute.xlu2 %2262 }
0x3b3c   :  { %2587 = vmatmul.msk.f32.vlgmr.msrb.gmra.mxu3 %vm72_vm0, %v2263_v14  ;;  %2595 = vmatmul.msk.f32.gmra.mxu1 %vm72_vm0, %v2263_v14 }
0x3b64   :  { %v1817_v4 = vpop.f32.mrf.mxu0 }
0x3b65   :  { %v1818_v1 = vadd.f32 %v3493_v53, %v1817_v4 }
0x3bb9   :  { %v2372_v49 = vpop.f32.mrf.mxu1 }
0x3bba   :  { %v3641_v52 = vadd.f32 %v3617_v23, %v2372_v49 }
0x3bbf   :  { %v2283_v40 = vpop.f32.mrf.mxu3 }
0x3bc0   :  { %v2286_v55 = vadd.f32 %v2283_v40, %v1818_v1 }
0x3bc2   :  { %2870 = vtanh.f32 %v2286_v55  ;;  %v2588_v17 = vmul.f32 -1.442695, %v2286_v55 }
0x3bc4   :  { %2872 = vpow2.f32 %v2588_v17 }
0x3bc8   :  { %v2871_v16 = vpop.eup %2870 }
0x3bc9   :  { %2309 = vrot.lane.b32.xlu1 %v2871_v16, %s2996_s11 }
0x3bca   :  { %v2873_v10 = vpop.eup %2872 }
0x3bcb   :  { %v2290_v18 = vadd.f32 1.0, %v2873_v10 }
0x3bcd   :  { %2874 = vrcp.f32 %v2290_v18  ;;  %v2302_v57 = vand.u32 2147483648, %v2290_v18  ;;  %vm2296_vm6 = vweird.f32 %v2290_v18  ;;  %v2300_v53 = vand.u32 2147483647, %v2290_v18 }
0x3bcf   :  { %v2303_v13 = vor.u32 1.1754944e-38, %v2302_v57  ;;  %vm2301_vm8 = vcmp.eq.f32.partialorder %v2300_v53, 8.507059e+37 }
0x3bd3   :  { %v2875_v48 = vpop.eup %2874 }
0x3bd4   :  { %v2292_v54 = vmul.f32 %v2875_v48, %v2290_v18  ;;  %vm2297_vm5 = vweird.f32 %v2875_v48 }
0x3bd5   :  { %vm2298_vm7 = vmor %vm2296_vm6, %vm2297_vm5 }
0x3bd6   :  { %v2293_v50 = vsub.f32 1.0, %v2292_v54 }
0x3bd8   :  { %v2294_v56 = vmul.f32 %v2875_v48, %v2293_v50 }
0x3bda   :  { %v2295_v19 = vadd.f32 %v2875_v48, %v2294_v56 }
0x3bdc   :  { %v2299_v20 = vsel %vm2298_vm7, %v2875_v48, %v2295_v19 }
0x3bdd   :  { %v2304_v61 = vsel %vm2301_vm8, %v2303_v13, %v2299_v20 }
0x3bde   :  { %v2307_v33 = vmul.f32 %v2304_v61, %v2254_v7 }
0x3c3b   :  { %v2310_v62 = vpop.permute.xlu1 %2309 }
0x3c3c   :  { %v2312_v6 = vmul.f32 %v2310_v62, %v2304_v61 }
0x3c3e   :  { %2314 = vrot.lane.b32.xlu2 %v2312_v6, %s2997_s12 }
0x3c67   :  { %2378 = vmax.xlane.f32.xlu2 %v2355_v26 }
0x3c6f   :  { %2384 = vmax.xlane.f32.xlu2 %v2364_v29 }
0x3c77   :  { %2386 = vmax.xlane.f32.xlu2 %v3622_v32 }
0x3c98   :  { %v2315_v36 = vpop.permute.xlu2 %2314 }
0x3c99   :  { %v2317_v2 = vadd.f32 %v2315_v36, %v2307_v33 }
0x3c9b   :  { %2876 = vtanh.f32 %v2317_v2 }
0x3ca1   :  { %v2877_v27 = vpop.eup %2876 }
0x3ca2   :  { %2320 = vrot.lane.b32.xlu0 %v2877_v27, %s2996_s11  ;;  %s2478_s11 = sshll.u32 %s2998_s5, 4  ;;  %s2479_s11 = int_to_ptr.vmem [resolvable:$true] %s2478_s11 }
0x3ccc   :  { %2380 = vmax.xlane.f32.xlu0 %v3627_v41 }
0x3cd4   :  { %2388 = vmax.xlane.f32.xlu0 %v3631_v42 }
0x3cda   :  { %v2379_v31 = vpop.xlane.xlu2 %2378 }
0x3cdb   :  { %v2394_v38 = vsub.f32 %v2355_v26, %v2379_v31 }
0x3cdd   :  { %v2402_v43 = vmul.f32 1.442695, %v2394_v38 }
0x3cdf   :  { %2878 = vpow2.f32 %v2402_v43 }
0x3ce2   :  { %v2385_v58 = vpop.xlane.xlu2 %2384 }
0x3ce3   :  { %v2397_v11 = vsub.f32 %v2364_v29, %v2385_v58 }
0x3ce5   :  { %v2879_v5 = vpop.eup %2878  ;;  %v2408_v44 = vmul.f32 1.442695, %v2397_v11 }
0x3ce6   :  { %2418 = vadd.xlane.f32.xlu0 %v2879_v5 }
0x3ce7   :  { %2880 = vpow2.f32 %v2408_v44 }
0x3cea   :  { %v2387_v8 = vpop.xlane.xlu2 %2386 }
0x3ceb   :  { %v2398_v12 = vsub.f32 %v3622_v32, %v2387_v8 }
0x3ced   :  { %v2881_v34 = vpop.eup %2880  ;;  %v2410_v35 = vmul.f32 1.442695, %v2398_v12 }
0x3cee   :  { %2424 = vadd.xlane.f32.xlu0 %v2881_v34 }
0x3d14   :  { %v2321_v3 = vpop.permute.xlu0 %2320 }
0x3d15   :  { %v2323_v45 = vmul.f32 %v2321_v3, %v2304_v61 }
0x3d17   :  { %2333 = vrot.lane.b32.xlu1 %v2323_v45, %s2997_s12 }
0x3d3f   :  { %v2381_v24 = vpop.xlane.xlu0 %2380 }
0x3d40   :  { %v2395_v47 = vsub.f32 %v3627_v41, %v2381_v24 }
0x3d41   :  { %2382 = vmax.xlane.f32.xlu1 %v3636_v46 }
0x3d42   :  { %v2404_v51 = vmul.f32 1.442695, %v2395_v47 }
0x3d44   :  { %2882 = vpow2.f32 %v2404_v51 }
0x3d45   :  { %2884 = vpow2.f32 %v2410_v35 }
0x3d47   :  { %v3645_v7 = vpop.xlane.xlu0 %2388 }
0x3d48   :  { %v2399_v28 = vsub.f32 %v3631_v42, %v3645_v7 }
0x3d49   :  { %2390 = vmax.xlane.f32.xlu1 %v3641_v52 }
0x3d4a   :  { %v2883_v0 = vpop.eup %2882 }
0x3d4b   :  { %v2885_v15 = vpop.eup %2884 }
0x3d51   :  { %2420 = vadd.xlane.f32.xlu1 %v2883_v0 }
0x3d59   :  { %2426 = vadd.xlane.f32.xlu1 %v2885_v15  ;;  %v2419_v63 = vpop.xlane.xlu0 %2418 }
0x3d5a   :  { %2886 = vlog2.f32 %v2419_v63 }
0x3d60   :  { %v2887_v37 = vpop.eup %2886 }
0x3d61   :  { %v2435_v39 = vmul.f32 0.6931472, %v2887_v37  ;;  %v2425_v9 = vpop.xlane.xlu0 %2424 }
0x3d62   :  { %2888 = vlog2.f32 %v2425_v9 }
0x3d63   :  { %v2450_v60 = vadd.f32 %v2435_v39, %v2379_v31 }
0x3d65   :  { %v2458_v14 = vsub.f32 %v2355_v26, %v2450_v60 }
0x3d67   :  { %2466 = vst [vmem:[#allocation7] sm:$0xff] %v2458_v14 }
0x3d68   :  { %v2889_v4 = vpop.eup %2888 }
0x3d69   :  { %v2441_v1 = vmul.f32 0.6931472, %v2889_v4 }
0x3d6b   :  { %v2453_v40 = vadd.f32 %v2441_v1, %v2385_v58 }
0x3d6d   :  { %v2461_v55 = vsub.f32 %v2364_v29, %v2453_v40  ;;  %v2412_v29 = vmul.f32 1.442695, %v2399_v28 }
0x3d6f   :  { %2469 = vst [vmem:[#allocation7 + $0x18] sm:$0xff] %v2461_v55 }
0x3d89   :  { %v2334_v16 = vpop.permute.xlu1 %2333 }
0x3d8a   :  { %2596 = vmatmul.msk.f32.gmra.mxu1 %vm72_vm0, %v2334_v16 }
0x3db4   :  { %v2383_v17 = vpop.xlane.xlu1 %2382 }
0x3db5   :  { %v2396_v21 = vsub.f32 %v3636_v46, %v2383_v17 }
0x3db7   :  { %v2406_v22 = vmul.f32 1.442695, %v2396_v21 }
0x3dbc   :  { %v2391_v10 = vpop.xlane.xlu1 %2390 }
0x3dbd   :  { %v2400_v18 = vsub.f32 %v3641_v52, %v2391_v10 }
0x3dbf   :  { %v2414_v48 = vmul.f32 1.442695, %v2400_v18 }
0x3dc1   :  { %2890 = vpow2.f32 %v2414_v48 }
0x3dc4   :  { %v2421_v54 = vpop.xlane.xlu1 %2420 }
0x3dc5   :  { %2892 = vlog2.f32 %v2421_v54 }
0x3dc7   :  { %v2891_v50 = vpop.eup %2890 }
0x3dc8   :  { %2430 = vadd.xlane.f32.xlu0 %v2891_v50 }
0x3dcb   :  { %v2893_v56 = vpop.eup %2892 }
0x3dcc   :  { %v2437_v19 = vmul.f32 0.6931472, %v2893_v56  ;;  %v2427_v57 = vpop.xlane.xlu1 %2426 }
0x3dcd   :  { %2894 = vlog2.f32 %v2427_v57 }
0x3dce   :  { %v2451_v53 = vadd.f32 %v2437_v19, %v2381_v24  ;;  %2896 = vpow2.f32 %v2406_v22 }
0x3dcf   :  { %2898 = vpow2.f32 %v2412_v29 }
0x3dd0   :  { %v2459_v20 = vsub.f32 %v3627_v41, %v2451_v53 }
0x3dd2   :  { %2467 = vst [vmem:[#allocation7 + $0x8] sm:$0xff] %v2459_v20 }
0x3dd3   :  { %v2895_v13 = vpop.eup %2894 }
0x3dd4   :  { %v2443_v62 = vmul.f32 0.6931472, %v2895_v13  ;;  %v2897_v30 = vpop.eup %2896 }
0x3dd5   :  { %v2899_v33 = vpop.eup %2898 }
0x3dd6   :  { %v2454_v61 = vadd.f32 %v2443_v62, %v2387_v8 }
0x3dd8   :  { %v2462_v6 = vsub.f32 %v3622_v32, %v2454_v61 }
0x3dda   :  { %2470 = vst [vmem:[#allocation7 + $0x20] sm:$0xff] %v2462_v6 }
0x3e07   :  { %v2375_v25 = vpop.f32.mrf.mxu1 }
0x3e08   :  { %v2376_v26 = vadd.f32 %v3617_v23, %v2375_v25 }
0x3e0a   :  { %2392 = vmax.xlane.f32.xlu2 %v2376_v26 }
0x3e12   :  { %2422 = vadd.xlane.f32.xlu2 %v2897_v30 }
0x3e1a   :  { %2428 = vadd.xlane.f32.xlu2 %v2899_v33 }
0x3e3b   :  { %v2431_v36 = vpop.xlane.xlu0 %2430 }
0x3e3c   :  { %2900 = vlog2.f32 %v2431_v36 }
0x3e42   :  { %v2901_v32 = vpop.eup %2900 }
0x3e43   :  { %v2447_v2 = vmul.f32 0.6931472, %v2901_v32 }
0x3e45   :  { %v2456_v27 = vadd.f32 %v2447_v2, %v2391_v10 }
0x3e47   :  { %v2464_v41 = vsub.f32 %v3641_v52, %v2456_v27 }
0x3e49   :  { %2472 = vst [vmem:[#allocation7 + $0x30] sm:$0xff] %v2464_v41 }
0x3e7d   :  { %v2393_v23 = vpop.xlane.xlu2 %2392 }
0x3e7e   :  { %v2401_v59 = vsub.f32 %v2376_v26, %v2393_v23 }
0x3e80   :  { %v2416_v31 = vmul.f32 1.442695, %v2401_v59 }
0x3e82   :  { %2902 = vpow2.f32 %v2416_v31 }
0x3e85   :  { %v2423_v38 = vpop.xlane.xlu2 %2422 }
0x3e86   :  { %2904 = vlog2.f32 %v2423_v38 }
0x3e88   :  { %v2903_v43 = vpop.eup %2902 }
0x3e89   :  { %2432 = vadd.xlane.f32.xlu1 %v2903_v43 }
0x3e8c   :  { %v2905_v58 = vpop.eup %2904 }
0x3e8d   :  { %v2439_v11 = vmul.f32 0.6931472, %v2905_v58  ;;  %v2429_v5 = vpop.xlane.xlu2 %2428 }
0x3e8e   :  { %2906 = vlog2.f32 %v2429_v5 }
0x3e8f   :  { %v2452_v44 = vadd.f32 %v2439_v11, %v2383_v17 }
0x3e91   :  { %v2460_v34 = vsub.f32 %v3636_v46, %v2452_v44 }
0x3e93   :  { %2468 = vst [vmem:[#allocation7 + $0x10] sm:$0xff] %v2460_v34 }
0x3e94   :  { %v2907_v3 = vpop.eup %2906 }
0x3e95   :  { %v2445_v45 = vmul.f32 0.6931472, %v2907_v3 }
0x3e97   :  { %v2455_v24 = vadd.f32 %v2445_v45, %v3645_v7 }
0x3e99   :  { %v2463_v47 = vsub.f32 %v3631_v42, %v2455_v24 }
0x3e9b   :  { %2471 = vst [vmem:[#allocation7 + $0x28] sm:$0xff] %v2463_v47 }
0x3efc   :  { %v2433_v49 = vpop.xlane.xlu1 %2432 }
0x3efd   :  { %2908 = vlog2.f32 %v2433_v49 }
0x3f03   :  { %v2909_v51 = vpop.eup %2908 }
0x3f04   :  { %v2449_v52 = vmul.f32 0.6931472, %v2909_v51 }
0x3f06   :  { %v2457_v8 = vadd.f32 %v2449_v52, %v2393_v23 }
0x3f08   :  { %v2465_v46 = vsub.f32 %v2376_v26, %v2457_v8 }
0x3f0a   :  { %2473 = vst [vmem:[#allocation7 + $0x38] sm:$0xff] %v2465_v46 }
0x3f0b   :  { %2486 = dma.vmem_to_hbm [thread:$0]  %s2479_s11, 1024, %s2481_s25, [#allocation4], %s2992_s29, %s2992_s29, %s2993_s30  }
0x3f0c   :  { %2989 = dma.done.wait [#allocation4], 1024  }
0x3f0d   :  { %2990 = vsyncadd [#allocation4], 4294966272 }
0x3f0e   :  { %2491 = vsyncpa [#allocation3], 1 }
0x3f0f   :  { %2492 = vsyncpa [#allocation6], 1 }
0x3f10   :  { %2493 = vsyncpa [#allocation4], 1 }

</bundles_post_ra>
